<compile_context>
chip_gen: v7x
topology: tpu7x:2x2x1
jax: 0.10.0
libtpu: 0.0.40
codegen_flags: <defaults>
</compile_context>

<pallas_src>
import math

import jax
import jax.numpy as jnp
from jax.experimental import pallas as pl
from jax.experimental.pallas import tpu as pltpu

# ---------------- model hyper-params (match torch defaults) -----------------
INPUT_WIDTH = 3
OUTPUT_WIDTH = 1
LAYERS = 10
WIDTH = 50
N_MID = LAYERS - 2          # number of middle Linear+ReLU layers

PAD = 128                   # padded hidden feature dim (lane/sublane aligned)
OUT_PAD = 8                 # sublane-padded output rows for the final matmul
TILE_B = 256                # batch tile (lane axis inside the kernel)


# ------------------------------ Pallas kernel -------------------------------
def mlp_kernel(x_ref, w_in_ref, b_in_ref, w_mid_ref, b_mid_ref,
               w_out_ref, b_out_ref, o_ref):
    # ---- first layer (K = 3): three rank-1 updates + bias, then ReLU --------
    x = x_ref[...]                         # (INPUT_WIDTH, TILE_B)
    w_in = w_in_ref[...]                   # (PAD, INPUT_WIDTH)  == W_in^T, zero padded
    h = b_in_ref[...] + w_in[:, 0:1] * x[0:1, :]          # (PAD, TILE_B)
    for k in range(1, INPUT_WIDTH):
        h = h + w_in[:, k:k + 1] * x[k:k + 1, :]
    h = jnp.maximum(h, 0.0)

    # ---- middle layers: Linear + ReLU, statically unrolled -------------------
    for l in range(N_MID):
        h = jnp.dot(w_mid_ref[l], h, preferred_element_type=jnp.float32)
        h = jnp.maximum(h + b_mid_ref[l], 0.0)

    # ---- output layer (output_width == 1): lane-dense (1, TILE_B) row --------
    out = jnp.dot(w_out_ref[...], h, preferred_element_type=jnp.float32)  # (OUT_PAD, TILE_B)
    o_ref[...] = out[0:1, :] + b_out_ref[...]


# --------------------------------- wrapper ----------------------------------
def ffs_pallas(x, params, *, tile_b=TILE_B):
    """x: (B, INPUT_WIDTH) float32 -> (B,) float32 (matches torch FFs.forward)."""
    w_in_t, b_in, w_mid_t, b_mid, w_out_t, b_out = params
    B = x.shape[0]
    b_pad = ((B + tile_b - 1) // tile_b) * tile_b          # pad batch to tile multiple

    # Transposed, batch-on-lanes input; only the real 3 features go through HBM.
    x_t = jnp.zeros((INPUT_WIDTH, b_pad), jnp.float32).at[:, :B].set(x.T)

    n_mid = w_mid_t.shape[0]
    grid = (b_pad // tile_b,)

    out = pl.pallas_call(
        mlp_kernel,
        out_shape=jax.ShapeDtypeStruct((1, b_pad), jnp.float32),
        grid_spec=pltpu.PrefetchScalarGridSpec(
            num_scalar_prefetch=0,
            grid=grid,
            in_specs=[
                pl.BlockSpec((INPUT_WIDTH, tile_b), lambda i: (0, i)),   # x tile (3, TILE_B)
                pl.BlockSpec((PAD, INPUT_WIDTH), lambda i: (0, 0)),      # W_in^T
                pl.BlockSpec((PAD, 1), lambda i: (0, 0)),                # b_in
                pl.BlockSpec((n_mid, PAD, PAD), lambda i: (0, 0, 0)),    # W_mid^T stack
                pl.BlockSpec((n_mid, PAD, 1), lambda i: (0, 0, 0)),      # b_mid stack
                pl.BlockSpec((OUT_PAD, PAD), lambda i: (0, 0)),          # W_out^T (row 0 real)
                pl.BlockSpec((1, 1), lambda i: (0, 0)),                  # b_out
            ],
            out_specs=pl.BlockSpec((1, tile_b), lambda i: (0, i)),       # lane-dense output row
        ),
        compiler_params=pltpu.CompilerParams(
            dimension_semantics=("parallel",)),
    )(x_t, w_in_t, b_in, w_mid_t, b_mid, w_out_t, b_out)

    return out[0, :B]


# --------------------------- parameter construction --------------------------
def init_params(key):
    """Deterministic synthetic weights, stored transposed + zero-padded for the kernel."""
    ks = jax.random.split(key, 2 * LAYERS)

    def linear(kw, kb, fan_in, fan_out):
        bound = 1.0 / math.sqrt(fan_in)
        w = jax.random.uniform(kw, (fan_in, fan_out), jnp.float32, -bound, bound)
        b = jax.random.uniform(kb, (fan_out,), jnp.float32, -bound, bound)
        return w, b

    # first layer: store W_in^T as (PAD, INPUT_WIDTH), bias as (PAD, 1)
    w0, b0 = linear(ks[0], ks[1], INPUT_WIDTH, WIDTH)
    w_in_t = jnp.zeros((PAD, INPUT_WIDTH), jnp.float32).at[:WIDTH, :].set(w0.T)
    b_in = jnp.zeros((PAD, 1), jnp.float32).at[:WIDTH, 0].set(b0)

    # middle layers: store W^T padded to (PAD, PAD), bias (PAD, 1)
    w_mid_list, b_mid_list = [], []
    for l in range(N_MID):
        w, b = linear(ks[2 + 2 * l], ks[3 + 2 * l], WIDTH, WIDTH)
        w_mid_list.append(jnp.zeros((PAD, PAD), jnp.float32).at[:WIDTH, :WIDTH].set(w.T))
        b_mid_list.append(jnp.zeros((PAD, 1), jnp.float32).at[:WIDTH, 0].set(b))
    w_mid_t = jnp.stack(w_mid_list)            # (N_MID, PAD, PAD)
    b_mid = jnp.stack(b_mid_list)              # (N_MID, PAD, 1)

    # output layer: W_out^T in row 0 of an (OUT_PAD, PAD) block, scalar bias as (1, 1)
    w_last, b_last = linear(ks[-2], ks[-1], WIDTH, OUTPUT_WIDTH)
    w_out_t = jnp.zeros((OUT_PAD, PAD), jnp.float32).at[0, :WIDTH].set(w_last[:, 0])
    b_out = b_last.reshape(1, 1)

    return (w_in_t, b_in, w_mid_t, b_mid, w_out_t, b_out)


# ------------------------------ pure-JAX reference ---------------------------
def ffs_ref(x, params):
    """Reference in the natural (batch, feature) layout, matching the torch module."""
    w_in_t, b_in, w_mid_t, b_mid, w_out_t, b_out = params
    hp = jax.lax.Precision.HIGHEST
    h = jnp.maximum(jnp.dot(x, w_in_t[:WIDTH, :].T, precision=hp) + b_in[:WIDTH, 0], 0.0)
    for l in range(w_mid_t.shape[0]):
        h = jnp.maximum(
            jnp.dot(h, w_mid_t[l, :WIDTH, :WIDTH].T, precision=hp) + b_mid[l, :WIDTH, 0], 0.0)
    return jnp.dot(h, w_out_t[0, :WIDTH], precision=hp) + b_out[0, 0]


# ------------------------------------ main -----------------------------------
if __name__ == "__main__":
    key = jax.random.PRNGKey(0)
    kp, kx = jax.random.split(key)

    params = init_params(kp)
    B = 8
    x = jax.random.normal(kx, (B, INPUT_WIDTH), jnp.float32)

    out = jax.block_until_ready(ffs_pallas(x, params))
    ref = jax.block_until_ready(ffs_ref(x, params))

    assert out.shape == (B,), out.shape
    assert jnp.allclose(out, ref, atol=1e-3, rtol=1e-3), (out, ref)
    print("KERNEL_OK")
</pallas_src>

<mosaic_0001>
module attributes {stable_mosaic.version = 11 : i64} {
  func.func @mlp_kernel(%arg0: i32, %arg1: memref<3x256xf32, #tpu.memory_space<vmem>>, %arg2: memref<128x3xf32, #tpu.memory_space<vmem>>, %arg3: memref<128x1xf32, #tpu.memory_space<vmem>>, %arg4: memref<8x128x128xf32, #tpu.memory_space<vmem>>, %arg5: memref<8x128x1xf32, #tpu.memory_space<vmem>>, %arg6: memref<8x128xf32, #tpu.memory_space<vmem>>, %arg7: memref<1x1xf32, #tpu.memory_space<vmem>>, %arg8: memref<1x256xf32, #tpu.memory_space<vmem>>) attributes {dimension_semantics = [#tpu.dimension_semantics<parallel>], iteration_bounds = array<i64: 1>, scalar_prefetch = 0 : i64, scratch_operands = 0 : i64, tpu.core_type = #tpu.core_type<tc>, window_params = [{transform_indices = @transform_0, window_bounds = array<i64: 3, 256>}, {pipeline_mode = #tpu.pipeline_mode<synchronous>, transform_indices = @transform_1, window_bounds = array<i64: 128, 3>}, {pipeline_mode = #tpu.pipeline_mode<synchronous>, transform_indices = @transform_2, window_bounds = array<i64: 128, 1>}, {pipeline_mode = #tpu.pipeline_mode<synchronous>, transform_indices = @transform_3, window_bounds = array<i64: 8, 128, 128>}, {pipeline_mode = #tpu.pipeline_mode<synchronous>, transform_indices = @transform_4, window_bounds = array<i64: 8, 128, 1>}, {pipeline_mode = #tpu.pipeline_mode<synchronous>, transform_indices = @transform_5, window_bounds = array<i64: 8, 128>}, {pipeline_mode = #tpu.pipeline_mode<synchronous>, transform_indices = @transform_6, window_bounds = array<i64: 1, 1>}, {transform_indices = @transform_7, window_bounds = array<i64: 1, 256>}]} {
    %c0 = arith.constant 0 : index
    %c0_0 = arith.constant 0 : index
    %0 = vector.load %arg1[%c0, %c0_0] : memref<3x256xf32, #tpu.memory_space<vmem>>, vector<3x256xf32>
    %c0_1 = arith.constant 0 : index
    %c0_2 = arith.constant 0 : index
    %1 = vector.load %arg2[%c0_1, %c0_2] : memref<128x3xf32, #tpu.memory_space<vmem>>, vector<128x3xf32>
    %c0_3 = arith.constant 0 : index
    %c0_4 = arith.constant 0 : index
    %2 = vector.load %arg3[%c0_3, %c0_4] : memref<128x1xf32, #tpu.memory_space<vmem>>, vector<128x1xf32>
    %3 = vector.extract_strided_slice %1 {offsets = [0, 0], sizes = [128, 1], strides = [1, 1]} : vector<128x3xf32> to vector<128x1xf32>
    %4 = vector.extract_strided_slice %0 {offsets = [0, 0], sizes = [1, 256], strides = [1, 1]} : vector<3x256xf32> to vector<1x256xf32>
    %5 = vector.broadcast %3 : vector<128x1xf32> to vector<128x256xf32>
    %6 = vector.broadcast %4 : vector<1x256xf32> to vector<128x256xf32>
    %7 = arith.mulf %5, %6 : vector<128x256xf32>
    %8 = vector.broadcast %2 : vector<128x1xf32> to vector<128x256xf32>
    %9 = arith.addf %8, %7 : vector<128x256xf32>
    %10 = vector.extract_strided_slice %1 {offsets = [0, 1], sizes = [128, 1], strides = [1, 1]} : vector<128x3xf32> to vector<128x1xf32>
    %11 = vector.extract_strided_slice %0 {offsets = [1, 0], sizes = [1, 256], strides = [1, 1]} : vector<3x256xf32> to vector<1x256xf32>
    %12 = vector.broadcast %10 : vector<128x1xf32> to vector<128x256xf32>
    %13 = vector.broadcast %11 : vector<1x256xf32> to vector<128x256xf32>
    %14 = arith.mulf %12, %13 : vector<128x256xf32>
    %15 = arith.addf %9, %14 : vector<128x256xf32>
    %16 = vector.extract_strided_slice %1 {offsets = [0, 2], sizes = [128, 1], strides = [1, 1]} : vector<128x3xf32> to vector<128x1xf32>
    %17 = vector.extract_strided_slice %0 {offsets = [2, 0], sizes = [1, 256], strides = [1, 1]} : vector<3x256xf32> to vector<1x256xf32>
    %18 = vector.broadcast %16 : vector<128x1xf32> to vector<128x256xf32>
    %19 = vector.broadcast %17 : vector<1x256xf32> to vector<128x256xf32>
    %20 = arith.mulf %18, %19 : vector<128x256xf32>
    %21 = arith.addf %15, %20 : vector<128x256xf32>
    %cst = arith.constant 0.000000e+00 : f32
    %22 = vector.broadcast %cst : f32 to vector<128x256xf32>
    %23 = arith.maximumf %21, %22 : vector<128x256xf32>
    %c0_5 = arith.constant 0 : index
    %c0_6 = arith.constant 0 : index
    %c0_7 = arith.constant 0 : index
    %24 = vector.load %arg4[%c0_5, %c0_6, %c0_7] : memref<8x128x128xf32, #tpu.memory_space<vmem>>, vector<1x128x128xf32>
    %25 = vector.shape_cast %24 : vector<1x128x128xf32> to vector<128x128xf32>
    %cst_8 = arith.constant dense<0.000000e+00> : vector<128x256xf32>
    %26 = tpu.matmul %25, %23, %cst_8 {dimension_numbers = #tpu.dot_dimension_numbers<[1], [0], [0], [1], [0, 0, 1, 1], [], []>} : vector<128x128xf32>, vector<128x256xf32>, vector<128x256xf32> -> vector<128x256xf32>
    %c0_9 = arith.constant 0 : index
    %c0_10 = arith.constant 0 : index
    %c0_11 = arith.constant 0 : index
    %27 = vector.load %arg5[%c0_9, %c0_10, %c0_11] : memref<8x128x1xf32, #tpu.memory_space<vmem>>, vector<1x128x1xf32>
    %28 = vector.shape_cast %27 : vector<1x128x1xf32> to vector<128x1xf32>
    %29 = vector.broadcast %28 : vector<128x1xf32> to vector<128x256xf32>
    %30 = arith.addf %26, %29 : vector<128x256xf32>
    %cst_12 = arith.constant 0.000000e+00 : f32
    %31 = vector.broadcast %cst_12 : f32 to vector<128x256xf32>
    %32 = arith.maximumf %30, %31 : vector<128x256xf32>
    %c1 = arith.constant 1 : index
    %c0_13 = arith.constant 0 : index
    %c0_14 = arith.constant 0 : index
    %33 = vector.load %arg4[%c1, %c0_13, %c0_14] : memref<8x128x128xf32, #tpu.memory_space<vmem>>, vector<1x128x128xf32>
    %34 = vector.shape_cast %33 : vector<1x128x128xf32> to vector<128x128xf32>
    %cst_15 = arith.constant dense<0.000000e+00> : vector<128x256xf32>
    %35 = tpu.matmul %34, %32, %cst_15 {dimension_numbers = #tpu.dot_dimension_numbers<[1], [0], [0], [1], [0, 0, 1, 1], [], []>} : vector<128x128xf32>, vector<128x256xf32>, vector<128x256xf32> -> vector<128x256xf32>
    %c1_16 = arith.constant 1 : index
    %c0_17 = arith.constant 0 : index
    %c0_18 = arith.constant 0 : index
    %36 = vector.load %arg5[%c1_16, %c0_17, %c0_18] : memref<8x128x1xf32, #tpu.memory_space<vmem>>, vector<1x128x1xf32>
    %37 = vector.shape_cast %36 : vector<1x128x1xf32> to vector<128x1xf32>
    %38 = vector.broadcast %37 : vector<128x1xf32> to vector<128x256xf32>
    %39 = arith.addf %35, %38 : vector<128x256xf32>
    %cst_19 = arith.constant 0.000000e+00 : f32
    %40 = vector.broadcast %cst_19 : f32 to vector<128x256xf32>
    %41 = arith.maximumf %39, %40 : vector<128x256xf32>
    %c2 = arith.constant 2 : index
    %c0_20 = arith.constant 0 : index
    %c0_21 = arith.constant 0 : index
    %42 = vector.load %arg4[%c2, %c0_20, %c0_21] : memref<8x128x128xf32, #tpu.memory_space<vmem>>, vector<1x128x128xf32>
    %43 = vector.shape_cast %42 : vector<1x128x128xf32> to vector<128x128xf32>
    %cst_22 = arith.constant dense<0.000000e+00> : vector<128x256xf32>
    %44 = tpu.matmul %43, %41, %cst_22 {dimension_numbers = #tpu.dot_dimension_numbers<[1], [0], [0], [1], [0, 0, 1, 1], [], []>} : vector<128x128xf32>, vector<128x256xf32>, vector<128x256xf32> -> vector<128x256xf32>
    %c2_23 = arith.constant 2 : index
    %c0_24 = arith.constant 0 : index
    %c0_25 = arith.constant 0 : index
    %45 = vector.load %arg5[%c2_23, %c0_24, %c0_25] : memref<8x128x1xf32, #tpu.memory_space<vmem>>, vector<1x128x1xf32>
    %46 = vector.shape_cast %45 : vector<1x128x1xf32> to vector<128x1xf32>
    %47 = vector.broadcast %46 : vector<128x1xf32> to vector<128x256xf32>
    %48 = arith.addf %44, %47 : vector<128x256xf32>
    %cst_26 = arith.constant 0.000000e+00 : f32
    %49 = vector.broadcast %cst_26 : f32 to vector<128x256xf32>
    %50 = arith.maximumf %48, %49 : vector<128x256xf32>
    %c3 = arith.constant 3 : index
    %c0_27 = arith.constant 0 : index
    %c0_28 = arith.constant 0 : index
    %51 = vector.load %arg4[%c3, %c0_27, %c0_28] : memref<8x128x128xf32, #tpu.memory_space<vmem>>, vector<1x128x128xf32>
    %52 = vector.shape_cast %51 : vector<1x128x128xf32> to vector<128x128xf32>
    %cst_29 = arith.constant dense<0.000000e+00> : vector<128x256xf32>
    %53 = tpu.matmul %52, %50, %cst_29 {dimension_numbers = #tpu.dot_dimension_numbers<[1], [0], [0], [1], [0, 0, 1, 1], [], []>} : vector<128x128xf32>, vector<128x256xf32>, vector<128x256xf32> -> vector<128x256xf32>
    %c3_30 = arith.constant 3 : index
    %c0_31 = arith.constant 0 : index
    %c0_32 = arith.constant 0 : index
    %54 = vector.load %arg5[%c3_30, %c0_31, %c0_32] : memref<8x128x1xf32, #tpu.memory_space<vmem>>, vector<1x128x1xf32>
    %55 = vector.shape_cast %54 : vector<1x128x1xf32> to vector<128x1xf32>
    %56 = vector.broadcast %55 : vector<128x1xf32> to vector<128x256xf32>
    %57 = arith.addf %53, %56 : vector<128x256xf32>
    %cst_33 = arith.constant 0.000000e+00 : f32
    %58 = vector.broadcast %cst_33 : f32 to vector<128x256xf32>
    %59 = arith.maximumf %57, %58 : vector<128x256xf32>
    %c4 = arith.constant 4 : index
    %c0_34 = arith.constant 0 : index
    %c0_35 = arith.constant 0 : index
    %60 = vector.load %arg4[%c4, %c0_34, %c0_35] : memref<8x128x128xf32, #tpu.memory_space<vmem>>, vector<1x128x128xf32>
    %61 = vector.shape_cast %60 : vector<1x128x128xf32> to vector<128x128xf32>
    %cst_36 = arith.constant dense<0.000000e+00> : vector<128x256xf32>
    %62 = tpu.matmul %61, %59, %cst_36 {dimension_numbers = #tpu.dot_dimension_numbers<[1], [0], [0], [1], [0, 0, 1, 1], [], []>} : vector<128x128xf32>, vector<128x256xf32>, vector<128x256xf32> -> vector<128x256xf32>
    %c4_37 = arith.constant 4 : index
    %c0_38 = arith.constant 0 : index
    %c0_39 = arith.constant 0 : index
    %63 = vector.load %arg5[%c4_37, %c0_38, %c0_39] : memref<8x128x1xf32, #tpu.memory_space<vmem>>, vector<1x128x1xf32>
    %64 = vector.shape_cast %63 : vector<1x128x1xf32> to vector<128x1xf32>
    %65 = vector.broadcast %64 : vector<128x1xf32> to vector<128x256xf32>
    %66 = arith.addf %62, %65 : vector<128x256xf32>
    %cst_40 = arith.constant 0.000000e+00 : f32
    %67 = vector.broadcast %cst_40 : f32 to vector<128x256xf32>
    %68 = arith.maximumf %66, %67 : vector<128x256xf32>
    %c5 = arith.constant 5 : index
    %c0_41 = arith.constant 0 : index
    %c0_42 = arith.constant 0 : index
    %69 = vector.load %arg4[%c5, %c0_41, %c0_42] : memref<8x128x128xf32, #tpu.memory_space<vmem>>, vector<1x128x128xf32>
    %70 = vector.shape_cast %69 : vector<1x128x128xf32> to vector<128x128xf32>
    %cst_43 = arith.constant dense<0.000000e+00> : vector<128x256xf32>
    %71 = tpu.matmul %70, %68, %cst_43 {dimension_numbers = #tpu.dot_dimension_numbers<[1], [0], [0], [1], [0, 0, 1, 1], [], []>} : vector<128x128xf32>, vector<128x256xf32>, vector<128x256xf32> -> vector<128x256xf32>
    %c5_44 = arith.constant 5 : index
    %c0_45 = arith.constant 0 : index
    %c0_46 = arith.constant 0 : index
    %72 = vector.load %arg5[%c5_44, %c0_45, %c0_46] : memref<8x128x1xf32, #tpu.memory_space<vmem>>, vector<1x128x1xf32>
    %73 = vector.shape_cast %72 : vector<1x128x1xf32> to vector<128x1xf32>
    %74 = vector.broadcast %73 : vector<128x1xf32> to vector<128x256xf32>
    %75 = arith.addf %71, %74 : vector<128x256xf32>
    %cst_47 = arith.constant 0.000000e+00 : f32
    %76 = vector.broadcast %cst_47 : f32 to vector<128x256xf32>
    %77 = arith.maximumf %75, %76 : vector<128x256xf32>
    %c6 = arith.constant 6 : index
    %c0_48 = arith.constant 0 : index
    %c0_49 = arith.constant 0 : index
    %78 = vector.load %arg4[%c6, %c0_48, %c0_49] : memref<8x128x128xf32, #tpu.memory_space<vmem>>, vector<1x128x128xf32>
    %79 = vector.shape_cast %78 : vector<1x128x128xf32> to vector<128x128xf32>
    %cst_50 = arith.constant dense<0.000000e+00> : vector<128x256xf32>
    %80 = tpu.matmul %79, %77, %cst_50 {dimension_numbers = #tpu.dot_dimension_numbers<[1], [0], [0], [1], [0, 0, 1, 1], [], []>} : vector<128x128xf32>, vector<128x256xf32>, vector<128x256xf32> -> vector<128x256xf32>
    %c6_51 = arith.constant 6 : index
    %c0_52 = arith.constant 0 : index
    %c0_53 = arith.constant 0 : index
    %81 = vector.load %arg5[%c6_51, %c0_52, %c0_53] : memref<8x128x1xf32, #tpu.memory_space<vmem>>, vector<1x128x1xf32>
    %82 = vector.shape_cast %81 : vector<1x128x1xf32> to vector<128x1xf32>
    %83 = vector.broadcast %82 : vector<128x1xf32> to vector<128x256xf32>
    %84 = arith.addf %80, %83 : vector<128x256xf32>
    %cst_54 = arith.constant 0.000000e+00 : f32
    %85 = vector.broadcast %cst_54 : f32 to vector<128x256xf32>
    %86 = arith.maximumf %84, %85 : vector<128x256xf32>
    %c7 = arith.constant 7 : index
    %c0_55 = arith.constant 0 : index
    %c0_56 = arith.constant 0 : index
    %87 = vector.load %arg4[%c7, %c0_55, %c0_56] : memref<8x128x128xf32, #tpu.memory_space<vmem>>, vector<1x128x128xf32>
    %88 = vector.shape_cast %87 : vector<1x128x128xf32> to vector<128x128xf32>
    %cst_57 = arith.constant dense<0.000000e+00> : vector<128x256xf32>
    %89 = tpu.matmul %88, %86, %cst_57 {dimension_numbers = #tpu.dot_dimension_numbers<[1], [0], [0], [1], [0, 0, 1, 1], [], []>} : vector<128x128xf32>, vector<128x256xf32>, vector<128x256xf32> -> vector<128x256xf32>
    %c7_58 = arith.constant 7 : index
    %c0_59 = arith.constant 0 : index
    %c0_60 = arith.constant 0 : index
    %90 = vector.load %arg5[%c7_58, %c0_59, %c0_60] : memref<8x128x1xf32, #tpu.memory_space<vmem>>, vector<1x128x1xf32>
    %91 = vector.shape_cast %90 : vector<1x128x1xf32> to vector<128x1xf32>
    %92 = vector.broadcast %91 : vector<128x1xf32> to vector<128x256xf32>
    %93 = arith.addf %89, %92 : vector<128x256xf32>
    %cst_61 = arith.constant 0.000000e+00 : f32
    %94 = vector.broadcast %cst_61 : f32 to vector<128x256xf32>
    %95 = arith.maximumf %93, %94 : vector<128x256xf32>
    %c0_62 = arith.constant 0 : index
    %c0_63 = arith.constant 0 : index
    %96 = vector.load %arg6[%c0_62, %c0_63] : memref<8x128xf32, #tpu.memory_space<vmem>>, vector<8x128xf32>
    %cst_64 = arith.constant dense<0.000000e+00> : vector<8x256xf32>
    %97 = tpu.matmul %96, %95, %cst_64 {dimension_numbers = #tpu.dot_dimension_numbers<[1], [0], [0], [1], [0, 0, 1, 1], [], []>} : vector<8x128xf32>, vector<128x256xf32>, vector<8x256xf32> -> vector<8x256xf32>
    %98 = vector.extract_strided_slice %97 {offsets = [0, 0], sizes = [1, 256], strides = [1, 1]} : vector<8x256xf32> to vector<1x256xf32>
    %c0_65 = arith.constant 0 : index
    %c0_66 = arith.constant 0 : index
    %99 = vector.load %arg7[%c0_65, %c0_66] : memref<1x1xf32, #tpu.memory_space<vmem>>, vector<1x1xf32>
    %100 = vector.broadcast %99 : vector<1x1xf32> to vector<1x256xf32>
    %101 = arith.addf %98, %100 : vector<1x256xf32>
    %c0_67 = arith.constant 0 : index
    %c0_68 = arith.constant 0 : index
    %102 = vector.load %arg8[%c0_67, %c0_68] : memref<1x256xf32, #tpu.memory_space<vmem>>, vector<1x256xf32>
    tpu.vector_store %arg8[%c0_67, %c0_68], %101 {strides = array<i32>} : memref<1x256xf32, #tpu.memory_space<vmem>>, vector<1x256xf32>,
    return
  }
  func.func @transform_0(%arg0: i32) -> (i32, i32) {
    %c0_i32 = arith.constant 0 : i32
    %c0_i32_0 = arith.constant 0 : i32
    return %c0_i32, %arg0 : i32, i32
  }
  func.func @transform_1(%arg0: i32) -> (i32, i32) {
    %c0_i32 = arith.constant 0 : i32
    %c0_i32_0 = arith.constant 0 : i32
    %c0_i32_1 = arith.constant 0 : i32
    return %c0_i32, %c0_i32_0 : i32, i32
  }
  func.func @transform_2(%arg0: i32) -> (i32, i32) {
    %c0_i32 = arith.constant 0 : i32
    %c0_i32_0 = arith.constant 0 : i32
    %c0_i32_1 = arith.constant 0 : i32
    return %c0_i32, %c0_i32_0 : i32, i32
  }
  func.func @transform_3(%arg0: i32) -> (i32, i32, i32) {
    %c0_i32 = arith.constant 0 : i32
    %c0_i32_0 = arith.constant 0 : i32
    %c0_i32_1 = arith.constant 0 : i32
    %c0_i32_2 = arith.constant 0 : i32
    return %c0_i32, %c0_i32_0, %c0_i32_1 : i32, i32, i32
  }
  func.func @transform_4(%arg0: i32) -> (i32, i32, i32) {
    %c0_i32 = arith.constant 0 : i32
    %c0_i32_0 = arith.constant 0 : i32
    %c0_i32_1 = arith.constant 0 : i32
    %c0_i32_2 = arith.constant 0 : i32
    return %c0_i32, %c0_i32_0, %c0_i32_1 : i32, i32, i32
  }
  func.func @transform_5(%arg0: i32) -> (i32, i32) {
    %c0_i32 = arith.constant 0 : i32
    %c0_i32_0 = arith.constant 0 : i32
    %c0_i32_1 = arith.constant 0 : i32
    return %c0_i32, %c0_i32_0 : i32, i32
  }
  func.func @transform_6(%arg0: i32) -> (i32, i32) {
    %c0_i32 = arith.constant 0 : i32
    %c0_i32_0 = arith.constant 0 : i32
    %c0_i32_1 = arith.constant 0 : i32
    return %c0_i32, %c0_i32_0 : i32, i32
  }
  func.func @transform_7(%arg0: i32) -> (i32, i32) {
    %c0_i32 = arith.constant 0 : i32
    %c0_i32_0 = arith.constant 0 : i32
    return %c0_i32, %arg0 : i32, i32
  }
}

</mosaic_0001>

<bundles_post_ra>
// kernel: tpu_custom_call.1
= control target key start
LH: loop header
LB: loop body
LE: loop exit
PB: predicated region body
PF: predicated region fallthrough
CT: control target
= control target key end

     0   :  { %s5309_s0 = inlined_call_operand.vmem [shape: f32[3,256], index: 0, kind: input, shape index: {}]   ;;  %s5310_s1 = inlined_call_operand.vmem [shape: f32[128,3], index: 1, kind: input, shape index: {}]   ;;  %s5311_s2 = inlined_call_operand.vmem [shape: f32[128,1], index: 2, kind: input, shape index: {}]   ;;  %s5312_s3 = inlined_call_operand.vmem [shape: f32[8,128,128], index: 3, kind: input, shape index: {}]   ;;  %s5313_s4 = inlined_call_operand.vmem [shape: f32[8,128,1], index: 4, kind: input, shape index: {}]   ;;  %s5314_s5 = inlined_call_operand.vmem [shape: f32[8,128], index: 5, kind: input, shape index: {}]   ;;  %s5315_s6 = inlined_call_operand.<no memory space> [shape: f32[1,1], index: 6, kind: input, shape index: {}]   ;;  %s5316_s7 = inlined_call_operand.hbm [shape: f32[1,256], index: 7, kind: output, shape index: {}]  }
   0x1   :  { %v12_v0 = vstv %s5315_s6 }
   0x2   :  { %13 = vst [vmem:[#allocation2] sm:$0x1] %v12_v0 }
   0x3   :  { %v46_v1 = vld [vmem:[%s5311_s2] sm:$0xff]  ;;  %v3782_v3 = vmov 0   ;;  %v47_v4 = vld [vmem:[%s5311_s2 + $0x8] sm:$0xff]  ;;  %v33_v6 = vld [vmem:[%s5310_s1 + $0x18] sm:$0xff]  ;;  %v3783_v7 = vmov 1  }
   0x4   :  { %v3837_v2 = vld [vmem:[%s5310_s1] sm:$0xff]  ;;  %3723 = vset.pattern.permute.xlu1 %v3782_v3  ;;  %3722 = vset.pattern.permute.xlu0 %v3782_v3  ;;  %v31_v5 = vld [vmem:[%s5310_s1 + $0x8] sm:$0xff] }
   0x5   :  { %195 = vperm.xlu1 %3723, %v46_v1   ;;  %64 = vperm.xlu0 %3722, %v3837_v2  }
   0x9   :  { %200 = vperm.xlu1 %3723, %v47_v4   ;;  %69 = vperm.xlu0 %3722, %v31_v5  }
   0xd   :  { %3724 = vset.pattern.permute.xlu1 %v3783_v7  ;;  %79 = vperm.xlu0 %3722, %v33_v6  }
   0xe   :  { %14 = vsyncpa [#allocation4], 0  ;;  %310 = vperm.xlu1 %3724, %v31_v5   ;;  %v48_v8 = vld [vmem:[%s5311_s2 + $0x10] sm:$0xff]  ;;  %v35_v10 = vld [vmem:[%s5310_s1 + $0x28] sm:$0xff]  ;;  %v3784_v12 = vmov 2   ;;  %s3787_s13 = smov [#allocation3]  }
   0xf   :  { %v32_v9 = vld [vmem:[%s5310_s1 + $0x10] sm:$0xff]  ;;  %v50_v11 = vld [vmem:[%s5311_s2 + $0x20] sm:$0xff]  ;;  %v3870_v13 = vld [vmem:[%s5310_s1 + $0x38] sm:$0xff] }
  0x10   :  { %v49_v14 = vld [vmem:[%s5311_s2 + $0x18] sm:$0xff]  ;;  %v52_v15 = vld [vmem:[%s5311_s2 + $0x30] sm:$0xff]  ;;  %v3883_v16 = vld [vmem:[%s5310_s1 + $0x48] sm:$0xff] }
  0x11   :  { %205 = vperm.xlu0 %3722, %v48_v8   ;;  %v54_v17 = vld [vmem:[%s5311_s2 + $0x40] sm:$0xff]  ;;  %v3897_v19 = vld [vmem:[%s5310_s1 + $0x58] sm:$0xff]  ;;  %v56_v20 = vld [vmem:[%s5311_s2 + $0x50] sm:$0xff] }
  0x12   :  { %3725 = vset.pattern.permute.xlu1 %v3782_v3  ;;  %v34_v18 = vld [vmem:[%s5310_s1 + $0x20] sm:$0xff]  ;;  %v3907_v21 = vld [vmem:[%s5310_s1 + $0x68] sm:$0xff]  ;;  %v3920_v24 = vld [vmem:[%s5310_s1 + $0x78] sm:$0xff] }
  0x13   :  { %74 = vperm.xlu1 %3725, %v32_v9   ;;  %v51_v22 = vld [vmem:[%s5311_s2 + $0x28] sm:$0xff]  ;;  %v58_v23 = vld [vmem:[%s5311_s2 + $0x60] sm:$0xff]  ;;  %v60_v25 = vld [vmem:[%s5311_s2 + $0x70] sm:$0xff] }
  0x14   :  { %v36_v26 = vld [vmem:[%s5310_s1 + $0x30] sm:$0xff]  ;;  %v53_v27 = vld [vmem:[%s5311_s2 + $0x38] sm:$0xff]  ;;  %v38_v28 = vld [vmem:[%s5310_s1 + $0x40] sm:$0xff] }
  0x15   :  { %89 = vperm.xlu0 %3722, %v35_v10   ;;  %v40_v29 = vld [vmem:[%s5310_s1 + $0x50] sm:$0xff]  ;;  %v3950_v30 = vld [vmem:[%s5310_s1 + $0x60] sm:$0xff]  ;;  %v55_v32 = vld [vmem:[%s5311_s2 + $0x48] sm:$0xff] }
  0x16   :  { %v3957_v31 = vld [vmem:[%s5310_s1 + $0x70] sm:$0xff]  ;;  %v650_v34 = vld [vmem:[%s5313_s4 + $0x28] sm:$0xff]  ;;  %v652_v35 = vld [vmem:[%s5313_s4 + $0x38] sm:$0xff]  ;;  %s3196_s1 = sshll.u32 %s3787_s13, 4  ;;  %s3197_s1 = int_to_ptr.vmem [resolvable:$true] %s3196_s1 }
  0x17   :  { %3726 = vset.pattern.permute.xlu1 %v3784_v12  ;;  %v647_v33 = vld [vmem:[%s5313_s4 + $0x10] sm:$0xff]  ;;  %v654_v36 = vld [vmem:[%s5313_s4 + $0x48] sm:$0xff]  ;;  %v656_v37 = vld [vmem:[%s5313_s4 + $0x58] sm:$0xff]  ;;  %p3763_p1 = scmp.lt.s32.totalorder %s3197_s1, %s3197_s1 }
  0x18   :  { %452 = vperm.xlu1 %3726, %v3837_v2   ;;  %v658_v38 = vld [vmem:[%s5313_s4 + $0x68] sm:$0xff]  ;;  %v57_v39 = vld [vmem:[%s5311_s2 + $0x58] sm:$0xff] }
  0x19   :  { %215 = vperm.xlu0 %3722, %v50_v11   ;;  %v660_v40 = vld [vmem:[%s5313_s4 + $0x78] sm:$0xff]  ;;  %v3221_v43 = vld [vmem:[%s5313_s4 + $0x88] sm:$0xff] }
  0x1a   :  { %v3223_v46 = vld [vmem:[%s5313_s4 + $0x98] sm:$0xff]  ;;  %v3225_v49 = vld [vmem:[%s5313_s4 + $0xa8] sm:$0xff] }
  0x1b   :  { %v3227_v51 = vld [vmem:[%s5313_s4 + $0xb8] sm:$0xff]  ;;  %v3229_v54 = vld [vmem:[%s5313_s4 + $0xc8] sm:$0xff] }
  0x1c   :  { %456 = vperm.xlu1 %3726, %v31_v5   ;;  %v59_v55 = vld [vmem:[%s5311_s2 + $0x68] sm:$0xff]  ;;  %v3231_v58 = vld [vmem:[%s5313_s4 + $0xd8] sm:$0xff]  ;;  %v143_v5 = vlaneseq }
  0x1d   :  { %99 = vperm.xlu0 %3722, %v3870_v13   ;;  %v3233_v61 = vld [vmem:[%s5313_s4 + $0xe8] sm:$0xff]  ;;  %v3235_v0 = vld [vmem:[%s5313_s4 + $0xf8] sm:$0xff] }
  0x1e   :  { %v3253_v4 = vld [vmem:[%s5313_s4 + $0x108] sm:$0xff]  ;;  %v3255_v8 = vld [vmem:[%s5313_s4 + $0x118] sm:$0xff]  ;;  %vm3187_vm0 = vcmp.lt.s32.totalorder %v143_v5, 256 }
  0x20   :  { %3727 = vset.pattern.permute.xlu1 %v3782_v3 }
  0x21   :  { %210 = vperm.xlu1 %3727, %v49_v14   ;;  %225 = vperm.xlu0 %3722, %v52_v15   ;;  %v61_v14 = vld [vmem:[%s5311_s2 + $0x78] sm:$0xff] }
  0x25   :  { %3728 = vset.pattern.permute.xlu1 %v3783_v7  ;;  %109 = vperm.xlu0 %3722, %v3883_v16  }
  0x26   :  { %318 = vperm.xlu1 %3728, %v33_v6  }
  0x29   :  { %235 = vperm.xlu0 %3722, %v54_v17  }
  0x2a   :  { %3729 = vset.pattern.permute.xlu1 %v3782_v3 }
  0x2b   :  { %84 = vperm.xlu1 %3729, %v34_v18  }
  0x2d   :  { %119 = vperm.xlu0 %3722, %v3897_v19  }
  0x2f   :  { %3730 = vset.pattern.permute.xlu1 %v3784_v12 }
  0x30   :  { %460 = vperm.xlu1 %3730, %v32_v9  }
  0x31   :  { %245 = vperm.xlu0 %3722, %v56_v20  }
  0x34   :  { %464 = vperm.xlu1 %3730, %v33_v6  }
  0x35   :  { %129 = vperm.xlu0 %3722, %v3907_v21  }
  0x38   :  { %3731 = vset.pattern.permute.xlu1 %v3782_v3 }
  0x39   :  { %220 = vperm.xlu1 %3731, %v51_v22   ;;  %255 = vperm.xlu0 %3722, %v58_v23   ;;  %v3259_v22 = vld [vmem:[%s5313_s4 + $0x138] sm:$0xff] }
  0x3d   :  { %3732 = vset.pattern.permute.xlu1 %v3783_v7  ;;  %139 = vperm.xlu0 %3722, %v3920_v24  }
  0x3e   :  { %326 = vperm.xlu1 %3732, %v35_v10  }
  0x41   :  { %265 = vperm.xlu0 %3722, %v60_v25  }
  0x42   :  { %3733 = vset.pattern.permute.xlu1 %v3782_v3 }
  0x43   :  { %94 = vperm.xlu1 %3733, %v36_v26  }
  0x45   :  { %3751 = vset.pattern.permute.xlu0 %v3783_v7 }
  0x46   :  { %306 = vperm.xlu0 %3751, %v3837_v2  }
  0x47   :  { %3734 = vset.pattern.permute.xlu1 %v3784_v12 }
  0x48   :  { %468 = vperm.xlu1 %3734, %v34_v18  }
  0x4a   :  { %314 = vperm.xlu0 %3751, %v32_v9  }
  0x4c   :  { %472 = vperm.xlu1 %3734, %v35_v10   ;;  %v4083_v10 = vshrl.u32 %v143_v5, 7 }
  0x4e   :  { %322 = vperm.xlu0 %3751, %v34_v18   ;;  %v4095_v15 = vsub.s32 0, %v4083_v10  ;;  %v29_v18 = vld [vmem:[%s5309_s0] sm:$0x77]  ;;  %v375_v20 = vsub.s32 5, %v4083_v10 }
  0x50   :  { %3735 = vset.pattern.permute.xlu1 %v3782_v3  ;;  %v146_v23 = vrot.slane %v29_v18, %v4095_v15 }
  0x51   :  { %230 = vperm.xlu1 %3735, %v53_v27  }
  0x52   :  { %330 = vperm.xlu0 %3751, %v36_v26  }
  0x55   :  { %3736 = vset.pattern.permute.xlu1 %v3783_v7 }
  0x56   :  { %334 = vperm.xlu1 %3736, %v3870_v13   ;;  %338 = vperm.xlu0 %3751, %v38_v28  }
  0x5a   :  { %3737 = vset.pattern.permute.xlu1 %v3782_v3  ;;  %346 = vperm.xlu0 %3751, %v40_v29  }
  0x5b   :  { %104 = vperm.xlu1 %3737, %v38_v28  }
  0x5e   :  { %354 = vperm.xlu0 %3751, %v3950_v30  }
  0x5f   :  { %3738 = vset.pattern.permute.xlu1 %v3784_v12 }
  0x60   :  { %476 = vperm.xlu1 %3738, %v36_v26  }
  0x62   :  { %362 = vperm.xlu0 %3751, %v3957_v31  }
  0x64   :  { %480 = vperm.xlu1 %3738, %v3870_v13   ;;  %v3257_v13 = vld [vmem:[%s5313_s4 + $0x128] sm:$0xff] }
  0x66   :  { %3755 = vset.pattern.permute.xlu0 %v3784_v12 }
  0x67   :  { %512 = vperm.xlu0 %3755, %v3920_v24  }
  0x68   :  { %3739 = vset.pattern.permute.xlu1 %v3782_v3 }
  0x69   :  { %240 = vperm.xlu1 %3739, %v55_v32  }
  0x6b   :  { %3757 = vset.pattern.permute.xlu0 %v3782_v3 }
  0x6c   :  { %673 = vperm.xlu0 %3757, %v647_v33   ;;  %v3261_v33 = vld [vmem:[%s5313_s4 + $0x148] sm:$0xff] }
  0x6d   :  { %3740 = vset.pattern.permute.xlu1 %v3783_v7 }
  0x6e   :  { %342 = vperm.xlu1 %3740, %v3883_v16  }
  0x70   :  { %688 = vperm.xlu0 %3757, %v650_v34   ;;  %v4124_v34 = vrot.slane %v146_v23, %v4095_v15 }
  0x72   :  { %3741 = vset.pattern.permute.xlu1 %v3782_v3 }
  0x73   :  { %114 = vperm.xlu1 %3741, %v40_v29  }
  0x74   :  { %698 = vperm.xlu0 %3757, %v652_v35  }
  0x77   :  { %3742 = vset.pattern.permute.xlu1 %v3784_v12 }
  0x78   :  { %484 = vperm.xlu1 %3742, %v38_v28   ;;  %708 = vperm.xlu0 %3757, %v654_v36   ;;  %v376_v28 = vrot.slane %v29_v18, %v375_v20 }
  0x7c   :  { %488 = vperm.xlu1 %3742, %v3883_v16   ;;  %718 = vperm.xlu0 %3757, %v656_v37   ;;  %v149_v16 = vsub.s32 4, %v4083_v10 }
  0x7e   :  { %v150_v25 = vrot.slane %v29_v18, %v149_v16 }
  0x80   :  { %3743 = vset.pattern.permute.xlu1 %v3782_v3  ;;  %728 = vperm.xlu0 %3757, %v658_v38   ;;  %v4127_v35 = vrot.slane %v150_v25, %v4095_v15 }
  0x81   :  { %250 = vperm.xlu1 %3743, %v57_v39  }
  0x84   :  { %v3998_v41 = vpop.permute.xlu1 %195  ;;  %v4000_v42 = vpop.permute.xlu0 %64  ;;  %738 = vperm.xlu0 %3757, %v660_v40  }
  0x85   :  { %3744 = vset.pattern.permute.xlu1 %v3783_v7 }
  0x86   :  { %350 = vperm.xlu1 %3744, %v3897_v19  }
  0x88   :  { %v4007_v44 = vpop.permute.xlu1 %200  ;;  %v4009_v45 = vpop.permute.xlu0 %69  ;;  %975 = vperm.xlu0 %3757, %v3221_v43  }
  0x89   :  { %v164_v43 = vmul.f32 %v4127_v35, %v4009_v45 }
  0x8a   :  { %3745 = vset.pattern.permute.xlu1 %v3782_v3 }
  0x8b   :  { %124 = vperm.xlu1 %3745, %v3950_v30  }
  0x8c   :  { %v4016_v47 = vpop.permute.xlu0 %79  ;;  %985 = vperm.xlu0 %3757, %v3223_v46   ;;  %v3263_v46 = vld [vmem:[%s5313_s4 + $0x158] sm:$0xff] }
  0x8d   :  { %v4018_v48 = vpop.permute.xlu1 %310 }
  0x8f   :  { %3746 = vset.pattern.permute.xlu1 %v3784_v12 }
  0x90   :  { %492 = vperm.xlu1 %3746, %v40_v29   ;;  %v4024_v50 = vpop.permute.xlu0 %205  ;;  %995 = vperm.xlu0 %3757, %v3225_v49   ;;  %v517_v29 = vsub.s32 2, %v4083_v10 }
  0x92   :  { %v4029_v52 = vpop.permute.xlu1 %74  ;;  %v518_v38 = vrot.slane %v29_v18, %v517_v29 }
  0x94   :  { %496 = vperm.xlu1 %3746, %v3897_v19   ;;  %v4032_v53 = vpop.permute.xlu0 %89  ;;  %1005 = vperm.xlu0 %3757, %v3227_v51   ;;  %v371_v19 = vsub.s32 1, %v4083_v10 }
  0x96   :  { %v372_v27 = vrot.slane %v29_v18, %v371_v19  ;;  %v4131_v37 = vrot.slane %v376_v28, %v371_v19 }
  0x97   :  { %v4040_v56 = vpop.permute.xlu1 %452 }
  0x98   :  { %3747 = vset.pattern.permute.xlu1 %v3782_v3  ;;  %v4043_v57 = vpop.permute.xlu0 %215  ;;  %1015 = vperm.xlu0 %3757, %v3229_v54   ;;  %v4129_v36 = vrot.slane %v372_v27, %v371_v19  ;;  %v390_v51 = vmul.f32 %v4131_v37, %v4018_v48  ;;  %v4150_v54 = vrot.slane %v518_v38, %v517_v29 }
  0x99   :  { %260 = vperm.xlu1 %3747, %v59_v55  }
  0x9a   :  { %v389_v49 = vmul.f32 %v4129_v36, %v4018_v48  ;;  %v645_v48 = vld [vmem:[%s5313_s4] sm:$0xff] }
  0x9b   :  { %v4048_v59 = vpop.permute.xlu1 %456 }
  0x9c   :  { %v4050_v60 = vpop.permute.xlu0 %99  ;;  %1025 = vperm.xlu0 %3757, %v3231_v58  }
  0x9d   :  { %3748 = vset.pattern.permute.xlu1 %v3783_v7 }
  0x9e   :  { %358 = vperm.xlu1 %3748, %v3907_v21  }
  0xa0   :  { %v4057_v62 = vpop.permute.xlu1 %210  ;;  %v4059_v63 = vpop.permute.xlu0 %225  ;;  %1035 = vperm.xlu0 %3757, %v3233_v61   ;;  %v276_v61 = vadd.f32 %v4007_v44, %v164_v43 }
  0xa2   :  { %3749 = vset.pattern.permute.xlu1 %v3782_v3 }
  0xa3   :  { %134 = vperm.xlu1 %3749, %v3957_v31  }
  0xa4   :  { %v4066_v1 = vpop.permute.xlu0 %109  ;;  %1045 = vperm.xlu0 %3757, %v3235_v0  }
  0xa5   :  { %v4068_v2 = vpop.permute.xlu1 %318 }
  0xa7   :  { %3750 = vset.pattern.permute.xlu1 %v3784_v12 }
  0xa8   :  { %500 = vperm.xlu1 %3750, %v3950_v30   ;;  %v4075_v6 = vpop.permute.xlu0 %235  ;;  %1282 = vperm.xlu0 %3757, %v3253_v4   ;;  %v521_v30 = vsub.s32 6, %v4083_v10  ;;  %v3265_v4 = vld [vmem:[%s5313_s4 + $0x168] sm:$0xff] }
  0xaa   :  { %v4080_v9 = vpop.permute.xlu1 %84  ;;  %v522_v39 = vrot.slane %v29_v18, %v521_v30  ;;  %v422_v18 = vadd.f32 %v390_v51, %v276_v61  ;;  %v393_v30 = vmul.f32 %v4129_v36, %v4068_v2 }
  0xab   :  { %v169_v38 = vmul.f32 %v4124_v34, %v4080_v9 }
  0xac   :  { %504 = vperm.xlu1 %3750, %v3907_v21   ;;  %v4086_v11 = vpop.permute.xlu0 %119  ;;  %1292 = vperm.xlu0 %3757, %v3255_v8   ;;  %v4152_v55 = vrot.slane %v522_v39, %v517_v29  ;;  %v165_v8 = vmul.f32 %v4124_v34, %v4029_v52  ;;  %v172_v29 = vmul.f32 %v4127_v35, %v4032_v53 }
  0xad   :  { %v170_v39 = vmul.f32 %v4127_v35, %v4080_v9 }
  0xae   :  { %v277_v23 = vadd.f32 %v4024_v50, %v165_v8  ;;  %v281_v8 = vadd.f32 %v4043_v57, %v169_v38 }
  0xaf   :  { %v4098_v17 = vpop.permute.xlu1 %460 }
  0xb0   :  { %3752 = vset.pattern.permute.xlu1 %v3782_v3  ;;  %v4106_v21 = vpop.permute.xlu0 %245  ;;  %1302 = vperm.xlu0 %3757, %v3257_v13   ;;  %v166_v13 = vmul.f32 %v4127_v35, %v4029_v52  ;;  %v167_v52 = vmul.f32 %v4124_v34, %v4016_v47 }
  0xb1   :  { %270 = vperm.xlu1 %3752, %v61_v14  }
  0xb2   :  { %v278_v25 = vadd.f32 %v4024_v50, %v166_v13  ;;  %v533_v50 = vmul.f32 %v4150_v54, %v4040_v56  ;;  %v282_v13 = vadd.f32 %v4043_v57, %v170_v39 }
  0xb3   :  { %v4112_v26 = vpop.permute.xlu1 %464 }
  0xb4   :  { %v4116_v32 = vpop.permute.xlu0 %129  ;;  %1312 = vperm.xlu0 %3757, %v3259_v22   ;;  %v168_v22 = vmul.f32 %v4127_v35, %v4016_v47  ;;  %v171_v47 = vmul.f32 %v4124_v34, %v4032_v53  ;;  %v534_v53 = vmul.f32 %v4152_v55, %v4040_v56  ;;  %v539_v61 = vmul.f32 %v4150_v54, %v4112_v26 }
  0xb5   :  { %3753 = vset.pattern.permute.xlu1 %v3783_v7 }
  0xb6   :  { %366 = vperm.xlu1 %3753, %v3920_v24   ;;  %v163_v24 = vmul.f32 %v4124_v34, %v4009_v45  ;;  %v161_v45 = vmul.f32 %v4124_v34, %v4000_v42  ;;  %v280_v43 = vadd.f32 %v4057_v62, %v168_v22 }
  0xb8   :  { %v4133_v40 = vpop.permute.xlu1 %220  ;;  %v4135_v7 = vpop.permute.xlu0 %255  ;;  %1322 = vperm.xlu0 %3757, %v3261_v33   ;;  %v273_v19 = vadd.f32 %v3998_v41, %v161_v45  ;;  %v394_v33 = vmul.f32 %v4131_v37, %v4068_v2  ;;  %v648_v2 = vld [vmem:[%s5313_s4 + $0x18] sm:$0xff] }
  0xba   :  { %3754 = vset.pattern.permute.xlu1 %v3784_v12  ;;  %v162_v12 = vmul.f32 %v4127_v35, %v4000_v42  ;;  %v535_v42 = vmul.f32 %v4150_v54, %v4048_v59 }
  0xbb   :  { %508 = vperm.xlu1 %3754, %v3957_v31   ;;  %v275_v31 = vadd.f32 %v4007_v44, %v163_v24  ;;  %v536_v44 = vmul.f32 %v4152_v55, %v4048_v59  ;;  %v3267_v59 = vld [vmem:[%s5313_s4 + $0x178] sm:$0xff]  ;;  %v279_v24 = vadd.f32 %v4057_v62, %v167_v52  ;;  %v3285_v62 = vld [vmem:[%s5313_s4 + $0x188] sm:$0xff] }
  0xbc   :  { %v4154_v58 = vpop.permute.xlu0 %139  ;;  %1332 = vperm.xlu0 %3757, %v3263_v46   ;;  %v274_v20 = vadd.f32 %v3998_v41, %v162_v12 }
  0xbd   :  { %v327_v0 = vpop.permute.xlu1 %326  ;;  %v421_v14 = vadd.f32 %v389_v49, %v275_v31  ;;  %v4195_v41 = vadd.f32 %v536_v44, %v422_v18  ;;  %v3785_v49 = vmov 0.0   ;;  %v425_v12 = vadd.f32 %v393_v30, %v279_v24 }
  0xbe   :  { %805 = vmatprep.mubr.f32.mxu0 %v3785_v49  ;;  %1112 = vmatprep.mubr.f32.mxu1 %v3785_v49  ;;  %v426_v31 = vadd.f32 %v394_v33, %v280_v43  ;;  %v538_v18 = vmul.f32 %v4152_v55, %v4098_v17  ;;  %v397_v52 = vmul.f32 %v4129_v36, %v327_v0 }
  0xbf   :  { %3756 = vset.pattern.permute.xlu1 %v3782_v3  ;;  %v646_v3 = vld [vmem:[%s5313_s4 + $0x8] sm:$0xff]  ;;  %v4197_v28 = vadd.f32 %v535_v42, %v421_v14  ;;  %v600_v56 = vmax.f32 %v4195_v41, 0.0  ;;  %v537_v14 = vmul.f32 %v4150_v54, %v4098_v17  ;;  %v398_v22 = vmul.f32 %v4131_v37, %v327_v0  ;;  %v3287_v17 = vld [vmem:[%s5313_s4 + $0x198] sm:$0xff] }
  0xc0   :  { %663 = vperm.xlu1 %3756, %v645_v48   ;;  %v4177_v16 = vpop.permute.xlu0 %265  ;;  %1342 = vperm.xlu0 %3757, %v3265_v4   ;;  %v540_v48 = vmul.f32 %v4152_v55, %v4112_v26  ;;  %v649_v26 = vld [vmem:[%s5313_s4 + $0x20] sm:$0xff]  ;;  %v571_v41 = vadd.f32 %v539_v61, %v425_v12  ;;  %v283_v0 = vadd.f32 %v4133_v40, %v171_v47 }
  0xc1   :  { %v599_v45 = vmax.f32 %v4197_v28, 0.0  ;;  %v284_v30 = vadd.f32 %v4133_v40, %v172_v29  ;;  %v3289_v29 = vld [vmem:[%s5313_s4 + $0x1a8] sm:$0xff] }
  0xc2   :  { %v4193_v27 = vpop.permute.xlu1 %94  ;;  %v572_v28 = vadd.f32 %v540_v48, %v426_v31 }
  0xc4   :  { %668 = vperm.xlu1 %3756, %v646_v3   ;;  %1352 = vperm.xlu0 %3757, %v3267_v59  }
  0xc5   :  { %v307_v46 = vpop.permute.xlu0 %306 }
  0xc6   :  { %v387_v9 = vmul.f32 %v4129_v36, %v307_v46  ;;  %v388_v51 = vmul.f32 %v4131_v37, %v307_v46 }
  0xc7   :  { %v469_v4 = vpop.permute.xlu1 %468 }
  0xc8   :  { %v419_v42 = vadd.f32 %v387_v9, %v273_v19  ;;  %678 = vperm.xlu1 %3756, %v648_v2   ;;  %v420_v44 = vadd.f32 %v388_v51, %v274_v20  ;;  %1589 = vperm.xlu0 %3757, %v3285_v62   ;;  %v651_v2 = vld [vmem:[%s5313_s4 + $0x30] sm:$0xff]  ;;  %v541_v40 = vmul.f32 %v4150_v54, %v469_v4 }
  0xc9   :  { %v315_v3 = vpop.permute.xlu0 %314 }
  0xca   :  { %v391_v57 = vmul.f32 %v4129_v36, %v315_v3  ;;  %v392_v19 = vmul.f32 %v4131_v37, %v315_v3  ;;  %v566_v20 = vadd.f32 %v534_v53, %v420_v44  ;;  %v565_v59 = vadd.f32 %v533_v50, %v419_v42 }
  0xcb   :  { %v473_v33 = vpop.permute.xlu1 %472  ;;  %v429_v53 = vadd.f32 %v397_v52, %v283_v0  ;;  %v430_v50 = vadd.f32 %v398_v22, %v284_v30 }
  0xcc   :  { %v423_v38 = vadd.f32 %v391_v57, %v277_v23  ;;  %v424_v39 = vadd.f32 %v392_v19, %v278_v25  ;;  %v543_v24 = vmul.f32 %v4150_v54, %v473_v33  ;;  %v544_v43 = vmul.f32 %v4152_v55, %v473_v33  ;;  %683 = vperm.xlu1 %3756, %v649_v26   ;;  %v3293_v33 = vld [vmem:[%s5313_s4 + $0x1c8] sm:$0xff] }
  0xcd   :  { %v323_v46 = vpop.permute.xlu0 %322  ;;  %v598_v9 = vmax.f32 %v566_v20, 0.0  ;;  %v597_v51 = vmax.f32 %v565_v59, 0.0  ;;  %1599 = vperm.xlu0 %3757, %v3287_v17   ;;  %v542_v23 = vmul.f32 %v4152_v55, %v469_v4  ;;  %v653_v4 = vld [vmem:[%s5313_s4 + $0x40] sm:$0xff]  ;;  %v604_v26 = vmax.f32 %v572_v28, 0.0 }
  0xce   :  { %v395_v25 = vmul.f32 %v4129_v36, %v323_v46  ;;  %v396_v47 = vmul.f32 %v4131_v37, %v323_v46  ;;  %v570_v31 = vadd.f32 %v538_v18, %v424_v39  ;;  %v569_v61 = vadd.f32 %v537_v14, %v423_v38  ;;  %v657_v38 = vld [vmem:[%s5313_s4 + $0x60] sm:$0xff] }
  0xcf   :  { %v3428_v62 = vpack.c.bf16 %v600_v56, %v598_v9  ;;  %v3430_v12 = vpack.c.bf16 %v599_v45, %v597_v51  ;;  %v575_v48 = vadd.f32 %v543_v24, %v429_v53  ;;  %v576_v42 = vadd.f32 %v544_v43, %v430_v50  ;;  %v3295_v24 = vld [vmem:[%s5313_s4 + $0x1d8] sm:$0xff]  ;;  %v659_v9 = vld [vmem:[%s5313_s4 + $0x70] sm:$0xff] }
  0xd0   :  { %v427_v44 = vadd.f32 %v395_v25, %v281_v8  ;;  %v428_v52 = vadd.f32 %v396_v47, %v282_v13  ;;  %693 = vperm.xlu1 %3756, %v651_v2   ;;  %v231_v22 = vpop.permute.xlu1 %230  ;;  %v602_v3 = vmax.f32 %v570_v31, 0.0  ;;  %v601_v57 = vmax.f32 %v569_v61, 0.0  ;;  %v3291_v8 = vld [vmem:[%s5313_s4 + $0x1b8] sm:$0xff] }
  0xd1   :  { %3429 = vmatprep.subr.bf16.mxu0 %v3428_v62  ;;  %v603_v19 = vmax.f32 %v571_v41, 0.0  ;;  %1609 = vperm.xlu0 %3757, %v3289_v29   ;;  %v608_v20 = vmax.f32 %v576_v42, 0.0  ;;  %v607_v17 = vmax.f32 %v575_v48, 0.0  ;;  %v655_v41 = vld [vmem:[%s5313_s4 + $0x50] sm:$0xff]  ;;  %v331_v43 = vpop.permute.xlu0 %330  ;;  %v173_v53 = vmul.f32 %v4124_v34, %v4193_v27  ;;  %v3220_v48 = vld [vmem:[%s5313_s4 + $0x80] sm:$0xff] }
  0xd2   :  { %3431 = vmatpush1.bf16.msra.mxu0 %v3430_v12  ;;  %v574_v56 = vadd.f32 %v542_v23, %v428_v52  ;;  %v573_v45 = vadd.f32 %v541_v40, %v427_v44  ;;  %v3432_v13 = vpack.c.bf16 %v604_v26, %v602_v3  ;;  %v174_v50 = vmul.f32 %v4127_v35, %v4193_v27  ;;  %v3297_v27 = vld [vmem:[%s5313_s4 + $0x1e8] sm:$0xff]  ;;  %v3299_v52 = vld [vmem:[%s5313_s4 + $0x1f8] sm:$0xff] }
  0xd3   :  { %v3434_v14 = vpack.c.bf16 %v603_v19, %v601_v57  ;;  %v175_v46 = vmul.f32 %v4124_v34, %v4050_v60  ;;  %v176_v2 = vmul.f32 %v4127_v35, %v4050_v60  ;;  %v399_v51 = vmul.f32 %v4129_v36, %v331_v43 }
  0xd4   :  { %703 = vperm.xlu1 %3756, %v653_v4   ;;  %v606_v18 = vmax.f32 %v574_v56, 0.0  ;;  %v605_v59 = vmax.f32 %v573_v45, 0.0  ;;  %3433 = vmatprep.subr.bf16.mxu0 %v3432_v13  ;;  %v400_v40 = vmul.f32 %v4131_v37, %v331_v43  ;;  %v285_v60 = vadd.f32 %v4059_v63, %v173_v53  ;;  %v3222_v56 = vld [vmem:[%s5313_s4 + $0x90] sm:$0xff]  ;;  %v3317_v13 = vld [vmem:[%s5313_s4 + $0x208] sm:$0xff]  ;;  %v3228_v43 = vld [vmem:[%s5313_s4 + $0xc0] sm:$0xff] }
  0xd5   :  { %v335_v0 = vpop.permute.xlu1 %334  ;;  %1619 = vperm.xlu0 %3757, %v3291_v8   ;;  %v286_v29 = vadd.f32 %v4059_v63, %v174_v50  ;;  %v287_v31 = vadd.f32 %v231_v22, %v175_v46  ;;  %v288_v61 = vadd.f32 %v231_v22, %v176_v2  ;;  %v3323_v2 = vld [vmem:[%s5313_s4 + $0x238] sm:$0xff] }
  0xd6   :  { %3435 = vmatpush1.bf16.msra.mxu0 %v3434_v14  ;;  %v3436_v28 = vpack.c.bf16 %v608_v20, %v606_v18  ;;  %v3438_v30 = vpack.c.bf16 %v607_v17, %v605_v59  ;;  %v401_v23 = vmul.f32 %v4129_v36, %v335_v0  ;;  %v402_v25 = vmul.f32 %v4131_v37, %v335_v0  ;;  %v3224_v0 = vld [vmem:[%s5313_s4 + $0xa0] sm:$0xff] }
  0xd7   :  { %v431_v42 = vadd.f32 %v399_v51, %v285_v60  ;;  %v432_v44 = vadd.f32 %v400_v40, %v286_v29  ;;  %v3230_v51 = vld [vmem:[%s5313_s4 + $0xd0] sm:$0xff]  ;;  %v180_v60 = vmul.f32 %v4127_v35, %v4066_v1 }
  0xd8   :  { %713 = vperm.xlu1 %3756, %v655_v41   ;;  %3437 = vmatprep.subr.bf16.mxu0 %v3436_v28  ;;  %v433_v4 = vadd.f32 %v401_v23, %v287_v31  ;;  %v434_v63 = vadd.f32 %v402_v25, %v288_v61  ;;  %v3325_v25 = vld [vmem:[%s5313_s4 + $0x248] sm:$0xff] }
  0xd9   :  { %1629 = vperm.xlu0 %3757, %v3293_v33  }
  0xda   :  { %3439 = vmatpush1.bf16.msra.mxu0 %v3438_v30  ;;  %v4278_v39 = vpop.permute.xlu1 %104  ;;  %v3319_v30 = vld [vmem:[%s5313_s4 + $0x218] sm:$0xff] }
  0xdb   :  { %v177_v53 = vmul.f32 %v4124_v34, %v4278_v39  ;;  %v178_v50 = vmul.f32 %v4127_v35, %v4278_v39 }
  0xdc   :  { %723 = vperm.xlu1 %3756, %v657_v38   ;;  %v3226_v38 = vld [vmem:[%s5313_s4 + $0xb0] sm:$0xff] }
  0xdd   :  { %1639 = vperm.xlu0 %3757, %v3295_v24   ;;  %v3321_v24 = vld [vmem:[%s5313_s4 + $0x228] sm:$0xff]  ;;  %v289_v40 = vadd.f32 %v4075_v6, %v177_v53  ;;  %v3256_v53 = vld [vmem:[%s5313_s4 + $0x120] sm:$0xff] }
  0xdf   :  { %v477_v47 = vpop.permute.xlu1 %476 }
  0xe0   :  { %v545_v62 = vmul.f32 %v4150_v54, %v477_v47  ;;  %v546_v12 = vmul.f32 %v4152_v55, %v477_v47  ;;  %733 = vperm.xlu1 %3756, %v659_v9   ;;  %v339_v9 = vpop.permute.xlu0 %338  ;;  %v179_v47 = vmul.f32 %v4124_v34, %v4066_v1  ;;  %v3327_v1 = vld [vmem:[%s5313_s4 + $0x258] sm:$0xff] }
  0xe1   :  { %1649 = vperm.xlu0 %3757, %v3297_v27   ;;  %v290_v27 = vadd.f32 %v4075_v6, %v178_v50  ;;  %v403_v23 = vmul.f32 %v4129_v36, %v339_v9  ;;  %v404_v39 = vmul.f32 %v4131_v37, %v339_v9 }
  0xe2   :  { %v577_v26 = vadd.f32 %v545_v62, %v431_v42  ;;  %v578_v57 = vadd.f32 %v546_v12, %v432_v44  ;;  %v3232_v42 = vld [vmem:[%s5313_s4 + $0xe0] sm:$0xff] }
  0xe3   :  { %v481_v3 = vpop.permute.xlu1 %480  ;;  %v435_v44 = vadd.f32 %v403_v23, %v289_v40 }
  0xe4   :  { %v547_v19 = vmul.f32 %v4150_v54, %v481_v3  ;;  %v548_v22 = vmul.f32 %v4152_v55, %v481_v3  ;;  %970 = vperm.xlu1 %3756, %v3220_v48   ;;  %v610_v18 = vmax.f32 %v578_v57, 0.0  ;;  %v609_v59 = vmax.f32 %v577_v26, 0.0 }
  0xe5   :  { %1659 = vperm.xlu0 %3757, %v3299_v52   ;;  %v436_v52 = vadd.f32 %v404_v39, %v290_v27  ;;  %v3258_v27 = vld [vmem:[%s5313_s4 + $0x130] sm:$0xff] }
  0xe6   :  { %v579_v45 = vadd.f32 %v547_v19, %v433_v4  ;;  %v580_v8 = vadd.f32 %v548_v22, %v434_v63 }
  0xe8   :  { %980 = vperm.xlu1 %3756, %v3222_v56   ;;  %v241_v14 = vpop.permute.xlu1 %240  ;;  %v612_v20 = vmax.f32 %v580_v8, 0.0  ;;  %v611_v17 = vmax.f32 %v579_v45, 0.0  ;;  %v3234_v56 = vld [vmem:[%s5313_s4 + $0xf0] sm:$0xff] }
  0xe9   :  { %1896 = vperm.xlu0 %3757, %v3317_v13   ;;  %v291_v61 = vadd.f32 %v241_v14, %v179_v47  ;;  %v292_v48 = vadd.f32 %v241_v14, %v180_v60  ;;  %v3329_v13 = vld [vmem:[%s5313_s4 + $0x268] sm:$0xff]  ;;  %v183_v60 = vmul.f32 %v4124_v34, %v4086_v11 }
  0xea   :  { %v3440_v41 = vpack.c.bf16 %v612_v20, %v610_v18  ;;  %v3442_v28 = vpack.c.bf16 %v611_v17, %v609_v59  ;;  %v3353_v47 = vld [vmem:[%s5313_s4 + $0x2a8] sm:$0xff] }
  0xec   :  { %990 = vperm.xlu1 %3756, %v3224_v0   ;;  %3441 = vmatprep.subr.bf16.mxu0 %v3440_v41  ;;  %v3252_v0 = vld [vmem:[%s5313_s4 + $0x100] sm:$0xff] }
  0xed   :  { %v343_v33 = vpop.permute.xlu1 %342  ;;  %3443 = vmatpush1.bf16.msra.mxu0 %v3442_v28  ;;  %1906 = vperm.xlu0 %3757, %v3319_v30   ;;  %v3331_v30 = vld [vmem:[%s5313_s4 + $0x278] sm:$0xff] }
  0xee   :  { %v405_v29 = vmul.f32 %v4129_v36, %v343_v33  ;;  %v406_v62 = vmul.f32 %v4131_v37, %v343_v33 }
  0xf0   :  { %1000 = vperm.xlu1 %3756, %v3226_v38   ;;  %v437_v4 = vadd.f32 %v405_v29, %v291_v61  ;;  %v438_v63 = vadd.f32 %v406_v62, %v292_v48  ;;  %v3254_v38 = vld [vmem:[%s5313_s4 + $0x110] sm:$0xff]  ;;  %v184_v29 = vmul.f32 %v4127_v35, %v4086_v11 }
  0xf1   :  { %1916 = vperm.xlu0 %3757, %v3321_v24   ;;  %v3349_v24 = vld [vmem:[%s5313_s4 + $0x288] sm:$0xff] }
  0xf2   :  { %v115_v46 = vpop.permute.xlu1 %114 }
  0xf3   :  { %v181_v50 = vmul.f32 %v4124_v34, %v115_v46 }
  0xf4   :  { %1010 = vperm.xlu1 %3756, %v3228_v43   ;;  %v347_v43 = vpop.permute.xlu0 %346 }
  0xf5   :  { %1926 = vperm.xlu0 %3757, %v3323_v2   ;;  %v182_v2 = vmul.f32 %v4127_v35, %v115_v46  ;;  %v293_v23 = vadd.f32 %v4106_v21, %v181_v50  ;;  %v407_v46 = vmul.f32 %v4129_v36, %v347_v43  ;;  %v3361_v50 = vld [vmem:[%s5313_s4 + $0x2e8] sm:$0xff] }
  0xf7   :  { %v485_v12 = vpop.permute.xlu1 %484  ;;  %v294_v39 = vadd.f32 %v4106_v21, %v182_v2  ;;  %v439_v11 = vadd.f32 %v407_v46, %v293_v23  ;;  %v3284_v2 = vld [vmem:[%s5313_s4 + $0x180] sm:$0xff] }
  0xf8   :  { %v549_v6 = vmul.f32 %v4150_v54, %v485_v12  ;;  %v550_v31 = vmul.f32 %v4152_v55, %v485_v12  ;;  %1020 = vperm.xlu1 %3756, %v3230_v51   ;;  %v3351_v51 = vld [vmem:[%s5313_s4 + $0x298] sm:$0xff]  ;;  %v4395_v40 = vpop.permute.xlu0 %354 }
  0xf9   :  { %1936 = vperm.xlu0 %3757, %v3325_v25   ;;  %v408_v25 = vmul.f32 %v4131_v37, %v347_v43  ;;  %v3266_v43 = vld [vmem:[%s5313_s4 + $0x170] sm:$0xff] }
  0xfa   :  { %v581_v26 = vadd.f32 %v549_v6, %v435_v44  ;;  %v582_v57 = vadd.f32 %v550_v31, %v436_v52  ;;  %v3260_v44 = vld [vmem:[%s5313_s4 + $0x140] sm:$0xff] }
  0xfb   :  { %v489_v3 = vpop.permute.xlu1 %488  ;;  %v440_v52 = vadd.f32 %v408_v25, %v294_v39  ;;  %v3363_v39 = vld [vmem:[%s5313_s4 + $0x2f8] sm:$0xff]  ;;  %v3286_v25 = vld [vmem:[%s5313_s4 + $0x190] sm:$0xff] }
  0xfc   :  { %v551_v19 = vmul.f32 %v4150_v54, %v489_v3  ;;  %v552_v22 = vmul.f32 %v4152_v55, %v489_v3  ;;  %1030 = vperm.xlu1 %3756, %v3232_v42   ;;  %v614_v18 = vmax.f32 %v582_v57, 0.0  ;;  %v613_v59 = vmax.f32 %v581_v26, 0.0  ;;  %v4413_v21 = vpop.permute.xlu0 %362 }
  0xfd   :  { %1946 = vperm.xlu0 %3757, %v3327_v1   ;;  %v3355_v1 = vld [vmem:[%s5313_s4 + $0x2b8] sm:$0xff] }
  0xfe   :  { %v583_v45 = vadd.f32 %v551_v19, %v437_v4  ;;  %v584_v8 = vadd.f32 %v552_v22, %v438_v63 }
 0x100   :  { %1040 = vperm.xlu1 %3756, %v3234_v56   ;;  %v251_v14 = vpop.permute.xlu1 %250  ;;  %v616_v20 = vmax.f32 %v584_v8, 0.0  ;;  %v615_v17 = vmax.f32 %v583_v45, 0.0  ;;  %v4423_v26 = vpop.permute.xlu0 %512  ;;  %v3262_v45 = vld [vmem:[%s5313_s4 + $0x150] sm:$0xff] }
 0x101   :  { %1956 = vperm.xlu0 %3757, %v3329_v13   ;;  %v295_v48 = vadd.f32 %v251_v14, %v183_v60  ;;  %v296_v42 = vadd.f32 %v251_v14, %v184_v29  ;;  %v3357_v14 = vld [vmem:[%s5313_s4 + $0x2c8] sm:$0xff]  ;;  %v412_v29 = vmul.f32 %v4131_v37, %v4395_v40 }
 0x102   :  { %v3444_v41 = vpack.c.bf16 %v616_v20, %v614_v18  ;;  %v3446_v28 = vpack.c.bf16 %v615_v17, %v613_v59 }
 0x104   :  { %1277 = vperm.xlu1 %3756, %v3252_v0   ;;  %3445 = vmatprep.subr.bf16.mxu0 %v3444_v41  ;;  %v4433_v18 = vpop.permute.xlu0 %673 }
 0x105   :  { %v351_v33 = vpop.permute.xlu1 %350  ;;  %3447 = vmatpush1.bf16.msra.mxu0 %v3446_v28  ;;  %1966 = vperm.xlu0 %3757, %v3331_v30   ;;  %v3264_v28 = vld [vmem:[%s5313_s4 + $0x160] sm:$0xff] }
 0x106   :  { %v409_v62 = vmul.f32 %v4129_v36, %v351_v33  ;;  %v410_v12 = vmul.f32 %v4131_v37, %v351_v33 }
 0x108   :  { %1287 = vperm.xlu1 %3756, %v3254_v38   ;;  %v441_v4 = vadd.f32 %v409_v62, %v295_v48  ;;  %v442_v63 = vadd.f32 %v410_v12, %v296_v42  ;;  %v3359_v38 = vld [vmem:[%s5313_s4 + $0x2d8] sm:$0xff]  ;;  %v3381_v62 = vld [vmem:[%s5313_s4 + $0x308] sm:$0xff]  ;;  %v187_v12 = vmul.f32 %v4124_v34, %v4116_v32 }
 0x109   :  { %2203 = vperm.xlu0 %3757, %v3349_v24  }
 0x10a   :  { %v4390_v9 = vpop.permute.xlu1 %124 }
 0x10c   :  { %1297 = vperm.xlu1 %3756, %v3256_v53   ;;  %v4444_v53 = vpop.permute.xlu0 %688 }
 0x10d   :  { %2213 = vperm.xlu0 %3757, %v3351_v51   ;;  %v185_v51 = vmul.f32 %v4124_v34, %v4390_v9 }
 0x10f   :  { %v493_v6 = vpop.permute.xlu1 %492 }
 0x110   :  { %v553_v31 = vmul.f32 %v4150_v54, %v493_v6  ;;  %v554_v61 = vmul.f32 %v4152_v55, %v493_v6  ;;  %1307 = vperm.xlu1 %3756, %v3258_v27   ;;  %v186_v27 = vmul.f32 %v4127_v35, %v4390_v9  ;;  %v4459_v46 = vpop.permute.xlu0 %698  ;;  %v411_v9 = vmul.f32 %v4129_v36, %v4395_v40 }
 0x111   :  { %2223 = vperm.xlu0 %3757, %v3353_v47   ;;  %v297_v47 = vadd.f32 %v4135_v7, %v185_v51  ;;  %v188_v6 = vmul.f32 %v4127_v35, %v4116_v32  ;;  %v191_v51 = vmul.f32 %v4124_v34, %v4154_v58 }
 0x112   :  { %v585_v57 = vadd.f32 %v553_v31, %v439_v11  ;;  %v586_v19 = vadd.f32 %v554_v61, %v440_v52  ;;  %v298_v60 = vadd.f32 %v4135_v7, %v186_v27  ;;  %v3288_v11 = vld [vmem:[%s5313_s4 + $0x1a0] sm:$0xff]  ;;  %v192_v27 = vmul.f32 %v4127_v35, %v4154_v58  ;;  %v3389_v58 = vld [vmem:[%s5313_s4 + $0x348] sm:$0xff] }
 0x113   :  { %v497_v3 = vpop.permute.xlu1 %496  ;;  %v443_v32 = vadd.f32 %v411_v9, %v297_v47  ;;  %v3294_v47 = vld [vmem:[%s5313_s4 + $0x1d0] sm:$0xff] }
 0x114   :  { %v555_v22 = vmul.f32 %v4150_v54, %v497_v3  ;;  %v556_v56 = vmul.f32 %v4152_v55, %v497_v3  ;;  %1317 = vperm.xlu1 %3756, %v3260_v44   ;;  %v618_v59 = vmax.f32 %v586_v19, 0.0  ;;  %v617_v0 = vmax.f32 %v585_v57, 0.0  ;;  %v4484_v52 = vpop.permute.xlu0 %708 }
 0x115   :  { %2233 = vperm.xlu0 %3757, %v3355_v1   ;;  %v444_v1 = vadd.f32 %v412_v29, %v298_v60 }
 0x116   :  { %v587_v8 = vadd.f32 %v555_v22, %v441_v4  ;;  %v588_v13 = vadd.f32 %v556_v56, %v442_v63  ;;  %v3383_v4 = vld [vmem:[%s5313_s4 + $0x318] sm:$0xff] }
 0x118   :  { %1327 = vperm.xlu1 %3756, %v3262_v45   ;;  %v261_v20 = vpop.permute.xlu1 %260  ;;  %v620_v17 = vmax.f32 %v588_v13, 0.0  ;;  %v619_v41 = vmax.f32 %v587_v8, 0.0  ;;  %v3290_v8 = vld [vmem:[%s5313_s4 + $0x1b0] sm:$0xff] }
 0x119   :  { %2243 = vperm.xlu0 %3757, %v3357_v14   ;;  %v299_v40 = vadd.f32 %v261_v20, %v187_v12  ;;  %v300_v44 = vadd.f32 %v261_v20, %v188_v6  ;;  %v3385_v20 = vld [vmem:[%s5313_s4 + $0x328] sm:$0xff]  ;;  %v415_v12 = vmul.f32 %v4129_v36, %v4413_v21  ;;  %v416_v6 = vmul.f32 %v4131_v37, %v4413_v21 }
 0x11a   :  { %v3448_v30 = vpack.c.bf16 %v620_v17, %v618_v59  ;;  %v3450_v33 = vpack.c.bf16 %v619_v41, %v617_v0  ;;  %v4497_v59 = vpop.permute.xlu0 %718 }
 0x11c   :  { %1337 = vperm.xlu1 %3756, %v3264_v28   ;;  %3449 = vmatprep.subr.bf16.mxu0 %v3448_v30 }
 0x11d   :  { %v359_v24 = vpop.permute.xlu1 %358  ;;  %3451 = vmatpush1.bf16.msra.mxu0 %v3450_v33  ;;  %2253 = vperm.xlu0 %3757, %v3359_v38  }
 0x11e   :  { %v413_v31 = vmul.f32 %v4129_v36, %v359_v24  ;;  %v414_v7 = vmul.f32 %v4131_v37, %v359_v24  ;;  %v3292_v24 = vld [vmem:[%s5313_s4 + $0x1c0] sm:$0xff]  ;;  %v4516_v60 = vpop.permute.xlu0 %728 }
 0x120   :  { %1347 = vperm.xlu1 %3756, %v3266_v43   ;;  %v445_v63 = vadd.f32 %v413_v31, %v299_v40  ;;  %v446_v3 = vadd.f32 %v414_v7, %v300_v44 }
 0x121   :  { %2263 = vperm.xlu0 %3757, %v3361_v50  }
 0x122   :  { %v135_v23 = vpop.permute.xlu1 %134  ;;  %v4539_v21 = vpop.permute.xlu0 %738 }
 0x123   :  { %v189_v33 = vmul.f32 %v4124_v34, %v135_v23  ;;  %v190_v38 = vmul.f32 %v4127_v35, %v135_v23 }
 0x124   :  { %1584 = vperm.xlu1 %3756, %v3284_v2   ;;  %v3387_v2 = vld [vmem:[%s5313_s4 + $0x338] sm:$0xff] }
 0x125   :  { %2273 = vperm.xlu0 %3757, %v3363_v39   ;;  %v301_v23 = vadd.f32 %v4177_v16, %v189_v33  ;;  %v302_v39 = vadd.f32 %v4177_v16, %v190_v38  ;;  %v563_v16 = vmul.f32 %v4150_v54, %v4423_v26  ;;  %v3322_v33 = vld [vmem:[%s5313_s4 + $0x230] sm:$0xff] }
 0x127   :  { %v501_v61 = vpop.permute.xlu1 %500  ;;  %v448_v40 = vadd.f32 %v416_v6, %v302_v39  ;;  %v3421_v39 = vld [vmem:[%s5313_s4 + $0x3c8] sm:$0xff]  ;;  %v3427_v6 = vld [vmem:[%s5313_s4 + $0x3f8] sm:$0xff] }
 0x128   :  { %v557_v48 = vmul.f32 %v4150_v54, %v501_v61  ;;  %v558_v42 = vmul.f32 %v4152_v55, %v501_v61  ;;  %1594 = vperm.xlu1 %3756, %v3286_v25   ;;  %v3296_v61 = vld [vmem:[%s5313_s4 + $0x1e0] sm:$0xff] }
 0x129   :  { %2510 = vperm.xlu0 %3757, %v3381_v62   ;;  %v564_v62 = vmul.f32 %v4152_v55, %v4423_v26  ;;  %v3391_v26 = vld [vmem:[%s5313_s4 + $0x358] sm:$0xff] }
 0x12a   :  { %v589_v19 = vadd.f32 %v557_v48, %v443_v32  ;;  %v590_v22 = vadd.f32 %v558_v42, %v444_v1  ;;  %v447_v42 = vadd.f32 %v415_v12, %v301_v23  ;;  %v3326_v23 = vld [vmem:[%s5313_s4 + $0x250] sm:$0xff]  ;;  %v3348_v12 = vld [vmem:[%s5313_s4 + $0x280] sm:$0xff] }
 0x12b   :  { %v505_v57 = vpop.permute.xlu1 %504 }
 0x12c   :  { %v559_v56 = vmul.f32 %v4150_v54, %v505_v57  ;;  %v560_v45 = vmul.f32 %v4152_v55, %v505_v57  ;;  %1604 = vperm.xlu1 %3756, %v3288_v11   ;;  %v622_v0 = vmax.f32 %v590_v22, 0.0  ;;  %v621_v28 = vmax.f32 %v589_v19, 0.0  ;;  %v3316_v22 = vld [vmem:[%s5313_s4 + $0x200] sm:$0xff] }
 0x12d   :  { %2520 = vperm.xlu0 %3757, %v3383_v4   ;;  %v3298_v4 = vld [vmem:[%s5313_s4 + $0x1f0] sm:$0xff] }
 0x12e   :  { %v591_v13 = vadd.f32 %v559_v56, %v445_v63  ;;  %v592_v14 = vadd.f32 %v560_v45, %v446_v3  ;;  %v3393_v63 = vld [vmem:[%s5313_s4 + $0x368] sm:$0xff]  ;;  %v4550_v45 = vpop.permute.xlu0 %975 }
 0x130   :  { %1614 = vperm.xlu1 %3756, %v3290_v8   ;;  %v271_v17 = vpop.permute.xlu1 %270  ;;  %v624_v41 = vmax.f32 %v592_v14, 0.0  ;;  %v623_v30 = vmax.f32 %v591_v13, 0.0  ;;  %v3395_v8 = vld [vmem:[%s5313_s4 + $0x378] sm:$0xff]  ;;  %v629_v13 = vld [vmem:[%s5312_s3] sm:$0xff]  ;;  %v3318_v14 = vld [vmem:[%s5313_s4 + $0x210] sm:$0xff] }
 0x131   :  { %2530 = vperm.xlu0 %3757, %v3385_v20   ;;  %v303_v9 = vadd.f32 %v271_v17, %v191_v51  ;;  %v304_v34 = vadd.f32 %v271_v17, %v192_v27  ;;  %v3413_v20 = vld [vmem:[%s5313_s4 + $0x388] sm:$0xff]  ;;  %v633_v27 = vld [vmem:[%s5312_s3 + $0x20] sm:$0xff] }
 0x132   :  { %v3452_v43 = vpack.c.bf16 %v624_v41, %v622_v0  ;;  %v3454_v50 = vpack.c.bf16 %v623_v30, %v621_v28  ;;  %v4564_v17 = vpop.permute.xlu0 %985  ;;  %v630_v0 = vld [vmem:[%s5312_s3 + $0x8] sm:$0xff]  ;;  %v3320_v41 = vld [vmem:[%s5313_s4 + $0x220] sm:$0xff]  ;;  %v3415_v28 = vld [vmem:[%s5313_s4 + $0x398] sm:$0xff] }
 0x133   :  { %v631_v30 = vld [vmem:[%s5312_s3 + $0x10] sm:$0xff] }
 0x134   :  { %1624 = vperm.xlu1 %3756, %v3292_v24   ;;  %3453 = vmatprep.subr.bf16.mxu0 %v3452_v43  ;;  %v3417_v24 = vld [vmem:[%s5313_s4 + $0x3a8] sm:$0xff]  ;;  %v632_v43 = vld [vmem:[%s5312_s3 + $0x18] sm:$0xff] }
 0x135   :  { %v367_v25 = vpop.permute.xlu1 %366  ;;  %3455 = vmatpush1.bf16.msra.mxu0 %v3454_v50  ;;  %2540 = vperm.xlu0 %3757, %v3387_v2   ;;  %v3324_v50 = vld [vmem:[%s5313_s4 + $0x240] sm:$0xff]  ;;  %v3419_v2 = vld [vmem:[%s5313_s4 + $0x3b8] sm:$0xff] }
 0x136   :  { %v417_v29 = vmul.f32 %v4129_v36, %v367_v25  ;;  %v418_v35 = vmul.f32 %v4131_v37, %v367_v25  ;;  %v4583_v38 = vpop.permute.xlu0 %995  ;;  %v634_v25 = vld [vmem:[%s5312_s3 + $0x28] sm:$0xff] }
 0x138   :  { %v449_v31 = vadd.f32 %v417_v29, %v303_v9  ;;  %v450_v7 = vadd.f32 %v418_v35, %v304_v34  ;;  %1634 = vperm.xlu1 %3756, %v3294_v47   ;;  %v3328_v47 = vld [vmem:[%s5313_s4 + $0x260] sm:$0xff]  ;;  %v3423_v34 = vld [vmem:[%s5313_s4 + $0x3d8] sm:$0xff]  ;;  %v635_v29 = vld [vmem:[%s5312_s3 + $0x30] sm:$0xff] }
 0x139   :  { %2550 = vperm.xlu0 %3757, %v3389_v58   ;;  %v3330_v35 = vld [vmem:[%s5313_s4 + $0x270] sm:$0xff]  ;;  %v3425_v58 = vld [vmem:[%s5313_s4 + $0x3e8] sm:$0xff] }
 0x13a   :  { %v509_v48 = vpop.permute.xlu1 %508  ;;  %v595_v44 = vadd.f32 %v563_v16, %v449_v31  ;;  %v596_v36 = vadd.f32 %v564_v62, %v450_v7  ;;  %v4598_v51 = vpop.permute.xlu0 %1005  ;;  %v636_v62 = vld [vmem:[%s5312_s3 + $0x38] sm:$0xff]  ;;  %v637_v7 = vld [vmem:[%s5312_s3 + $0x40] sm:$0xff] }
 0x13b   :  { %v561_v11 = vmul.f32 %v4150_v54, %v509_v48  ;;  %v562_v37 = vmul.f32 %v4152_v55, %v509_v48 }
 0x13c   :  { %1644 = vperm.xlu1 %3756, %v3296_v61   ;;  %v628_v57 = vmax.f32 %v596_v36, 0.0  ;;  %v627_v54 = vmax.f32 %v595_v44, 0.0  ;;  %v3350_v61 = vld [vmem:[%s5313_s4 + $0x290] sm:$0xff] }
 0x13d   :  { %v593_v32 = vadd.f32 %v561_v11, %v447_v42  ;;  %v594_v1 = vadd.f32 %v562_v37, %v448_v40  ;;  %2560 = vperm.xlu0 %3757, %v3391_v26   ;;  %v638_v42 = vld [vmem:[%s5312_s3 + $0x48] sm:$0xff]  ;;  %v3352_v40 = vld [vmem:[%s5313_s4 + $0x2a0] sm:$0xff]  ;;  %v639_v44 = vld [vmem:[%s5312_s3 + $0x50] sm:$0xff] }
 0x13e   :  { %v4617_v9 = vpop.permute.xlu0 %1015  ;;  %v3354_v36 = vld [vmem:[%s5313_s4 + $0x2b0] sm:$0xff]  ;;  %v640_v37 = vld [vmem:[%s5312_s3 + $0x58] sm:$0xff] }
 0x13f   :  { %v626_v3 = vmax.f32 %v594_v1, 0.0  ;;  %v625_v19 = vmax.f32 %v593_v32, 0.0  ;;  %v4644_v31 = vpop.permute.xlu1 %663  ;;  %v3356_v32 = vld [vmem:[%s5313_s4 + $0x2c0] sm:$0xff] }
 0x140   :  { %1654 = vperm.xlu1 %3756, %v3298_v4   ;;  %v641_v1 = vld [vmem:[%s5312_s3 + $0x60] sm:$0xff]  ;;  %v3358_v4 = vld [vmem:[%s5313_s4 + $0x2d0] sm:$0xff] }
 0x141   :  { %v3456_v55 = vpack.c.bf16 %v628_v57, %v626_v3  ;;  %v3458_v56 = vpack.c.bf16 %v627_v54, %v625_v19  ;;  %2570 = vperm.xlu0 %3757, %v3393_v63   ;;  %v642_v3 = vld [vmem:[%s5312_s3 + $0x68] sm:$0xff]  ;;  %v3360_v57 = vld [vmem:[%s5313_s4 + $0x2e0] sm:$0xff]  ;;  %v643_v54 = vld [vmem:[%s5312_s3 + $0x70] sm:$0xff] }
 0x142   :  { %v4632_v16 = vpop.permute.xlu0 %1025 }
 0x143   :  { %3457 = vmatprep.subr.bf16.mxu0 %v3456_v55  ;;  %v4662_v26 = vpop.permute.xlu1 %668  ;;  %v3362_v55 = vld [vmem:[%s5313_s4 + $0x2f0] sm:$0xff] }
 0x144   :  { %1891 = vperm.xlu1 %3756, %v3316_v22   ;;  %3459 = vmatpush1.bf16.msra.mxu0 %v3458_v56  ;;  %v644_v22 = vld [vmem:[%s5312_s3 + $0x78] sm:$0xff]  ;;  %v3380_v56 = vld [vmem:[%s5313_s4 + $0x300] sm:$0xff] }
 0x145   :  { %2580 = vperm.xlu0 %3757, %v3395_v8  }
 0x146   :  { %v4653_v48 = vpop.permute.xlu0 %1035 }
 0x147   :  { %806 = vmatmul.mubr.f32.vlgmr.msra.gmra.mrb[0].mxu0 %v629_v13  ;;  %v4671_v11 = vpop.permute.xlu1 %678  ;;  %v3382_v13 = vld [vmem:[%s5313_s4 + $0x310] sm:$0xff] }
 0x148   :  { %1901 = vperm.xlu1 %3756, %v3318_v14   ;;  %811 = vmatprep.mubr.f32.mxu0 %v3785_v49 }
 0x149   :  { %2817 = vperm.xlu0 %3757, %v3413_v20   ;;  %v3384_v20 = vld [vmem:[%s5313_s4 + $0x320] sm:$0xff] }
 0x14b   :  { %812 = vmatmul.mubr.f32.gmra.mrb[2].mxu0 %v630_v0  ;;  %v4687_v63 = vpop.permute.xlu1 %683  ;;  %v3386_v0 = vld [vmem:[%s5313_s4 + $0x330] sm:$0xff] }
 0x14c   :  { %1911 = vperm.xlu1 %3756, %v3320_v41   ;;  %817 = vmatprep.mubr.f32.mxu0 %v3785_v49 }
 0x14d   :  { %2827 = vperm.xlu0 %3757, %v3415_v28   ;;  %v3388_v28 = vld [vmem:[%s5313_s4 + $0x340] sm:$0xff] }
 0x14f   :  { %818 = vmatmul.mubr.f32.gmra.mrb[4].mxu0 %v631_v30  ;;  %v4696_v19 = vpop.permute.xlu1 %693 }
 0x150   :  { %1921 = vperm.xlu1 %3756, %v3322_v33   ;;  %823 = vmatprep.mubr.f32.mxu0 %v3785_v49  ;;  %v3390_v33 = vld [vmem:[%s5313_s4 + $0x350] sm:$0xff] }
 0x151   :  { %2837 = vperm.xlu0 %3757, %v3417_v24   ;;  %v3392_v24 = vld [vmem:[%s5313_s4 + $0x360] sm:$0xff] }
 0x153   :  { %824 = vmatmul.mubr.f32.gmra.mrb[6].mxu0 %v632_v43  ;;  %v4712_v8 = vpop.permute.xlu1 %703 }
 0x154   :  { %1931 = vperm.xlu1 %3756, %v3324_v50   ;;  %829 = vmatprep.mubr.f32.mxu0 %v3785_v49  ;;  %v3394_v50 = vld [vmem:[%s5313_s4 + $0x370] sm:$0xff] }
 0x155   :  { %2847 = vperm.xlu0 %3757, %v3419_v2  }
 0x157   :  { %830 = vmatmul.mubr.f32.gmra.mrb[8].mxu0 %v633_v27  ;;  %v4718_v14 = vpop.permute.xlu1 %713  ;;  %v3412_v27 = vld [vmem:[%s5313_s4 + $0x380] sm:$0xff] }
 0x158   :  { %1941 = vperm.xlu1 %3756, %v3326_v23   ;;  %835 = vmatprep.mubr.f32.mxu0 %v3785_v49  ;;  %v3414_v23 = vld [vmem:[%s5313_s4 + $0x390] sm:$0xff] }
 0x159   :  { %2857 = vperm.xlu0 %3757, %v3421_v39  }
 0x15b   :  { %836 = vmatmul.mubr.f32.gmra.mrb[10].mxu0 %v634_v25  ;;  %v4726_v41 = vpop.permute.xlu1 %723  ;;  %v3416_v25 = vld [vmem:[%s5313_s4 + $0x3a0] sm:$0xff] }
 0x15c   :  { %1951 = vperm.xlu1 %3756, %v3328_v47   ;;  %841 = vmatprep.mubr.f32.mxu0 %v3785_v49 }
 0x15d   :  { %2867 = vperm.xlu0 %3757, %v3423_v34   ;;  %v3418_v34 = vld [vmem:[%s5313_s4 + $0x3b0] sm:$0xff] }
 0x15f   :  { %842 = vmatmul.mubr.f32.gmra.mrb[12].mxu0 %v635_v29  ;;  %v4731_v30 = vpop.permute.xlu1 %733  ;;  %v3420_v29 = vld [vmem:[%s5313_s4 + $0x3c0] sm:$0xff] }
 0x160   :  { %1961 = vperm.xlu1 %3756, %v3330_v35   ;;  %847 = vmatprep.mubr.f32.mxu0 %v3785_v49 }
 0x161   :  { %2877 = vperm.xlu0 %3757, %v3425_v58   ;;  %v3422_v58 = vld [vmem:[%s5313_s4 + $0x3d0] sm:$0xff] }
 0x163   :  { %848 = vmatmul.mubr.f32.gmra.mrb[14].mxu0 %v636_v62  ;;  %v4739_v43 = vpop.permute.xlu1 %970 }
 0x164   :  { %2198 = vperm.xlu1 %3756, %v3348_v12   ;;  %853 = vmatprep.mubr.f32.mxu0 %v3785_v49  ;;  %v3424_v12 = vld [vmem:[%s5313_s4 + $0x3e0] sm:$0xff] }
 0x165   :  { %2887 = vperm.xlu0 %3757, %v3427_v6   ;;  %v3426_v6 = vld [vmem:[%s5313_s4 + $0x3f0] sm:$0xff] }
 0x167   :  { %854 = vmatmul.mubr.f32.gmra.mrb[16].mxu0 %v637_v7  ;;  %v4744_v2 = vpop.permute.xlu1 %980 }
 0x168   :  { %2208 = vperm.xlu1 %3756, %v3350_v61   ;;  %859 = vmatprep.mubr.f32.mxu0 %v3785_v49  ;;  %v3155_v61 = vld [vmem:[#allocation2] sm:$0x1] }
 0x16b   :  { %860 = vmatmul.mubr.f32.gmra.mrb[18].mxu0 %v638_v42  ;;  %v4752_v39 = vpop.permute.xlu1 %990 }
 0x16c   :  { %2218 = vperm.xlu1 %3756, %v3352_v40   ;;  %865 = vmatprep.mubr.f32.mxu0 %v3785_v49 }
 0x16f   :  { %866 = vmatmul.mubr.f32.gmra.mrb[20].mxu0 %v639_v44  ;;  %v4757_v47 = vpop.permute.xlu1 %1000 }
 0x170   :  { %2228 = vperm.xlu1 %3756, %v3354_v36   ;;  %871 = vmatprep.mubr.f32.mxu0 %v3785_v49 }
 0x173   :  { %872 = vmatmul.mubr.f32.gmra.mrb[22].mxu0 %v640_v37  ;;  %v4765_v35 = vpop.permute.xlu1 %1010 }
 0x174   :  { %2238 = vperm.xlu1 %3756, %v3356_v32   ;;  %877 = vmatprep.mubr.f32.mxu0 %v3785_v49 }
 0x177   :  { %878 = vmatmul.mubr.f32.gmra.mrb[24].mxu0 %v641_v1  ;;  %v4770_v62 = vpop.permute.xlu1 %1020 }
 0x178   :  { %2248 = vperm.xlu1 %3756, %v3358_v4   ;;  %883 = vmatprep.mubr.f32.mxu0 %v3785_v49 }
 0x17b   :  { %884 = vmatmul.mubr.f32.gmra.mrb[26].mxu0 %v642_v3  ;;  %v4778_v7 = vpop.permute.xlu1 %1030 }
 0x17c   :  { %2258 = vperm.xlu1 %3756, %v3360_v57   ;;  %889 = vmatprep.mubr.f32.mxu0 %v3785_v49 }
 0x17f   :  { %890 = vmatmul.mubr.f32.gmra.mrb[28].mxu0 %v643_v54  ;;  %v4780_v42 = vpop.permute.xlu1 %1040 }
 0x180   :  { %2268 = vperm.xlu1 %3756, %v3362_v55   ;;  %895 = vmatprep.mubr.f32.mxu0 %v3785_v49 }
 0x183   :  { %896 = vmatmul.mubr.f32.gmra.mrb[30].mxu0 %v644_v22 }
 0x184   :  { %2505 = vperm.xlu1 %3756, %v3380_v56   ;;  %1419 = vmatprep.mubr.f32.mxu0 %v3785_v49 }
 0x188   :  { %2515 = vperm.xlu1 %3756, %v3382_v13  }
 0x18c   :  { %2525 = vperm.xlu1 %3756, %v3384_v20  }
 0x190   :  { %2535 = vperm.xlu1 %3756, %v3386_v0  }
 0x194   :  { %2545 = vperm.xlu1 %3756, %v3388_v28  }
 0x198   :  { %2555 = vperm.xlu1 %3756, %v3390_v33  }
 0x19c   :  { %2565 = vperm.xlu1 %3756, %v3392_v24  }
 0x1a0   :  { %2575 = vperm.xlu1 %3756, %v3394_v50  }
 0x1a4   :  { %2812 = vperm.xlu1 %3756, %v3412_v27  }
 0x1a8   :  { %2822 = vperm.xlu1 %3756, %v3414_v23  }
 0x1ac   :  { %2832 = vperm.xlu1 %3756, %v3416_v25  }
 0x1b0   :  { %2842 = vperm.xlu1 %3756, %v3418_v34  }
 0x1b4   :  { %2852 = vperm.xlu1 %3756, %v3420_v29  }
 0x1b8   :  { %2862 = vperm.xlu1 %3756, %v3422_v58  }
 0x1bc   :  { %2872 = vperm.xlu1 %3756, %v3424_v12  }
 0x1c0   :  { %2882 = vperm.xlu1 %3756, %v3426_v6  }
 0x1c4   :  { %3158 = vperm.xlu1 %3756, %v3155_v61  }
 0x21a   :  { %v807_v40 = vpop.f32.mrb[0].mxu0 }
 0x21b   :  { %v809_v44 = vpop.f32.mrb[1].mxu0  ;;  %v808_v36 = vadd.f32 %v807_v40, %v4644_v31 }
 0x21c   :  { %v810_v37 = vadd.f32 %v809_v44, %v4644_v31 }
 0x21d   :  { %v902_v57 = vmax.f32 %v808_v36, 0.0 }
 0x21e   :  { %v813_v32 = vpop.f32.mrb[2].mxu0  ;;  %v903_v55 = vmax.f32 %v810_v37, 0.0 }
 0x21f   :  { %v814_v1 = vadd.f32 %v813_v32, %v4662_v26  ;;  %v815_v4 = vpop.f32.mrb[3].mxu0 }
 0x220   :  { %v816_v3 = vadd.f32 %v815_v4, %v4662_v26 }
 0x221   :  { %v904_v54 = vmax.f32 %v814_v1, 0.0 }
 0x222   :  { %v905_v22 = vmax.f32 %v816_v3, 0.0  ;;  %v819_v56 = vpop.f32.mrb[4].mxu0 }
 0x223   :  { %v821_v13 = vpop.f32.mrb[5].mxu0  ;;  %v3462_v20 = vpack.c.bf16 %v904_v54, %v902_v57  ;;  %v820_v28 = vadd.f32 %v819_v56, %v4433_v18 }
 0x224   :  { %v3460_v0 = vpack.c.bf16 %v905_v22, %v903_v55  ;;  %v822_v33 = vadd.f32 %v821_v13, %v4433_v18 }
 0x225   :  { %v906_v27 = vmax.f32 %v820_v28, 0.0 }
 0x226   :  { %v825_v24 = vpop.f32.mrb[6].mxu0  ;;  %3461 = vmatprep.subr.bf16.mxu1 %v3460_v0  ;;  %v907_v25 = vmax.f32 %v822_v33, 0.0 }
 0x227   :  { %v826_v31 = vadd.f32 %v825_v24, %v4671_v11  ;;  %v827_v50 = vpop.f32.mrb[7].mxu0  ;;  %3463 = vmatpush1.bf16.msra.mxu1 %v3462_v20 }
 0x228   :  { %v828_v26 = vadd.f32 %v827_v50, %v4671_v11 }
 0x229   :  { %v908_v23 = vmax.f32 %v826_v31, 0.0 }
 0x22a   :  { %v909_v34 = vmax.f32 %v828_v26, 0.0  ;;  %v831_v29 = vpop.f32.mrb[8].mxu0 }
 0x22b   :  { %v3466_v58 = vpack.c.bf16 %v908_v23, %v906_v27  ;;  %v833_v12 = vpop.f32.mrb[9].mxu0  ;;  %v832_v61 = vadd.f32 %v831_v29, %v4687_v63 }
 0x22c   :  { %v3464_v6 = vpack.c.bf16 %v909_v34, %v907_v25  ;;  %v834_v18 = vadd.f32 %v833_v12, %v4687_v63 }
 0x22d   :  { %v910_v37 = vmax.f32 %v832_v61, 0.0 }
 0x22e   :  { %v837_v40 = vpop.f32.mrb[10].mxu0  ;;  %3465 = vmatprep.subr.bf16.mxu1 %v3464_v6  ;;  %v911_v1 = vmax.f32 %v834_v18, 0.0 }
 0x22f   :  { %v838_v44 = vadd.f32 %v837_v40, %v4444_v53  ;;  %v839_v36 = vpop.f32.mrb[11].mxu0  ;;  %3467 = vmatpush1.bf16.msra.mxu1 %v3466_v58 }
 0x230   :  { %v840_v11 = vadd.f32 %v839_v36, %v4444_v53 }
 0x231   :  { %v912_v32 = vmax.f32 %v838_v44, 0.0 }
 0x232   :  { %v913_v4 = vmax.f32 %v840_v11, 0.0  ;;  %v843_v3 = vpop.f32.mrb[12].mxu0 }
 0x233   :  { %v3470_v57 = vpack.c.bf16 %v912_v32, %v910_v37  ;;  %v845_v54 = vpop.f32.mrb[13].mxu0  ;;  %v844_v22 = vadd.f32 %v843_v3, %v4696_v19 }
 0x234   :  { %v3468_v55 = vpack.c.bf16 %v913_v4, %v911_v1  ;;  %v846_v63 = vadd.f32 %v845_v54, %v4696_v19 }
 0x235   :  { %v914_v0 = vmax.f32 %v844_v22, 0.0 }
 0x236   :  { %v849_v56 = vpop.f32.mrb[14].mxu0  ;;  %3469 = vmatprep.subr.bf16.mxu1 %v3468_v55  ;;  %v915_v33 = vmax.f32 %v846_v63, 0.0 }
 0x237   :  { %v850_v13 = vadd.f32 %v849_v56, %v4459_v46  ;;  %v851_v20 = vpop.f32.mrb[15].mxu0  ;;  %3471 = vmatpush1.bf16.msra.mxu1 %v3470_v57 }
 0x238   :  { %v852_v53 = vadd.f32 %v851_v20, %v4459_v46 }
 0x239   :  { %v916_v28 = vmax.f32 %v850_v13, 0.0 }
 0x23a   :  { %v917_v24 = vmax.f32 %v852_v53, 0.0  ;;  %v855_v31 = vpop.f32.mrb[16].mxu0 }
 0x23b   :  { %v3474_v50 = vpack.c.bf16 %v916_v28, %v914_v0  ;;  %v857_v26 = vpop.f32.mrb[17].mxu0  ;;  %v856_v23 = vadd.f32 %v855_v31, %v4712_v8 }
 0x23c   :  { %v3472_v27 = vpack.c.bf16 %v917_v24, %v915_v33  ;;  %v858_v19 = vadd.f32 %v857_v26, %v4712_v8 }
 0x23d   :  { %v918_v58 = vmax.f32 %v856_v23, 0.0 }
 0x23e   :  { %v861_v25 = vpop.f32.mrb[18].mxu0  ;;  %3473 = vmatprep.subr.bf16.mxu1 %v3472_v27  ;;  %v919_v6 = vmax.f32 %v858_v19, 0.0 }
 0x23f   :  { %v862_v34 = vadd.f32 %v861_v25, %v4484_v52  ;;  %v863_v29 = vpop.f32.mrb[19].mxu0  ;;  %3475 = vmatpush1.bf16.msra.mxu1 %v3474_v50 }
 0x240   :  { %v864_v46 = vadd.f32 %v863_v29, %v4484_v52 }
 0x241   :  { %v920_v12 = vmax.f32 %v862_v34, 0.0 }
 0x242   :  { %v921_v61 = vmax.f32 %v864_v46, 0.0  ;;  %v867_v18 = vpop.f32.mrb[20].mxu0 }
 0x243   :  { %v3478_v40 = vpack.c.bf16 %v920_v12, %v918_v58  ;;  %v869_v44 = vpop.f32.mrb[21].mxu0  ;;  %v868_v11 = vadd.f32 %v867_v18, %v4718_v14 }
 0x244   :  { %v3476_v36 = vpack.c.bf16 %v921_v61, %v919_v6  ;;  %v870_v8 = vadd.f32 %v869_v44, %v4718_v14  ;;  %v3207_v44 = vld [vmem:[%s5312_s3 + $0x98] sm:$0xff] }
 0x245   :  { %v922_v4 = vmax.f32 %v868_v11, 0.0  ;;  %v3209_v11 = vld [vmem:[%s5312_s3 + $0xa8] sm:$0xff] }
 0x246   :  { %v873_v37 = vpop.f32.mrb[22].mxu0  ;;  %3477 = vmatprep.subr.bf16.mxu1 %v3476_v36  ;;  %v923_v57 = vmax.f32 %v870_v8, 0.0  ;;  %v3208_v36 = vld [vmem:[%s5312_s3 + $0xa0] sm:$0xff]  ;;  %v3210_v8 = vld [vmem:[%s5312_s3 + $0xb0] sm:$0xff] }
 0x247   :  { %v874_v32 = vadd.f32 %v873_v37, %v4497_v59  ;;  %v875_v1 = vpop.f32.mrb[23].mxu0  ;;  %3479 = vmatpush1.bf16.msra.mxu1 %v3478_v40  ;;  %v3205_v40 = vld [vmem:[%s5312_s3 + $0x88] sm:$0xff]  ;;  %v3211_v37 = vld [vmem:[%s5312_s3 + $0xb8] sm:$0xff] }
 0x248   :  { %v876_v52 = vadd.f32 %v875_v1, %v4497_v59  ;;  %v3213_v1 = vld [vmem:[%s5312_s3 + $0xc8] sm:$0xff] }
 0x249   :  { %v924_v3 = vmax.f32 %v874_v32, 0.0  ;;  %v3212_v32 = vld [vmem:[%s5312_s3 + $0xc0] sm:$0xff] }
 0x24a   :  { %v925_v54 = vmax.f32 %v876_v52, 0.0  ;;  %v879_v55 = vpop.f32.mrb[24].mxu0  ;;  %v3214_v52 = vld [vmem:[%s5312_s3 + $0xd0] sm:$0xff] }
 0x24b   :  { %v3482_v22 = vpack.c.bf16 %v924_v3, %v922_v4  ;;  %v881_v63 = vpop.f32.mrb[25].mxu0  ;;  %v880_v13 = vadd.f32 %v879_v55, %v4726_v41  ;;  %v3215_v4 = vld [vmem:[%s5312_s3 + $0xd8] sm:$0xff]  ;;  %v3216_v3 = vld [vmem:[%s5312_s3 + $0xe0] sm:$0xff] }
 0x24c   :  { %v3480_v56 = vpack.c.bf16 %v925_v54, %v923_v57  ;;  %v882_v14 = vadd.f32 %v881_v63, %v4726_v41  ;;  %v3217_v57 = vld [vmem:[%s5312_s3 + $0xe8] sm:$0xff]  ;;  %v3218_v54 = vld [vmem:[%s5312_s3 + $0xf0] sm:$0xff]  ;;  %v3219_v55 = vld [vmem:[%s5312_s3 + $0xf8] sm:$0xff] }
 0x24d   :  { %v926_v28 = vmax.f32 %v880_v13, 0.0 }
 0x24e   :  { %v885_v20 = vpop.f32.mrb[26].mxu0  ;;  %3481 = vmatprep.subr.bf16.mxu1 %v3480_v56  ;;  %v927_v24 = vmax.f32 %v882_v14, 0.0 }
 0x24f   :  { %v886_v53 = vadd.f32 %v885_v20, %v4516_v60  ;;  %v887_v0 = vpop.f32.mrb[27].mxu0  ;;  %3483 = vmatpush1.bf16.msra.mxu1 %v3482_v22 }
 0x250   :  { %v888_v59 = vadd.f32 %v887_v0, %v4516_v60 }
 0x251   :  { %v928_v33 = vmax.f32 %v886_v53, 0.0 }
 0x252   :  { %v929_v31 = vmax.f32 %v888_v59, 0.0  ;;  %v891_v50 = vpop.f32.mrb[28].mxu0 }
 0x253   :  { %v3486_v26 = vpack.c.bf16 %v928_v33, %v926_v28  ;;  %v893_v27 = vpop.f32.mrb[29].mxu0  ;;  %v892_v19 = vadd.f32 %v891_v50, %v4731_v30 }
 0x254   :  { %v3484_v23 = vpack.c.bf16 %v929_v31, %v927_v24  ;;  %v894_v41 = vadd.f32 %v893_v27, %v4731_v30  ;;  %v3204_v30 = vld [vmem:[%s5312_s3 + $0x80] sm:$0xff] }
 0x255   :  { %v930_v46 = vmax.f32 %v892_v19, 0.0 }
 0x256   :  { %v897_v25 = vpop.f32.mrb[30].mxu0  ;;  %3485 = vmatprep.subr.bf16.mxu1 %v3484_v23  ;;  %v931_v12 = vmax.f32 %v894_v41, 0.0 }
 0x257   :  { %v898_v34 = vadd.f32 %v897_v25, %v4539_v21  ;;  %v899_v29 = vpop.f32.mrb[31].mxu0  ;;  %3487 = vmatpush1.bf16.msra.mxu1 %v3486_v26 }
 0x258   :  { %v900_v60 = vadd.f32 %v899_v29, %v4539_v21  ;;  %v3206_v21 = vld [vmem:[%s5312_s3 + $0x90] sm:$0xff] }
 0x259   :  { %v932_v58 = vmax.f32 %v898_v34, 0.0 }
 0x25a   :  { %v933_v6 = vmax.f32 %v900_v60, 0.0 }
 0x25b   :  { %v3490_v61 = vpack.c.bf16 %v932_v58, %v930_v46 }
 0x25c   :  { %v3488_v18 = vpack.c.bf16 %v933_v6, %v931_v12 }
 0x25e   :  { %3489 = vmatprep.subr.bf16.mxu1 %v3488_v18 }
 0x25f   :  { %3491 = vmatpush1.bf16.msra.mxu1 %v3490_v61 }
 0x262   :  { %1113 = vmatmul.mubr.f32.vlgmr.msra.gmra.mrb[0].mxu1 %v3204_v30 }
 0x263   :  { %1118 = vmatprep.mubr.f32.mxu1 %v3785_v49 }
 0x266   :  { %1119 = vmatmul.mubr.f32.gmra.mrb[2].mxu1 %v3205_v40 }
 0x267   :  { %1124 = vmatprep.mubr.f32.mxu1 %v3785_v49 }
 0x26a   :  { %1125 = vmatmul.mubr.f32.gmra.mrb[4].mxu1 %v3206_v21 }
 0x26b   :  { %1130 = vmatprep.mubr.f32.mxu1 %v3785_v49 }
 0x26e   :  { %1131 = vmatmul.mubr.f32.gmra.mrb[6].mxu1 %v3207_v44 }
 0x26f   :  { %1136 = vmatprep.mubr.f32.mxu1 %v3785_v49 }
 0x272   :  { %1137 = vmatmul.mubr.f32.gmra.mrb[8].mxu1 %v3208_v36 }
 0x273   :  { %1142 = vmatprep.mubr.f32.mxu1 %v3785_v49 }
 0x276   :  { %1143 = vmatmul.mubr.f32.gmra.mrb[10].mxu1 %v3209_v11 }
 0x277   :  { %1148 = vmatprep.mubr.f32.mxu1 %v3785_v49 }
 0x27a   :  { %1149 = vmatmul.mubr.f32.gmra.mrb[12].mxu1 %v3210_v8 }
 0x27b   :  { %1154 = vmatprep.mubr.f32.mxu1 %v3785_v49 }
 0x27e   :  { %1155 = vmatmul.mubr.f32.gmra.mrb[14].mxu1 %v3211_v37 }
 0x27f   :  { %1160 = vmatprep.mubr.f32.mxu1 %v3785_v49 }
 0x282   :  { %1161 = vmatmul.mubr.f32.gmra.mrb[16].mxu1 %v3212_v32 }
 0x283   :  { %1166 = vmatprep.mubr.f32.mxu1 %v3785_v49 }
 0x286   :  { %1167 = vmatmul.mubr.f32.gmra.mrb[18].mxu1 %v3213_v1 }
 0x287   :  { %1172 = vmatprep.mubr.f32.mxu1 %v3785_v49 }
 0x28a   :  { %1173 = vmatmul.mubr.f32.gmra.mrb[20].mxu1 %v3214_v52 }
 0x28b   :  { %1178 = vmatprep.mubr.f32.mxu1 %v3785_v49 }
 0x28e   :  { %1179 = vmatmul.mubr.f32.gmra.mrb[22].mxu1 %v3215_v4 }
 0x28f   :  { %1184 = vmatprep.mubr.f32.mxu1 %v3785_v49 }
 0x292   :  { %1185 = vmatmul.mubr.f32.gmra.mrb[24].mxu1 %v3216_v3 }
 0x293   :  { %1190 = vmatprep.mubr.f32.mxu1 %v3785_v49 }
 0x296   :  { %1191 = vmatmul.mubr.f32.gmra.mrb[26].mxu1 %v3217_v57 }
 0x297   :  { %1196 = vmatprep.mubr.f32.mxu1 %v3785_v49 }
 0x29a   :  { %1197 = vmatmul.mubr.f32.gmra.mrb[28].mxu1 %v3218_v54 }
 0x29b   :  { %1202 = vmatprep.mubr.f32.mxu1 %v3785_v49 }
 0x29e   :  { %1203 = vmatmul.mubr.f32.gmra.mrb[30].mxu1 %v3219_v55 }
 0x29f   :  { %1726 = vmatprep.mubr.f32.mxu1 %v3785_v49 }
 0x335   :  { %v1114_v22 = vpop.f32.mrb[0].mxu1 }
 0x336   :  { %v1116_v63 = vpop.f32.mrb[1].mxu1  ;;  %v1115_v56 = vadd.f32 %v1114_v22, %v4739_v43 }
 0x337   :  { %v1117_v13 = vadd.f32 %v1116_v63, %v4739_v43 }
 0x338   :  { %v1209_v59 = vmax.f32 %v1115_v56, 0.0 }
 0x339   :  { %v1120_v14 = vpop.f32.mrb[2].mxu1  ;;  %v1210_v33 = vmax.f32 %v1117_v13, 0.0 }
 0x33a   :  { %v1121_v20 = vadd.f32 %v1120_v14, %v4550_v45  ;;  %v1122_v53 = vpop.f32.mrb[3].mxu1 }
 0x33b   :  { %v1123_v0 = vadd.f32 %v1122_v53, %v4550_v45 }
 0x33c   :  { %v1211_v28 = vmax.f32 %v1121_v20, 0.0 }
 0x33d   :  { %v1212_v24 = vmax.f32 %v1123_v0, 0.0  ;;  %v1126_v31 = vpop.f32.mrb[4].mxu1 }
 0x33e   :  { %v3494_v50 = vpack.c.bf16 %v1211_v28, %v1209_v59  ;;  %v1128_v26 = vpop.f32.mrb[5].mxu1  ;;  %v1127_v23 = vadd.f32 %v1126_v31, %v4744_v2 }
 0x33f   :  { %v3492_v27 = vpack.c.bf16 %v1212_v24, %v1210_v33  ;;  %v1129_v19 = vadd.f32 %v1128_v26, %v4744_v2 }
 0x340   :  { %v1213_v34 = vmax.f32 %v1127_v23, 0.0 }
 0x341   :  { %v1132_v41 = vpop.f32.mrb[6].mxu1  ;;  %3493 = vmatprep.subr.bf16.mxu0 %v3492_v27  ;;  %v1214_v60 = vmax.f32 %v1129_v19, 0.0 }
 0x342   :  { %v1133_v43 = vadd.f32 %v1132_v41, %v4564_v17  ;;  %v1134_v25 = vpop.f32.mrb[7].mxu1  ;;  %3495 = vmatpush1.bf16.msra.mxu0 %v3494_v50 }
 0x343   :  { %v1135_v45 = vadd.f32 %v1134_v25, %v4564_v17 }
 0x344   :  { %v1215_v29 = vmax.f32 %v1133_v43, 0.0 }
 0x345   :  { %v1216_v46 = vmax.f32 %v1135_v45, 0.0  ;;  %v1138_v58 = vpop.f32.mrb[8].mxu1 }
 0x346   :  { %v3498_v12 = vpack.c.bf16 %v1215_v29, %v1213_v34  ;;  %v1140_v6 = vpop.f32.mrb[9].mxu1  ;;  %v1139_v18 = vadd.f32 %v1138_v58, %v4752_v39 }
 0x347   :  { %v3496_v61 = vpack.c.bf16 %v1216_v46, %v1214_v60  ;;  %v1141_v2 = vadd.f32 %v1140_v6, %v4752_v39 }
 0x348   :  { %v1217_v44 = vmax.f32 %v1139_v18, 0.0 }
 0x349   :  { %v1144_v30 = vpop.f32.mrb[10].mxu1  ;;  %3497 = vmatprep.subr.bf16.mxu0 %v3496_v61  ;;  %v1218_v11 = vmax.f32 %v1141_v2, 0.0 }
 0x34a   :  { %v1145_v40 = vadd.f32 %v1144_v30, %v4583_v38  ;;  %v1146_v21 = vpop.f32.mrb[11].mxu1  ;;  %3499 = vmatpush1.bf16.msra.mxu0 %v3498_v12 }
 0x34b   :  { %v1147_v17 = vadd.f32 %v1146_v21, %v4583_v38 }
 0x34c   :  { %v1219_v36 = vmax.f32 %v1145_v40, 0.0 }
 0x34d   :  { %v1220_v8 = vmax.f32 %v1147_v17, 0.0  ;;  %v1150_v37 = vpop.f32.mrb[12].mxu1 }
 0x34e   :  { %v3502_v32 = vpack.c.bf16 %v1219_v36, %v1217_v44  ;;  %v1152_v1 = vpop.f32.mrb[13].mxu1  ;;  %v1151_v4 = vadd.f32 %v1150_v37, %v4757_v47 }
 0x34f   :  { %v3500_v52 = vpack.c.bf16 %v1220_v8, %v1218_v11  ;;  %v1153_v39 = vadd.f32 %v1152_v1, %v4757_v47 }
 0x350   :  { %v1221_v55 = vmax.f32 %v1151_v4, 0.0  ;;  %v1046_v4 = vpop.permute.xlu0 %1045 }
 0x351   :  { %v1156_v3 = vpop.f32.mrb[14].mxu1  ;;  %3501 = vmatprep.subr.bf16.mxu0 %v3500_v52  ;;  %v1222_v63 = vmax.f32 %v1153_v39, 0.0 }
 0x352   :  { %v1157_v57 = vadd.f32 %v1156_v3, %v4598_v51  ;;  %v1158_v54 = vpop.f32.mrb[15].mxu1  ;;  %3503 = vmatpush1.bf16.msra.mxu0 %v3502_v32 }
 0x353   :  { %v1159_v38 = vadd.f32 %v1158_v54, %v4598_v51 }
 0x354   :  { %v1223_v22 = vmax.f32 %v1157_v57, 0.0 }
 0x355   :  { %v1224_v56 = vmax.f32 %v1159_v38, 0.0  ;;  %v1162_v13 = vpop.f32.mrb[16].mxu1 }
 0x356   :  { %v3506_v14 = vpack.c.bf16 %v1223_v22, %v1221_v55  ;;  %v1164_v20 = vpop.f32.mrb[17].mxu1  ;;  %v1163_v0 = vadd.f32 %v1162_v13, %v4765_v35  ;;  %v3236_v13 = vld [vmem:[%s5312_s3 + $0x100] sm:$0xff] }
 0x357   :  { %v3504_v53 = vpack.c.bf16 %v1224_v56, %v1222_v63  ;;  %v1165_v47 = vadd.f32 %v1164_v20, %v4765_v35  ;;  %v3239_v20 = vld [vmem:[%s5312_s3 + $0x118] sm:$0xff] }
 0x358   :  { %v1225_v24 = vmax.f32 %v1163_v0, 0.0  ;;  %v3241_v0 = vld [vmem:[%s5312_s3 + $0x128] sm:$0xff] }
 0x359   :  { %v1168_v59 = vpop.f32.mrb[18].mxu1  ;;  %3505 = vmatprep.subr.bf16.mxu0 %v3504_v53  ;;  %v1226_v50 = vmax.f32 %v1165_v47, 0.0  ;;  %v3240_v53 = vld [vmem:[%s5312_s3 + $0x120] sm:$0xff]  ;;  %v3242_v47 = vld [vmem:[%s5312_s3 + $0x130] sm:$0xff] }
 0x35a   :  { %v1169_v28 = vadd.f32 %v1168_v59, %v4617_v9  ;;  %v1170_v33 = vpop.f32.mrb[19].mxu1  ;;  %3507 = vmatpush1.bf16.msra.mxu0 %v3506_v14  ;;  %v3238_v14 = vld [vmem:[%s5312_s3 + $0x110] sm:$0xff]  ;;  %v3243_v59 = vld [vmem:[%s5312_s3 + $0x138] sm:$0xff] }
 0x35b   :  { %v1171_v51 = vadd.f32 %v1170_v33, %v4617_v9  ;;  %v3245_v33 = vld [vmem:[%s5312_s3 + $0x148] sm:$0xff] }
 0x35c   :  { %v1227_v31 = vmax.f32 %v1169_v28, 0.0  ;;  %v3244_v28 = vld [vmem:[%s5312_s3 + $0x140] sm:$0xff] }
 0x35d   :  { %v1228_v26 = vmax.f32 %v1171_v51, 0.0  ;;  %v1174_v27 = vpop.f32.mrb[20].mxu1  ;;  %v3246_v51 = vld [vmem:[%s5312_s3 + $0x150] sm:$0xff] }
 0x35e   :  { %v3510_v23 = vpack.c.bf16 %v1227_v31, %v1225_v24  ;;  %v1176_v19 = vpop.f32.mrb[21].mxu1  ;;  %v1175_v43 = vadd.f32 %v1174_v27, %v4770_v62  ;;  %v3247_v24 = vld [vmem:[%s5312_s3 + $0x158] sm:$0xff]  ;;  %v3248_v31 = vld [vmem:[%s5312_s3 + $0x160] sm:$0xff] }
 0x35f   :  { %v3508_v41 = vpack.c.bf16 %v1228_v26, %v1226_v50  ;;  %v1177_v35 = vadd.f32 %v1176_v19, %v4770_v62  ;;  %v3249_v50 = vld [vmem:[%s5312_s3 + $0x168] sm:$0xff]  ;;  %v3250_v26 = vld [vmem:[%s5312_s3 + $0x170] sm:$0xff]  ;;  %v3251_v27 = vld [vmem:[%s5312_s3 + $0x178] sm:$0xff] }
 0x360   :  { %v1229_v29 = vmax.f32 %v1175_v43, 0.0 }
 0x361   :  { %v1180_v25 = vpop.f32.mrb[22].mxu1  ;;  %3509 = vmatprep.subr.bf16.mxu0 %v3508_v41  ;;  %v1230_v46 = vmax.f32 %v1177_v35, 0.0  ;;  %v1278_v41 = vpop.permute.xlu1 %1277 }
 0x362   :  { %v1181_v45 = vadd.f32 %v1180_v25, %v4632_v16  ;;  %v1182_v34 = vpop.f32.mrb[23].mxu1  ;;  %3511 = vmatpush1.bf16.msra.mxu0 %v3510_v23  ;;  %v1283_v35 = vpop.permute.xlu0 %1282 }
 0x363   :  { %v1183_v9 = vadd.f32 %v1182_v34, %v4632_v16 }
 0x364   :  { %v1231_v60 = vmax.f32 %v1181_v45, 0.0 }
 0x365   :  { %v1232_v58 = vmax.f32 %v1183_v9, 0.0  ;;  %v1186_v12 = vpop.f32.mrb[24].mxu1 }
 0x366   :  { %v3514_v6 = vpack.c.bf16 %v1231_v60, %v1229_v29  ;;  %v1188_v61 = vpop.f32.mrb[25].mxu1  ;;  %v1187_v2 = vadd.f32 %v1186_v12, %v4778_v7 }
 0x367   :  { %v3512_v18 = vpack.c.bf16 %v1232_v58, %v1230_v46  ;;  %v1189_v62 = vadd.f32 %v1188_v61, %v4778_v7 }
 0x368   :  { %v1233_v17 = vmax.f32 %v1187_v2, 0.0  ;;  %v1288_v2 = vpop.permute.xlu1 %1287 }
 0x369   :  { %v1192_v30 = vpop.f32.mrb[26].mxu1  ;;  %3513 = vmatprep.subr.bf16.mxu0 %v3512_v18  ;;  %v1234_v36 = vmax.f32 %v1189_v62, 0.0 }
 0x36a   :  { %v1193_v40 = vadd.f32 %v1192_v30, %v4653_v48  ;;  %v1194_v21 = vpop.f32.mrb[27].mxu1  ;;  %3515 = vmatpush1.bf16.msra.mxu0 %v3514_v6 }
 0x36b   :  { %v1195_v16 = vadd.f32 %v1194_v21, %v4653_v48 }
 0x36c   :  { %v1235_v44 = vmax.f32 %v1193_v40, 0.0  ;;  %v1293_v40 = vpop.permute.xlu0 %1292 }
 0x36d   :  { %v1236_v11 = vmax.f32 %v1195_v16, 0.0  ;;  %v1198_v8 = vpop.f32.mrb[28].mxu1 }
 0x36e   :  { %v3518_v37 = vpack.c.bf16 %v1235_v44, %v1233_v17  ;;  %v1200_v32 = vpop.f32.mrb[29].mxu1  ;;  %v1199_v52 = vadd.f32 %v1198_v8, %v4780_v42 }
 0x36f   :  { %v3516_v1 = vpack.c.bf16 %v1236_v11, %v1234_v36  ;;  %v1201_v7 = vadd.f32 %v1200_v32, %v4780_v42  ;;  %v3237_v42 = vld [vmem:[%s5312_s3 + $0x108] sm:$0xff] }
 0x370   :  { %v1237_v48 = vmax.f32 %v1199_v52, 0.0 }
 0x371   :  { %v1204_v39 = vpop.f32.mrb[30].mxu1  ;;  %3517 = vmatprep.subr.bf16.mxu0 %v3516_v1  ;;  %v1238_v55 = vmax.f32 %v1201_v7, 0.0  ;;  %v1298_v7 = vpop.permute.xlu1 %1297 }
 0x372   :  { %v1205_v3 = vadd.f32 %v1204_v39, %v1046_v4  ;;  %v1206_v57 = vpop.f32.mrb[31].mxu1  ;;  %3519 = vmatpush1.bf16.msra.mxu0 %v3518_v37 }
 0x373   :  { %v1207_v54 = vadd.f32 %v1206_v57, %v1046_v4  ;;  %v1303_v57 = vpop.permute.xlu0 %1302 }
 0x374   :  { %v1239_v38 = vmax.f32 %v1205_v3, 0.0 }
 0x375   :  { %v1240_v22 = vmax.f32 %v1207_v54, 0.0 }
 0x376   :  { %v3522_v63 = vpack.c.bf16 %v1239_v38, %v1237_v48 }
 0x377   :  { %v3520_v56 = vpack.c.bf16 %v1240_v22, %v1238_v55 }
 0x379   :  { %3521 = vmatprep.subr.bf16.mxu0 %v3520_v56 }
 0x37a   :  { %3523 = vmatpush1.bf16.msra.mxu0 %v3522_v63 }
 0x37d   :  { %1420 = vmatmul.mubr.f32.vlgmr.msra.gmra.mrb[32].mxu0 %v3236_v13 }
 0x37e   :  { %1425 = vmatprep.mubr.f32.mxu0 %v3785_v49 }
 0x381   :  { %1426 = vmatmul.mubr.f32.gmra.mrb[34].mxu0 %v3237_v42 }
 0x382   :  { %1431 = vmatprep.mubr.f32.mxu0 %v3785_v49 }
 0x385   :  { %1432 = vmatmul.mubr.f32.gmra.mrb[36].mxu0 %v3238_v14 }
 0x386   :  { %1437 = vmatprep.mubr.f32.mxu0 %v3785_v49 }
 0x389   :  { %1438 = vmatmul.mubr.f32.gmra.mrb[38].mxu0 %v3239_v20 }
 0x38a   :  { %1443 = vmatprep.mubr.f32.mxu0 %v3785_v49 }
 0x38d   :  { %1444 = vmatmul.mubr.f32.gmra.mrb[40].mxu0 %v3240_v53 }
 0x38e   :  { %1449 = vmatprep.mubr.f32.mxu0 %v3785_v49 }
 0x391   :  { %1450 = vmatmul.mubr.f32.gmra.mrb[42].mxu0 %v3241_v0  ;;  %v1308_v0 = vpop.permute.xlu1 %1307 }
 0x392   :  { %1455 = vmatprep.mubr.f32.mxu0 %v3785_v49 }
 0x395   :  { %1456 = vmatmul.mubr.f32.gmra.mrb[44].mxu0 %v3242_v47 }
 0x396   :  { %1461 = vmatprep.mubr.f32.mxu0 %v3785_v49 }
 0x399   :  { %1462 = vmatmul.mubr.f32.gmra.mrb[46].mxu0 %v3243_v59 }
 0x39a   :  { %1467 = vmatprep.mubr.f32.mxu0 %v3785_v49 }
 0x39d   :  { %1468 = vmatmul.mubr.f32.gmra.mrb[48].mxu0 %v3244_v28  ;;  %v1313_v28 = vpop.permute.xlu0 %1312 }
 0x39e   :  { %1473 = vmatprep.mubr.f32.mxu0 %v3785_v49 }
 0x3a1   :  { %1474 = vmatmul.mubr.f32.gmra.mrb[50].mxu0 %v3245_v33 }
 0x3a2   :  { %1479 = vmatprep.mubr.f32.mxu0 %v3785_v49 }
 0x3a5   :  { %1480 = vmatmul.mubr.f32.gmra.mrb[52].mxu0 %v3246_v51 }
 0x3a6   :  { %1485 = vmatprep.mubr.f32.mxu0 %v3785_v49 }
 0x3a9   :  { %1486 = vmatmul.mubr.f32.gmra.mrb[54].mxu0 %v3247_v24 }
 0x3aa   :  { %1491 = vmatprep.mubr.f32.mxu0 %v3785_v49 }
 0x3ad   :  { %1492 = vmatmul.mubr.f32.gmra.mrb[56].mxu0 %v3248_v31 }
 0x3ae   :  { %1497 = vmatprep.mubr.f32.mxu0 %v3785_v49 }
 0x3b1   :  { %1498 = vmatmul.mubr.f32.gmra.mrb[58].mxu0 %v3249_v50 }
 0x3b2   :  { %1503 = vmatprep.mubr.f32.mxu0 %v3785_v49 }
 0x3b5   :  { %1504 = vmatmul.mubr.f32.gmra.mrb[60].mxu0 %v3250_v26 }
 0x3b6   :  { %1509 = vmatprep.mubr.f32.mxu0 %v3785_v49 }
 0x3b9   :  { %1510 = vmatmul.mubr.f32.gmra.mrb[62].mxu0 %v3251_v27 }
 0x3ba   :  { %2033 = vmatprep.mubr.f32.mxu0 %v3785_v49 }
 0x450   :  { %v1421_v23 = vpop.f32.mrb[32].mxu0 }
 0x451   :  { %v1423_v19 = vpop.f32.mrb[33].mxu0  ;;  %v1422_v43 = vadd.f32 %v1421_v23, %v1278_v41 }
 0x452   :  { %v1424_v25 = vadd.f32 %v1423_v19, %v1278_v41 }
 0x453   :  { %v1516_v60 = vmax.f32 %v1422_v43, 0.0 }
 0x454   :  { %v1427_v45 = vpop.f32.mrb[34].mxu0  ;;  %v1517_v58 = vmax.f32 %v1424_v25, 0.0  ;;  %v1318_v25 = vpop.permute.xlu1 %1317 }
 0x455   :  { %v1428_v34 = vadd.f32 %v1427_v45, %v1283_v35  ;;  %v1429_v9 = vpop.f32.mrb[35].mxu0 }
 0x456   :  { %v1430_v29 = vadd.f32 %v1429_v9, %v1283_v35  ;;  %v1323_v9 = vpop.permute.xlu0 %1322 }
 0x457   :  { %v1518_v46 = vmax.f32 %v1428_v34, 0.0 }
 0x458   :  { %v1519_v12 = vmax.f32 %v1430_v29, 0.0  ;;  %v1433_v6 = vpop.f32.mrb[36].mxu0 }
 0x459   :  { %v3526_v61 = vpack.c.bf16 %v1518_v46, %v1516_v60  ;;  %v1435_v18 = vpop.f32.mrb[37].mxu0  ;;  %v1434_v30 = vadd.f32 %v1433_v6, %v1288_v2 }
 0x45a   :  { %v3524_v62 = vpack.c.bf16 %v1519_v12, %v1517_v58  ;;  %v1436_v21 = vadd.f32 %v1435_v18, %v1288_v2 }
 0x45b   :  { %v1520_v11 = vmax.f32 %v1434_v30, 0.0 }
 0x45c   :  { %v1439_v16 = vpop.f32.mrb[38].mxu0  ;;  %3525 = vmatprep.subr.bf16.mxu1 %v3524_v62  ;;  %v1521_v37 = vmax.f32 %v1436_v21, 0.0  ;;  %v1328_v21 = vpop.permute.xlu1 %1327 }
 0x45d   :  { %v1440_v17 = vadd.f32 %v1439_v16, %v1293_v40  ;;  %v1441_v44 = vpop.f32.mrb[39].mxu0  ;;  %3527 = vmatpush1.bf16.msra.mxu1 %v3526_v61 }
 0x45e   :  { %v1442_v36 = vadd.f32 %v1441_v44, %v1293_v40  ;;  %v1333_v44 = vpop.permute.xlu0 %1332 }
 0x45f   :  { %v1522_v8 = vmax.f32 %v1440_v17, 0.0 }
 0x460   :  { %v1523_v32 = vmax.f32 %v1442_v36, 0.0  ;;  %v1445_v1 = vpop.f32.mrb[40].mxu0 }
 0x461   :  { %v3530_v52 = vpack.c.bf16 %v1522_v8, %v1520_v11  ;;  %v1447_v4 = vpop.f32.mrb[41].mxu0  ;;  %v1446_v3 = vadd.f32 %v1445_v1, %v1298_v7 }
 0x462   :  { %v3528_v39 = vpack.c.bf16 %v1523_v32, %v1521_v37  ;;  %v1448_v54 = vadd.f32 %v1447_v4, %v1298_v7 }
 0x463   :  { %v1524_v63 = vmax.f32 %v1446_v3, 0.0 }
 0x464   :  { %v1451_v48 = vpop.f32.mrb[42].mxu0  ;;  %3529 = vmatprep.subr.bf16.mxu1 %v3528_v39  ;;  %v1525_v13 = vmax.f32 %v1448_v54, 0.0  ;;  %v1338_v54 = vpop.permute.xlu1 %1337 }
 0x465   :  { %v1452_v38 = vadd.f32 %v1451_v48, %v1303_v57  ;;  %v1453_v55 = vpop.f32.mrb[43].mxu0  ;;  %3531 = vmatpush1.bf16.msra.mxu1 %v3530_v52 }
 0x466   :  { %v1454_v22 = vadd.f32 %v1453_v55, %v1303_v57  ;;  %v1343_v55 = vpop.permute.xlu0 %1342 }
 0x467   :  { %v1526_v56 = vmax.f32 %v1452_v38, 0.0 }
 0x468   :  { %v1527_v42 = vmax.f32 %v1454_v22, 0.0  ;;  %v1457_v14 = vpop.f32.mrb[44].mxu0 }
 0x469   :  { %v3534_v20 = vpack.c.bf16 %v1526_v56, %v1524_v63  ;;  %v1459_v53 = vpop.f32.mrb[45].mxu0  ;;  %v1458_v59 = vadd.f32 %v1457_v14, %v1308_v0 }
 0x46a   :  { %v3532_v47 = vpack.c.bf16 %v1527_v42, %v1525_v13  ;;  %v1460_v33 = vadd.f32 %v1459_v53, %v1308_v0 }
 0x46b   :  { %v1528_v26 = vmax.f32 %v1458_v59, 0.0 }
 0x46c   :  { %v1463_v51 = vpop.f32.mrb[46].mxu0  ;;  %3533 = vmatprep.subr.bf16.mxu1 %v3532_v47  ;;  %v1529_v23 = vmax.f32 %v1460_v33, 0.0  ;;  %v1348_v33 = vpop.permute.xlu1 %1347 }
 0x46d   :  { %v1464_v24 = vadd.f32 %v1463_v51, %v1313_v28  ;;  %v1465_v31 = vpop.f32.mrb[47].mxu0  ;;  %3535 = vmatpush1.bf16.msra.mxu1 %v3534_v20 }
 0x46e   :  { %v1466_v50 = vadd.f32 %v1465_v31, %v1313_v28  ;;  %v1353_v31 = vpop.permute.xlu0 %1352 }
 0x46f   :  { %v1530_v27 = vmax.f32 %v1464_v24, 0.0 }
 0x470   :  { %v1531_v19 = vmax.f32 %v1466_v50, 0.0  ;;  %v1469_v41 = vpop.f32.mrb[48].mxu0 }
 0x471   :  { %v3538_v43 = vpack.c.bf16 %v1530_v27, %v1528_v26  ;;  %v1471_v35 = vpop.f32.mrb[49].mxu0  ;;  %v1470_v34 = vadd.f32 %v1469_v41, %v1318_v25 }
 0x472   :  { %v3536_v45 = vpack.c.bf16 %v1531_v19, %v1529_v23  ;;  %v1472_v29 = vadd.f32 %v1471_v35, %v1318_v25 }
 0x473   :  { %v1532_v6 = vmax.f32 %v1470_v34, 0.0 }
 0x474   :  { %v1475_v60 = vpop.f32.mrb[50].mxu0  ;;  %3537 = vmatprep.subr.bf16.mxu1 %v3536_v45  ;;  %v1533_v18 = vmax.f32 %v1472_v29, 0.0  ;;  %v3269_v29 = vld [vmem:[%s5312_s3 + $0x188] sm:$0xff] }
 0x475   :  { %v1476_v46 = vadd.f32 %v1475_v60, %v1323_v9  ;;  %v1477_v58 = vpop.f32.mrb[51].mxu0  ;;  %3539 = vmatpush1.bf16.msra.mxu1 %v3538_v43  ;;  %v3270_v60 = vld [vmem:[%s5312_s3 + $0x190] sm:$0xff] }
 0x476   :  { %v1478_v12 = vadd.f32 %v1477_v58, %v1323_v9  ;;  %v3268_v9 = vld [vmem:[%s5312_s3 + $0x180] sm:$0xff] }
 0x477   :  { %v1534_v61 = vmax.f32 %v1476_v46, 0.0  ;;  %v3271_v46 = vld [vmem:[%s5312_s3 + $0x198] sm:$0xff]  ;;  %v3272_v58 = vld [vmem:[%s5312_s3 + $0x1a0] sm:$0xff] }
 0x478   :  { %v1535_v2 = vmax.f32 %v1478_v12, 0.0  ;;  %v1481_v62 = vpop.f32.mrb[52].mxu0  ;;  %v3273_v12 = vld [vmem:[%s5312_s3 + $0x1a8] sm:$0xff] }
 0x479   :  { %v3542_v30 = vpack.c.bf16 %v1534_v61, %v1532_v6  ;;  %v1483_v40 = vpop.f32.mrb[53].mxu0  ;;  %v1482_v17 = vadd.f32 %v1481_v62, %v1328_v21  ;;  %v3274_v6 = vld [vmem:[%s5312_s3 + $0x1b0] sm:$0xff]  ;;  %v3275_v61 = vld [vmem:[%s5312_s3 + $0x1b8] sm:$0xff] }
 0x47a   :  { %v3540_v16 = vpack.c.bf16 %v1535_v2, %v1533_v18  ;;  %v1484_v36 = vadd.f32 %v1483_v40, %v1328_v21  ;;  %v3276_v18 = vld [vmem:[%s5312_s3 + $0x1c0] sm:$0xff]  ;;  %v3277_v2 = vld [vmem:[%s5312_s3 + $0x1c8] sm:$0xff]  ;;  %v3278_v62 = vld [vmem:[%s5312_s3 + $0x1d0] sm:$0xff] }
 0x47b   :  { %v1536_v1 = vmax.f32 %v1482_v17, 0.0  ;;  %v3280_v40 = vld [vmem:[%s5312_s3 + $0x1e0] sm:$0xff]  ;;  %v3281_v21 = vld [vmem:[%s5312_s3 + $0x1e8] sm:$0xff]  ;;  %v3283_v17 = vld [vmem:[%s5312_s3 + $0x1f8] sm:$0xff] }
 0x47c   :  { %v1487_v11 = vpop.f32.mrb[54].mxu0  ;;  %3541 = vmatprep.subr.bf16.mxu1 %v3540_v16  ;;  %v1537_v4 = vmax.f32 %v1484_v36, 0.0  ;;  %v3282_v16 = vld [vmem:[%s5312_s3 + $0x1f0] sm:$0xff] }
 0x47d   :  { %v1488_v8 = vadd.f32 %v1487_v11, %v1333_v44  ;;  %v1489_v37 = vpop.f32.mrb[55].mxu0  ;;  %3543 = vmatpush1.bf16.msra.mxu1 %v3542_v30  ;;  %v3279_v30 = vld [vmem:[%s5312_s3 + $0x1d8] sm:$0xff]  ;;  %v1585_v11 = vpop.permute.xlu1 %1584 }
 0x47e   :  { %v1490_v32 = vadd.f32 %v1489_v37, %v1333_v44  ;;  %v1590_v37 = vpop.permute.xlu0 %1589 }
 0x47f   :  { %v1538_v52 = vmax.f32 %v1488_v8, 0.0 }
 0x480   :  { %v1539_v7 = vmax.f32 %v1490_v32, 0.0  ;;  %v1493_v39 = vpop.f32.mrb[56].mxu0 }
 0x481   :  { %v3546_v3 = vpack.c.bf16 %v1538_v52, %v1536_v1  ;;  %v1495_v57 = vpop.f32.mrb[57].mxu0  ;;  %v1494_v38 = vadd.f32 %v1493_v39, %v1338_v54 }
 0x482   :  { %v3544_v48 = vpack.c.bf16 %v1539_v7, %v1537_v4  ;;  %v1496_v22 = vadd.f32 %v1495_v57, %v1338_v54 }
 0x483   :  { %v1540_v14 = vmax.f32 %v1494_v38, 0.0 }
 0x484   :  { %v1499_v63 = vpop.f32.mrb[58].mxu0  ;;  %3545 = vmatprep.subr.bf16.mxu1 %v3544_v48  ;;  %v1541_v53 = vmax.f32 %v1496_v22, 0.0  ;;  %v1595_v22 = vpop.permute.xlu1 %1594 }
 0x485   :  { %v1500_v56 = vadd.f32 %v1499_v63, %v1343_v55  ;;  %v1501_v13 = vpop.f32.mrb[59].mxu0  ;;  %3547 = vmatpush1.bf16.msra.mxu1 %v3546_v3 }
 0x486   :  { %v1502_v42 = vadd.f32 %v1501_v13, %v1343_v55  ;;  %v1600_v13 = vpop.permute.xlu0 %1599 }
 0x487   :  { %v1542_v20 = vmax.f32 %v1500_v56, 0.0 }
 0x488   :  { %v1543_v0 = vmax.f32 %v1502_v42, 0.0  ;;  %v1505_v47 = vpop.f32.mrb[60].mxu0 }
 0x489   :  { %v3550_v59 = vpack.c.bf16 %v1542_v20, %v1540_v14  ;;  %v1507_v28 = vpop.f32.mrb[61].mxu0  ;;  %v1506_v24 = vadd.f32 %v1505_v47, %v1348_v33 }
 0x48a   :  { %v3548_v51 = vpack.c.bf16 %v1543_v0, %v1541_v53  ;;  %v1508_v50 = vadd.f32 %v1507_v28, %v1348_v33 }
 0x48b   :  { %v1544_v41 = vmax.f32 %v1506_v24, 0.0 }
 0x48c   :  { %v1511_v26 = vpop.f32.mrb[62].mxu0  ;;  %3549 = vmatprep.subr.bf16.mxu1 %v3548_v51  ;;  %v1545_v35 = vmax.f32 %v1508_v50, 0.0  ;;  %v1605_v50 = vpop.permute.xlu1 %1604 }
 0x48d   :  { %v1512_v27 = vadd.f32 %v1511_v26, %v1353_v31  ;;  %v1513_v23 = vpop.f32.mrb[63].mxu0  ;;  %3551 = vmatpush1.bf16.msra.mxu1 %v3550_v59 }
 0x48e   :  { %v1514_v19 = vadd.f32 %v1513_v23, %v1353_v31  ;;  %v1610_v23 = vpop.permute.xlu0 %1609 }
 0x48f   :  { %v1546_v43 = vmax.f32 %v1512_v27, 0.0 }
 0x490   :  { %v1547_v25 = vmax.f32 %v1514_v19, 0.0 }
 0x491   :  { %v3554_v45 = vpack.c.bf16 %v1546_v43, %v1544_v41 }
 0x492   :  { %v3552_v34 = vpack.c.bf16 %v1547_v25, %v1545_v35 }
 0x494   :  { %3553 = vmatprep.subr.bf16.mxu1 %v3552_v34 }
 0x495   :  { %3555 = vmatpush1.bf16.msra.mxu1 %v3554_v45 }
 0x498   :  { %1727 = vmatmul.mubr.f32.vlgmr.msra.gmra.mrb[32].mxu1 %v3268_v9 }
 0x499   :  { %1732 = vmatprep.mubr.f32.mxu1 %v3785_v49 }
 0x49c   :  { %1733 = vmatmul.mubr.f32.gmra.mrb[34].mxu1 %v3269_v29 }
 0x49d   :  { %1738 = vmatprep.mubr.f32.mxu1 %v3785_v49 }
 0x4a0   :  { %1739 = vmatmul.mubr.f32.gmra.mrb[36].mxu1 %v3270_v60 }
 0x4a1   :  { %1744 = vmatprep.mubr.f32.mxu1 %v3785_v49 }
 0x4a4   :  { %1745 = vmatmul.mubr.f32.gmra.mrb[38].mxu1 %v3271_v46 }
 0x4a5   :  { %1750 = vmatprep.mubr.f32.mxu1 %v3785_v49 }
 0x4a8   :  { %1751 = vmatmul.mubr.f32.gmra.mrb[40].mxu1 %v3272_v58 }
 0x4a9   :  { %1756 = vmatprep.mubr.f32.mxu1 %v3785_v49 }
 0x4ac   :  { %1757 = vmatmul.mubr.f32.gmra.mrb[42].mxu1 %v3273_v12  ;;  %v1615_v12 = vpop.permute.xlu1 %1614 }
 0x4ad   :  { %1762 = vmatprep.mubr.f32.mxu1 %v3785_v49 }
 0x4b0   :  { %1763 = vmatmul.mubr.f32.gmra.mrb[44].mxu1 %v3274_v6 }
 0x4b1   :  { %1768 = vmatprep.mubr.f32.mxu1 %v3785_v49 }
 0x4b4   :  { %1769 = vmatmul.mubr.f32.gmra.mrb[46].mxu1 %v3275_v61 }
 0x4b5   :  { %1774 = vmatprep.mubr.f32.mxu1 %v3785_v49 }
 0x4b8   :  { %1775 = vmatmul.mubr.f32.gmra.mrb[48].mxu1 %v3276_v18  ;;  %v1620_v18 = vpop.permute.xlu0 %1619 }
 0x4b9   :  { %1780 = vmatprep.mubr.f32.mxu1 %v3785_v49 }
 0x4bc   :  { %1781 = vmatmul.mubr.f32.gmra.mrb[50].mxu1 %v3277_v2 }
 0x4bd   :  { %1786 = vmatprep.mubr.f32.mxu1 %v3785_v49 }
 0x4c0   :  { %1787 = vmatmul.mubr.f32.gmra.mrb[52].mxu1 %v3278_v62 }
 0x4c1   :  { %1792 = vmatprep.mubr.f32.mxu1 %v3785_v49 }
 0x4c4   :  { %1793 = vmatmul.mubr.f32.gmra.mrb[54].mxu1 %v3279_v30 }
 0x4c5   :  { %1798 = vmatprep.mubr.f32.mxu1 %v3785_v49 }
 0x4c8   :  { %1799 = vmatmul.mubr.f32.gmra.mrb[56].mxu1 %v3280_v40 }
 0x4c9   :  { %1804 = vmatprep.mubr.f32.mxu1 %v3785_v49 }
 0x4cc   :  { %1805 = vmatmul.mubr.f32.gmra.mrb[58].mxu1 %v3281_v21 }
 0x4cd   :  { %1810 = vmatprep.mubr.f32.mxu1 %v3785_v49 }
 0x4d0   :  { %1811 = vmatmul.mubr.f32.gmra.mrb[60].mxu1 %v3282_v16 }
 0x4d1   :  { %1816 = vmatprep.mubr.f32.mxu1 %v3785_v49 }
 0x4d4   :  { %1817 = vmatmul.mubr.f32.gmra.mrb[62].mxu1 %v3283_v17 }
 0x4d5   :  { %2340 = vmatprep.mubr.f32.mxu1 %v3785_v49 }
 0x56b   :  { %v1728_v44 = vpop.f32.mrb[32].mxu1 }
 0x56c   :  { %v1730_v36 = vpop.f32.mrb[33].mxu1  ;;  %v1729_v8 = vadd.f32 %v1728_v44, %v1585_v11 }
 0x56d   :  { %v1731_v32 = vadd.f32 %v1730_v36, %v1585_v11 }
 0x56e   :  { %v1823_v39 = vmax.f32 %v1729_v8, 0.0 }
 0x56f   :  { %v1734_v1 = vpop.f32.mrb[34].mxu1  ;;  %v1824_v57 = vmax.f32 %v1731_v32, 0.0  ;;  %v1625_v32 = vpop.permute.xlu1 %1624 }
 0x570   :  { %v1735_v52 = vadd.f32 %v1734_v1, %v1590_v37  ;;  %v1736_v4 = vpop.f32.mrb[35].mxu1 }
 0x571   :  { %v1737_v7 = vadd.f32 %v1736_v4, %v1590_v37  ;;  %v1630_v4 = vpop.permute.xlu0 %1629 }
 0x572   :  { %v1825_v3 = vmax.f32 %v1735_v52, 0.0 }
 0x573   :  { %v1826_v54 = vmax.f32 %v1737_v7, 0.0  ;;  %v1740_v48 = vpop.f32.mrb[36].mxu1 }
 0x574   :  { %v3558_v38 = vpack.c.bf16 %v1825_v3, %v1823_v39  ;;  %v1742_v55 = vpop.f32.mrb[37].mxu1  ;;  %v1741_v56 = vadd.f32 %v1740_v48, %v1595_v22 }
 0x575   :  { %v3556_v63 = vpack.c.bf16 %v1826_v54, %v1824_v57  ;;  %v1743_v42 = vadd.f32 %v1742_v55, %v1595_v22 }
 0x576   :  { %v1827_v47 = vmax.f32 %v1741_v56, 0.0 }
 0x577   :  { %v1746_v14 = vpop.f32.mrb[38].mxu1  ;;  %3557 = vmatprep.subr.bf16.mxu0 %v3556_v63  ;;  %v1828_v28 = vmax.f32 %v1743_v42, 0.0  ;;  %v1635_v42 = vpop.permute.xlu1 %1634 }
 0x578   :  { %v1747_v20 = vadd.f32 %v1746_v14, %v1600_v13  ;;  %v1748_v53 = vpop.f32.mrb[39].mxu1  ;;  %3559 = vmatpush1.bf16.msra.mxu0 %v3558_v38 }
 0x579   :  { %v1749_v0 = vadd.f32 %v1748_v53, %v1600_v13  ;;  %v1640_v53 = vpop.permute.xlu0 %1639 }
 0x57a   :  { %v1829_v59 = vmax.f32 %v1747_v20, 0.0 }
 0x57b   :  { %v1830_v33 = vmax.f32 %v1749_v0, 0.0  ;;  %v1752_v51 = vpop.f32.mrb[40].mxu1 }
 0x57c   :  { %v3562_v24 = vpack.c.bf16 %v1829_v59, %v1827_v47  ;;  %v1754_v31 = vpop.f32.mrb[41].mxu1  ;;  %v1753_v27 = vadd.f32 %v1752_v51, %v1605_v50 }
 0x57d   :  { %v3560_v26 = vpack.c.bf16 %v1830_v33, %v1828_v28  ;;  %v1755_v19 = vadd.f32 %v1754_v31, %v1605_v50 }
 0x57e   :  { %v1831_v45 = vmax.f32 %v1753_v27, 0.0 }
 0x57f   :  { %v1758_v41 = vpop.f32.mrb[42].mxu1  ;;  %3561 = vmatprep.subr.bf16.mxu0 %v3560_v26  ;;  %v1832_v9 = vmax.f32 %v1755_v19, 0.0  ;;  %v1645_v19 = vpop.permute.xlu1 %1644 }
 0x580   :  { %v1759_v43 = vadd.f32 %v1758_v41, %v1610_v23  ;;  %v1760_v35 = vpop.f32.mrb[43].mxu1  ;;  %3563 = vmatpush1.bf16.msra.mxu0 %v3562_v24 }
 0x581   :  { %v1761_v25 = vadd.f32 %v1760_v35, %v1610_v23  ;;  %v1650_v35 = vpop.permute.xlu0 %1649 }
 0x582   :  { %v1833_v34 = vmax.f32 %v1759_v43, 0.0 }
 0x583   :  { %v1834_v29 = vmax.f32 %v1761_v25, 0.0  ;;  %v1764_v60 = vpop.f32.mrb[44].mxu1 }
 0x584   :  { %v3566_v46 = vpack.c.bf16 %v1833_v34, %v1831_v45  ;;  %v1766_v58 = vpop.f32.mrb[45].mxu1  ;;  %v1765_v61 = vadd.f32 %v1764_v60, %v1615_v12 }
 0x585   :  { %v3564_v6 = vpack.c.bf16 %v1834_v29, %v1832_v9  ;;  %v1767_v2 = vadd.f32 %v1766_v58, %v1615_v12 }
 0x586   :  { %v1835_v16 = vmax.f32 %v1765_v61, 0.0 }
 0x587   :  { %v1770_v62 = vpop.f32.mrb[46].mxu1  ;;  %3565 = vmatprep.subr.bf16.mxu0 %v3564_v6  ;;  %v1836_v44 = vmax.f32 %v1767_v2, 0.0  ;;  %v1655_v2 = vpop.permute.xlu1 %1654 }
 0x588   :  { %v1771_v30 = vadd.f32 %v1770_v62, %v1620_v18  ;;  %v1772_v40 = vpop.f32.mrb[47].mxu1  ;;  %3567 = vmatpush1.bf16.msra.mxu0 %v3566_v46 }
 0x589   :  { %v1773_v21 = vadd.f32 %v1772_v40, %v1620_v18  ;;  %v1660_v40 = vpop.permute.xlu0 %1659 }
 0x58a   :  { %v1837_v17 = vmax.f32 %v1771_v30, 0.0 }
 0x58b   :  { %v1838_v36 = vmax.f32 %v1773_v21, 0.0  ;;  %v1776_v11 = vpop.f32.mrb[48].mxu1 }
 0x58c   :  { %v3570_v8 = vpack.c.bf16 %v1837_v17, %v1835_v16  ;;  %v1778_v37 = vpop.f32.mrb[49].mxu1  ;;  %v1777_v52 = vadd.f32 %v1776_v11, %v1625_v32 }
 0x58d   :  { %v3568_v1 = vpack.c.bf16 %v1838_v36, %v1836_v44  ;;  %v1779_v7 = vadd.f32 %v1778_v37, %v1625_v32 }
 0x58e   :  { %v1839_v48 = vmax.f32 %v1777_v52, 0.0 }
 0x58f   :  { %v1782_v39 = vpop.f32.mrb[50].mxu1  ;;  %3569 = vmatprep.subr.bf16.mxu0 %v3568_v1  ;;  %v1840_v55 = vmax.f32 %v1779_v7, 0.0  ;;  %v3301_v7 = vld [vmem:[%s5312_s3 + $0x208] sm:$0xff] }
 0x590   :  { %v1783_v3 = vadd.f32 %v1782_v39, %v1630_v4  ;;  %v1784_v57 = vpop.f32.mrb[51].mxu1  ;;  %3571 = vmatpush1.bf16.msra.mxu0 %v3570_v8  ;;  %v3302_v39 = vld [vmem:[%s5312_s3 + $0x210] sm:$0xff] }
 0x591   :  { %v1785_v54 = vadd.f32 %v1784_v57, %v1630_v4  ;;  %v3300_v4 = vld [vmem:[%s5312_s3 + $0x200] sm:$0xff] }
 0x592   :  { %v1841_v38 = vmax.f32 %v1783_v3, 0.0  ;;  %v3303_v3 = vld [vmem:[%s5312_s3 + $0x218] sm:$0xff]  ;;  %v3304_v57 = vld [vmem:[%s5312_s3 + $0x220] sm:$0xff] }
 0x593   :  { %v1842_v22 = vmax.f32 %v1785_v54, 0.0  ;;  %v1788_v63 = vpop.f32.mrb[52].mxu1  ;;  %v3305_v54 = vld [vmem:[%s5312_s3 + $0x228] sm:$0xff] }
 0x594   :  { %v3574_v56 = vpack.c.bf16 %v1841_v38, %v1839_v48  ;;  %v1790_v13 = vpop.f32.mrb[53].mxu1  ;;  %v1789_v20 = vadd.f32 %v1788_v63, %v1635_v42  ;;  %v3306_v48 = vld [vmem:[%s5312_s3 + $0x230] sm:$0xff]  ;;  %v3307_v38 = vld [vmem:[%s5312_s3 + $0x238] sm:$0xff] }
 0x595   :  { %v3572_v14 = vpack.c.bf16 %v1842_v22, %v1840_v55  ;;  %v1791_v0 = vadd.f32 %v1790_v13, %v1635_v42  ;;  %v3308_v55 = vld [vmem:[%s5312_s3 + $0x240] sm:$0xff]  ;;  %v3309_v22 = vld [vmem:[%s5312_s3 + $0x248] sm:$0xff]  ;;  %v3310_v63 = vld [vmem:[%s5312_s3 + $0x250] sm:$0xff] }
 0x596   :  { %v1843_v51 = vmax.f32 %v1789_v20, 0.0  ;;  %v3312_v13 = vld [vmem:[%s5312_s3 + $0x260] sm:$0xff]  ;;  %v3313_v42 = vld [vmem:[%s5312_s3 + $0x268] sm:$0xff]  ;;  %v3315_v20 = vld [vmem:[%s5312_s3 + $0x278] sm:$0xff] }
 0x597   :  { %v1794_v47 = vpop.f32.mrb[54].mxu1  ;;  %3573 = vmatprep.subr.bf16.mxu0 %v3572_v14  ;;  %v1844_v31 = vmax.f32 %v1791_v0, 0.0  ;;  %v3314_v14 = vld [vmem:[%s5312_s3 + $0x270] sm:$0xff] }
 0x598   :  { %v1795_v59 = vadd.f32 %v1794_v47, %v1640_v53  ;;  %v1796_v28 = vpop.f32.mrb[55].mxu1  ;;  %3575 = vmatpush1.bf16.msra.mxu0 %v3574_v56  ;;  %v3311_v56 = vld [vmem:[%s5312_s3 + $0x258] sm:$0xff]  ;;  %v1892_v47 = vpop.permute.xlu1 %1891 }
 0x599   :  { %v1797_v33 = vadd.f32 %v1796_v28, %v1640_v53  ;;  %v1897_v28 = vpop.permute.xlu0 %1896 }
 0x59a   :  { %v1845_v24 = vmax.f32 %v1795_v59, 0.0 }
 0x59b   :  { %v1846_v50 = vmax.f32 %v1797_v33, 0.0  ;;  %v1800_v26 = vpop.f32.mrb[56].mxu1 }
 0x59c   :  { %v3578_v27 = vpack.c.bf16 %v1845_v24, %v1843_v51  ;;  %v1802_v23 = vpop.f32.mrb[57].mxu1  ;;  %v1801_v43 = vadd.f32 %v1800_v26, %v1645_v19 }
 0x59d   :  { %v3576_v41 = vpack.c.bf16 %v1846_v50, %v1844_v31  ;;  %v1803_v25 = vadd.f32 %v1802_v23, %v1645_v19 }
 0x59e   :  { %v1847_v60 = vmax.f32 %v1801_v43, 0.0 }
 0x59f   :  { %v1806_v45 = vpop.f32.mrb[58].mxu1  ;;  %3577 = vmatprep.subr.bf16.mxu0 %v3576_v41  ;;  %v1848_v58 = vmax.f32 %v1803_v25, 0.0  ;;  %v1902_v25 = vpop.permute.xlu1 %1901 }
 0x5a0   :  { %v1807_v34 = vadd.f32 %v1806_v45, %v1650_v35  ;;  %v1808_v9 = vpop.f32.mrb[59].mxu1  ;;  %3579 = vmatpush1.bf16.msra.mxu0 %v3578_v27 }
 0x5a1   :  { %v1809_v29 = vadd.f32 %v1808_v9, %v1650_v35  ;;  %v1907_v9 = vpop.permute.xlu0 %1906 }
 0x5a2   :  { %v1849_v46 = vmax.f32 %v1807_v34, 0.0 }
 0x5a3   :  { %v1850_v12 = vmax.f32 %v1809_v29, 0.0  ;;  %v1812_v6 = vpop.f32.mrb[60].mxu1 }
 0x5a4   :  { %v3582_v61 = vpack.c.bf16 %v1849_v46, %v1847_v60  ;;  %v1814_v18 = vpop.f32.mrb[61].mxu1  ;;  %v1813_v30 = vadd.f32 %v1812_v6, %v1655_v2 }
 0x5a5   :  { %v3580_v62 = vpack.c.bf16 %v1850_v12, %v1848_v58  ;;  %v1815_v21 = vadd.f32 %v1814_v18, %v1655_v2 }
 0x5a6   :  { %v1851_v11 = vmax.f32 %v1813_v30, 0.0 }
 0x5a7   :  { %v1818_v16 = vpop.f32.mrb[62].mxu1  ;;  %3581 = vmatprep.subr.bf16.mxu0 %v3580_v62  ;;  %v1852_v37 = vmax.f32 %v1815_v21, 0.0  ;;  %v1912_v21 = vpop.permute.xlu1 %1911 }
 0x5a8   :  { %v1819_v17 = vadd.f32 %v1818_v16, %v1660_v40  ;;  %v1820_v44 = vpop.f32.mrb[63].mxu1  ;;  %3583 = vmatpush1.bf16.msra.mxu0 %v3582_v61 }
 0x5a9   :  { %v1821_v36 = vadd.f32 %v1820_v44, %v1660_v40  ;;  %v1917_v44 = vpop.permute.xlu0 %1916 }
 0x5aa   :  { %v1853_v8 = vmax.f32 %v1819_v17, 0.0 }
 0x5ab   :  { %v1854_v32 = vmax.f32 %v1821_v36, 0.0 }
 0x5ac   :  { %v3586_v1 = vpack.c.bf16 %v1853_v8, %v1851_v11 }
 0x5ad   :  { %v3584_v52 = vpack.c.bf16 %v1854_v32, %v1852_v37 }
 0x5af   :  { %3585 = vmatprep.subr.bf16.mxu0 %v3584_v52 }
 0x5b0   :  { %3587 = vmatpush1.bf16.msra.mxu0 %v3586_v1 }
 0x5b3   :  { %2034 = vmatmul.mubr.f32.vlgmr.msra.gmra.mrb[64].mxu0 %v3300_v4 }
 0x5b4   :  { %2039 = vmatprep.mubr.f32.mxu0 %v3785_v49 }
 0x5b7   :  { %2040 = vmatmul.mubr.f32.gmra.mrb[66].mxu0 %v3301_v7 }
 0x5b8   :  { %2045 = vmatprep.mubr.f32.mxu0 %v3785_v49 }
 0x5bb   :  { %2046 = vmatmul.mubr.f32.gmra.mrb[68].mxu0 %v3302_v39 }
 0x5bc   :  { %2051 = vmatprep.mubr.f32.mxu0 %v3785_v49 }
 0x5bf   :  { %2052 = vmatmul.mubr.f32.gmra.mrb[70].mxu0 %v3303_v3 }
 0x5c0   :  { %2057 = vmatprep.mubr.f32.mxu0 %v3785_v49 }
 0x5c3   :  { %2058 = vmatmul.mubr.f32.gmra.mrb[72].mxu0 %v3304_v57 }
 0x5c4   :  { %2063 = vmatprep.mubr.f32.mxu0 %v3785_v49 }
 0x5c7   :  { %2064 = vmatmul.mubr.f32.gmra.mrb[74].mxu0 %v3305_v54  ;;  %v1922_v54 = vpop.permute.xlu1 %1921 }
 0x5c8   :  { %2069 = vmatprep.mubr.f32.mxu0 %v3785_v49 }
 0x5cb   :  { %2070 = vmatmul.mubr.f32.gmra.mrb[76].mxu0 %v3306_v48 }
 0x5cc   :  { %2075 = vmatprep.mubr.f32.mxu0 %v3785_v49 }
 0x5cf   :  { %2076 = vmatmul.mubr.f32.gmra.mrb[78].mxu0 %v3307_v38 }
 0x5d0   :  { %2081 = vmatprep.mubr.f32.mxu0 %v3785_v49 }
 0x5d3   :  { %2082 = vmatmul.mubr.f32.gmra.mrb[80].mxu0 %v3308_v55  ;;  %v1927_v55 = vpop.permute.xlu0 %1926 }
 0x5d4   :  { %2087 = vmatprep.mubr.f32.mxu0 %v3785_v49 }
 0x5d7   :  { %2088 = vmatmul.mubr.f32.gmra.mrb[82].mxu0 %v3309_v22 }
 0x5d8   :  { %2093 = vmatprep.mubr.f32.mxu0 %v3785_v49 }
 0x5db   :  { %2094 = vmatmul.mubr.f32.gmra.mrb[84].mxu0 %v3310_v63 }
 0x5dc   :  { %2099 = vmatprep.mubr.f32.mxu0 %v3785_v49 }
 0x5df   :  { %2100 = vmatmul.mubr.f32.gmra.mrb[86].mxu0 %v3311_v56 }
 0x5e0   :  { %2105 = vmatprep.mubr.f32.mxu0 %v3785_v49 }
 0x5e3   :  { %2106 = vmatmul.mubr.f32.gmra.mrb[88].mxu0 %v3312_v13 }
 0x5e4   :  { %2111 = vmatprep.mubr.f32.mxu0 %v3785_v49 }
 0x5e7   :  { %2112 = vmatmul.mubr.f32.gmra.mrb[90].mxu0 %v3313_v42 }
 0x5e8   :  { %2117 = vmatprep.mubr.f32.mxu0 %v3785_v49 }
 0x5eb   :  { %2118 = vmatmul.mubr.f32.gmra.mrb[92].mxu0 %v3314_v14 }
 0x5ec   :  { %2123 = vmatprep.mubr.f32.mxu0 %v3785_v49 }
 0x5ef   :  { %2124 = vmatmul.mubr.f32.gmra.mrb[94].mxu0 %v3315_v20 }
 0x5f0   :  { %2647 = vmatprep.mubr.f32.mxu0 %v3785_v49 }
 0x686   :  { %v2035_v53 = vpop.f32.mrb[64].mxu0 }
 0x687   :  { %v2037_v0 = vpop.f32.mrb[65].mxu0  ;;  %v2036_v59 = vadd.f32 %v2035_v53, %v1892_v47 }
 0x688   :  { %v2038_v33 = vadd.f32 %v2037_v0, %v1892_v47 }
 0x689   :  { %v2130_v26 = vmax.f32 %v2036_v59, 0.0 }
 0x68a   :  { %v2041_v51 = vpop.f32.mrb[66].mxu0  ;;  %v2131_v23 = vmax.f32 %v2038_v33, 0.0  ;;  %v1932_v33 = vpop.permute.xlu1 %1931 }
 0x68b   :  { %v2042_v24 = vadd.f32 %v2041_v51, %v1897_v28  ;;  %v2043_v31 = vpop.f32.mrb[67].mxu0 }
 0x68c   :  { %v2044_v50 = vadd.f32 %v2043_v31, %v1897_v28  ;;  %v1937_v31 = vpop.permute.xlu0 %1936 }
 0x68d   :  { %v2132_v27 = vmax.f32 %v2042_v24, 0.0 }
 0x68e   :  { %v2133_v19 = vmax.f32 %v2044_v50, 0.0  ;;  %v2047_v41 = vpop.f32.mrb[68].mxu0 }
 0x68f   :  { %v3590_v43 = vpack.c.bf16 %v2132_v27, %v2130_v26  ;;  %v2049_v35 = vpop.f32.mrb[69].mxu0  ;;  %v2048_v34 = vadd.f32 %v2047_v41, %v1902_v25 }
 0x690   :  { %v3588_v45 = vpack.c.bf16 %v2133_v19, %v2131_v23  ;;  %v2050_v29 = vadd.f32 %v2049_v35, %v1902_v25 }
 0x691   :  { %v2134_v6 = vmax.f32 %v2048_v34, 0.0 }
 0x692   :  { %v2053_v60 = vpop.f32.mrb[70].mxu0  ;;  %3589 = vmatprep.subr.bf16.mxu1 %v3588_v45  ;;  %v2135_v18 = vmax.f32 %v2050_v29, 0.0  ;;  %v1942_v29 = vpop.permute.xlu1 %1941 }
 0x693   :  { %v2054_v46 = vadd.f32 %v2053_v60, %v1907_v9  ;;  %v2055_v58 = vpop.f32.mrb[71].mxu0  ;;  %3591 = vmatpush1.bf16.msra.mxu1 %v3590_v43 }
 0x694   :  { %v2056_v12 = vadd.f32 %v2055_v58, %v1907_v9  ;;  %v1947_v58 = vpop.permute.xlu0 %1946 }
 0x695   :  { %v2136_v61 = vmax.f32 %v2054_v46, 0.0 }
 0x696   :  { %v2137_v2 = vmax.f32 %v2056_v12, 0.0  ;;  %v2059_v62 = vpop.f32.mrb[72].mxu0 }
 0x697   :  { %v3594_v30 = vpack.c.bf16 %v2136_v61, %v2134_v6  ;;  %v2061_v40 = vpop.f32.mrb[73].mxu0  ;;  %v2060_v17 = vadd.f32 %v2059_v62, %v1912_v21 }
 0x698   :  { %v3592_v16 = vpack.c.bf16 %v2137_v2, %v2135_v18  ;;  %v2062_v36 = vadd.f32 %v2061_v40, %v1912_v21 }
 0x699   :  { %v2138_v1 = vmax.f32 %v2060_v17, 0.0 }
 0x69a   :  { %v2065_v11 = vpop.f32.mrb[74].mxu0  ;;  %3593 = vmatprep.subr.bf16.mxu1 %v3592_v16  ;;  %v2139_v4 = vmax.f32 %v2062_v36, 0.0  ;;  %v1952_v36 = vpop.permute.xlu1 %1951 }
 0x69b   :  { %v2066_v8 = vadd.f32 %v2065_v11, %v1917_v44  ;;  %v2067_v37 = vpop.f32.mrb[75].mxu0  ;;  %3595 = vmatpush1.bf16.msra.mxu1 %v3594_v30 }
 0x69c   :  { %v2068_v32 = vadd.f32 %v2067_v37, %v1917_v44  ;;  %v1957_v37 = vpop.permute.xlu0 %1956 }
 0x69d   :  { %v2140_v52 = vmax.f32 %v2066_v8, 0.0 }
 0x69e   :  { %v2141_v7 = vmax.f32 %v2068_v32, 0.0  ;;  %v2071_v39 = vpop.f32.mrb[76].mxu0 }
 0x69f   :  { %v3598_v3 = vpack.c.bf16 %v2140_v52, %v2138_v1  ;;  %v2073_v57 = vpop.f32.mrb[77].mxu0  ;;  %v2072_v38 = vadd.f32 %v2071_v39, %v1922_v54 }
 0x6a0   :  { %v3596_v48 = vpack.c.bf16 %v2141_v7, %v2139_v4  ;;  %v2074_v22 = vadd.f32 %v2073_v57, %v1922_v54 }
 0x6a1   :  { %v2142_v14 = vmax.f32 %v2072_v38, 0.0 }
 0x6a2   :  { %v2077_v63 = vpop.f32.mrb[78].mxu0  ;;  %3597 = vmatprep.subr.bf16.mxu1 %v3596_v48  ;;  %v2143_v53 = vmax.f32 %v2074_v22, 0.0  ;;  %v1962_v22 = vpop.permute.xlu1 %1961 }
 0x6a3   :  { %v2078_v56 = vadd.f32 %v2077_v63, %v1927_v55  ;;  %v2079_v13 = vpop.f32.mrb[79].mxu0  ;;  %3599 = vmatpush1.bf16.msra.mxu1 %v3598_v3 }
 0x6a4   :  { %v2080_v42 = vadd.f32 %v2079_v13, %v1927_v55  ;;  %v1967_v13 = vpop.permute.xlu0 %1966 }
 0x6a5   :  { %v2144_v20 = vmax.f32 %v2078_v56, 0.0 }
 0x6a6   :  { %v2145_v0 = vmax.f32 %v2080_v42, 0.0  ;;  %v2083_v47 = vpop.f32.mrb[80].mxu0 }
 0x6a7   :  { %v3602_v59 = vpack.c.bf16 %v2144_v20, %v2142_v14  ;;  %v2085_v28 = vpop.f32.mrb[81].mxu0  ;;  %v2084_v24 = vadd.f32 %v2083_v47, %v1932_v33 }
 0x6a8   :  { %v3600_v51 = vpack.c.bf16 %v2145_v0, %v2143_v53  ;;  %v2086_v50 = vadd.f32 %v2085_v28, %v1932_v33 }
 0x6a9   :  { %v2146_v41 = vmax.f32 %v2084_v24, 0.0 }
 0x6aa   :  { %v2089_v26 = vpop.f32.mrb[82].mxu0  ;;  %3601 = vmatprep.subr.bf16.mxu1 %v3600_v51  ;;  %v2147_v35 = vmax.f32 %v2086_v50, 0.0  ;;  %v3333_v50 = vld [vmem:[%s5312_s3 + $0x288] sm:$0xff] }
 0x6ab   :  { %v2090_v27 = vadd.f32 %v2089_v26, %v1937_v31  ;;  %v2091_v23 = vpop.f32.mrb[83].mxu0  ;;  %3603 = vmatpush1.bf16.msra.mxu1 %v3602_v59  ;;  %v3334_v26 = vld [vmem:[%s5312_s3 + $0x290] sm:$0xff] }
 0x6ac   :  { %v2092_v19 = vadd.f32 %v2091_v23, %v1937_v31  ;;  %v3332_v31 = vld [vmem:[%s5312_s3 + $0x280] sm:$0xff] }
 0x6ad   :  { %v2148_v43 = vmax.f32 %v2090_v27, 0.0  ;;  %v3335_v27 = vld [vmem:[%s5312_s3 + $0x298] sm:$0xff]  ;;  %v3336_v23 = vld [vmem:[%s5312_s3 + $0x2a0] sm:$0xff] }
 0x6ae   :  { %v2149_v25 = vmax.f32 %v2092_v19, 0.0  ;;  %v2095_v45 = vpop.f32.mrb[84].mxu0  ;;  %v3337_v19 = vld [vmem:[%s5312_s3 + $0x2a8] sm:$0xff] }
 0x6af   :  { %v3606_v34 = vpack.c.bf16 %v2148_v43, %v2146_v41  ;;  %v2097_v9 = vpop.f32.mrb[85].mxu0  ;;  %v2096_v46 = vadd.f32 %v2095_v45, %v1942_v29  ;;  %v3338_v41 = vld [vmem:[%s5312_s3 + $0x2b0] sm:$0xff]  ;;  %v3339_v43 = vld [vmem:[%s5312_s3 + $0x2b8] sm:$0xff] }
 0x6b0   :  { %v3604_v60 = vpack.c.bf16 %v2149_v25, %v2147_v35  ;;  %v2098_v12 = vadd.f32 %v2097_v9, %v1942_v29  ;;  %v3340_v35 = vld [vmem:[%s5312_s3 + $0x2c0] sm:$0xff]  ;;  %v3341_v25 = vld [vmem:[%s5312_s3 + $0x2c8] sm:$0xff]  ;;  %v3342_v45 = vld [vmem:[%s5312_s3 + $0x2d0] sm:$0xff] }
 0x6b1   :  { %v2150_v62 = vmax.f32 %v2096_v46, 0.0  ;;  %v3344_v9 = vld [vmem:[%s5312_s3 + $0x2e0] sm:$0xff]  ;;  %v3345_v29 = vld [vmem:[%s5312_s3 + $0x2e8] sm:$0xff]  ;;  %v3347_v46 = vld [vmem:[%s5312_s3 + $0x2f8] sm:$0xff] }
 0x6b2   :  { %v2101_v6 = vpop.f32.mrb[86].mxu0  ;;  %3605 = vmatprep.subr.bf16.mxu1 %v3604_v60  ;;  %v2151_v40 = vmax.f32 %v2098_v12, 0.0  ;;  %v3346_v60 = vld [vmem:[%s5312_s3 + $0x2f0] sm:$0xff] }
 0x6b3   :  { %v2102_v61 = vadd.f32 %v2101_v6, %v1947_v58  ;;  %v2103_v18 = vpop.f32.mrb[87].mxu0  ;;  %3607 = vmatpush1.bf16.msra.mxu1 %v3606_v34  ;;  %v3343_v34 = vld [vmem:[%s5312_s3 + $0x2d8] sm:$0xff]  ;;  %v2199_v6 = vpop.permute.xlu1 %2198 }
 0x6b4   :  { %v2104_v2 = vadd.f32 %v2103_v18, %v1947_v58  ;;  %v2204_v18 = vpop.permute.xlu0 %2203 }
 0x6b5   :  { %v2152_v30 = vmax.f32 %v2102_v61, 0.0 }
 0x6b6   :  { %v2153_v21 = vmax.f32 %v2104_v2, 0.0  ;;  %v2107_v16 = vpop.f32.mrb[88].mxu0 }
 0x6b7   :  { %v3610_v17 = vpack.c.bf16 %v2152_v30, %v2150_v62  ;;  %v2109_v44 = vpop.f32.mrb[89].mxu0  ;;  %v2108_v8 = vadd.f32 %v2107_v16, %v1952_v36 }
 0x6b8   :  { %v3608_v11 = vpack.c.bf16 %v2153_v21, %v2151_v40  ;;  %v2110_v32 = vadd.f32 %v2109_v44, %v1952_v36 }
 0x6b9   :  { %v2154_v39 = vmax.f32 %v2108_v8, 0.0 }
 0x6ba   :  { %v2113_v1 = vpop.f32.mrb[90].mxu0  ;;  %3609 = vmatprep.subr.bf16.mxu1 %v3608_v11  ;;  %v2155_v57 = vmax.f32 %v2110_v32, 0.0  ;;  %v2209_v32 = vpop.permute.xlu1 %2208 }
 0x6bb   :  { %v2114_v52 = vadd.f32 %v2113_v1, %v1957_v37  ;;  %v2115_v4 = vpop.f32.mrb[91].mxu0  ;;  %3611 = vmatpush1.bf16.msra.mxu1 %v3610_v17 }
 0x6bc   :  { %v2116_v7 = vadd.f32 %v2115_v4, %v1957_v37  ;;  %v2214_v4 = vpop.permute.xlu0 %2213 }
 0x6bd   :  { %v2156_v3 = vmax.f32 %v2114_v52, 0.0 }
 0x6be   :  { %v2157_v54 = vmax.f32 %v2116_v7, 0.0  ;;  %v2119_v48 = vpop.f32.mrb[92].mxu0 }
 0x6bf   :  { %v3614_v38 = vpack.c.bf16 %v2156_v3, %v2154_v39  ;;  %v2121_v55 = vpop.f32.mrb[93].mxu0  ;;  %v2120_v56 = vadd.f32 %v2119_v48, %v1962_v22 }
 0x6c0   :  { %v3612_v63 = vpack.c.bf16 %v2157_v54, %v2155_v57  ;;  %v2122_v42 = vadd.f32 %v2121_v55, %v1962_v22 }
 0x6c1   :  { %v2158_v47 = vmax.f32 %v2120_v56, 0.0 }
 0x6c2   :  { %v2125_v14 = vpop.f32.mrb[94].mxu0  ;;  %3613 = vmatprep.subr.bf16.mxu1 %v3612_v63  ;;  %v2159_v28 = vmax.f32 %v2122_v42, 0.0  ;;  %v2219_v42 = vpop.permute.xlu1 %2218 }
 0x6c3   :  { %v2126_v20 = vadd.f32 %v2125_v14, %v1967_v13  ;;  %v2127_v53 = vpop.f32.mrb[95].mxu0  ;;  %3615 = vmatpush1.bf16.msra.mxu1 %v3614_v38 }
 0x6c4   :  { %v2128_v0 = vadd.f32 %v2127_v53, %v1967_v13  ;;  %v2224_v53 = vpop.permute.xlu0 %2223 }
 0x6c5   :  { %v2160_v59 = vmax.f32 %v2126_v20, 0.0 }
 0x6c6   :  { %v2161_v33 = vmax.f32 %v2128_v0, 0.0 }
 0x6c7   :  { %v3618_v51 = vpack.c.bf16 %v2160_v59, %v2158_v47 }
 0x6c8   :  { %v3616_v24 = vpack.c.bf16 %v2161_v33, %v2159_v28 }
 0x6ca   :  { %3617 = vmatprep.subr.bf16.mxu1 %v3616_v24 }
 0x6cb   :  { %3619 = vmatpush1.bf16.msra.mxu1 %v3618_v51 }
 0x6ce   :  { %2341 = vmatmul.mubr.f32.vlgmr.msra.gmra.mrb[64].mxu1 %v3332_v31 }
 0x6cf   :  { %2346 = vmatprep.mubr.f32.mxu1 %v3785_v49 }
 0x6d2   :  { %2347 = vmatmul.mubr.f32.gmra.mrb[66].mxu1 %v3333_v50 }
 0x6d3   :  { %2352 = vmatprep.mubr.f32.mxu1 %v3785_v49 }
 0x6d6   :  { %2353 = vmatmul.mubr.f32.gmra.mrb[68].mxu1 %v3334_v26 }
 0x6d7   :  { %2358 = vmatprep.mubr.f32.mxu1 %v3785_v49 }
 0x6da   :  { %2359 = vmatmul.mubr.f32.gmra.mrb[70].mxu1 %v3335_v27 }
 0x6db   :  { %2364 = vmatprep.mubr.f32.mxu1 %v3785_v49 }
 0x6de   :  { %2365 = vmatmul.mubr.f32.gmra.mrb[72].mxu1 %v3336_v23 }
 0x6df   :  { %2370 = vmatprep.mubr.f32.mxu1 %v3785_v49 }
 0x6e2   :  { %2371 = vmatmul.mubr.f32.gmra.mrb[74].mxu1 %v3337_v19  ;;  %v2229_v19 = vpop.permute.xlu1 %2228 }
 0x6e3   :  { %2376 = vmatprep.mubr.f32.mxu1 %v3785_v49 }
 0x6e6   :  { %2377 = vmatmul.mubr.f32.gmra.mrb[76].mxu1 %v3338_v41 }
 0x6e7   :  { %2382 = vmatprep.mubr.f32.mxu1 %v3785_v49 }
 0x6ea   :  { %2383 = vmatmul.mubr.f32.gmra.mrb[78].mxu1 %v3339_v43 }
 0x6eb   :  { %2388 = vmatprep.mubr.f32.mxu1 %v3785_v49 }
 0x6ee   :  { %2389 = vmatmul.mubr.f32.gmra.mrb[80].mxu1 %v3340_v35  ;;  %v2234_v35 = vpop.permute.xlu0 %2233 }
 0x6ef   :  { %2394 = vmatprep.mubr.f32.mxu1 %v3785_v49 }
 0x6f2   :  { %2395 = vmatmul.mubr.f32.gmra.mrb[82].mxu1 %v3341_v25 }
 0x6f3   :  { %2400 = vmatprep.mubr.f32.mxu1 %v3785_v49 }
 0x6f6   :  { %2401 = vmatmul.mubr.f32.gmra.mrb[84].mxu1 %v3342_v45 }
 0x6f7   :  { %2406 = vmatprep.mubr.f32.mxu1 %v3785_v49 }
 0x6fa   :  { %2407 = vmatmul.mubr.f32.gmra.mrb[86].mxu1 %v3343_v34 }
 0x6fb   :  { %2412 = vmatprep.mubr.f32.mxu1 %v3785_v49 }
 0x6fe   :  { %2413 = vmatmul.mubr.f32.gmra.mrb[88].mxu1 %v3344_v9 }
 0x6ff   :  { %2418 = vmatprep.mubr.f32.mxu1 %v3785_v49 }
 0x702   :  { %2419 = vmatmul.mubr.f32.gmra.mrb[90].mxu1 %v3345_v29 }
 0x703   :  { %2424 = vmatprep.mubr.f32.mxu1 %v3785_v49 }
 0x706   :  { %2425 = vmatmul.mubr.f32.gmra.mrb[92].mxu1 %v3346_v60 }
 0x707   :  { %2430 = vmatprep.mubr.f32.mxu1 %v3785_v49 }
 0x70a   :  { %2431 = vmatmul.mubr.f32.gmra.mrb[94].mxu1 %v3347_v46 }
 0x70b   :  { %2954 = vmatprep.mubr.f32.mxu1 %v3785_v49 }
 0x7a1   :  { %v2342_v58 = vpop.f32.mrb[64].mxu1 }
 0x7a2   :  { %v2344_v12 = vpop.f32.mrb[65].mxu1  ;;  %v2343_v61 = vadd.f32 %v2342_v58, %v2199_v6 }
 0x7a3   :  { %v2345_v2 = vadd.f32 %v2344_v12, %v2199_v6 }
 0x7a4   :  { %v2437_v16 = vmax.f32 %v2343_v61, 0.0 }
 0x7a5   :  { %v2348_v62 = vpop.f32.mrb[66].mxu1  ;;  %v2438_v44 = vmax.f32 %v2345_v2, 0.0  ;;  %v2239_v2 = vpop.permute.xlu1 %2238 }
 0x7a6   :  { %v2349_v30 = vadd.f32 %v2348_v62, %v2204_v18  ;;  %v2350_v40 = vpop.f32.mrb[67].mxu1 }
 0x7a7   :  { %v2351_v21 = vadd.f32 %v2350_v40, %v2204_v18  ;;  %v2244_v40 = vpop.permute.xlu0 %2243 }
 0x7a8   :  { %v2439_v17 = vmax.f32 %v2349_v30, 0.0 }
 0x7a9   :  { %v2440_v36 = vmax.f32 %v2351_v21, 0.0  ;;  %v2354_v11 = vpop.f32.mrb[68].mxu1 }
 0x7aa   :  { %v3622_v8 = vpack.c.bf16 %v2439_v17, %v2437_v16  ;;  %v2356_v37 = vpop.f32.mrb[69].mxu1  ;;  %v2355_v52 = vadd.f32 %v2354_v11, %v2209_v32 }
 0x7ab   :  { %v3620_v1 = vpack.c.bf16 %v2440_v36, %v2438_v44  ;;  %v2357_v7 = vadd.f32 %v2356_v37, %v2209_v32 }
 0x7ac   :  { %v2441_v48 = vmax.f32 %v2355_v52, 0.0 }
 0x7ad   :  { %v2360_v39 = vpop.f32.mrb[70].mxu1  ;;  %3621 = vmatprep.subr.bf16.mxu0 %v3620_v1  ;;  %v2442_v55 = vmax.f32 %v2357_v7, 0.0  ;;  %v2249_v7 = vpop.permute.xlu1 %2248 }
 0x7ae   :  { %v2361_v3 = vadd.f32 %v2360_v39, %v2214_v4  ;;  %v2362_v57 = vpop.f32.mrb[71].mxu1  ;;  %3623 = vmatpush1.bf16.msra.mxu0 %v3622_v8 }
 0x7af   :  { %v2363_v54 = vadd.f32 %v2362_v57, %v2214_v4  ;;  %v2254_v57 = vpop.permute.xlu0 %2253 }
 0x7b0   :  { %v2443_v38 = vmax.f32 %v2361_v3, 0.0 }
 0x7b1   :  { %v2444_v22 = vmax.f32 %v2363_v54, 0.0  ;;  %v2366_v63 = vpop.f32.mrb[72].mxu1 }
 0x7b2   :  { %v3626_v56 = vpack.c.bf16 %v2443_v38, %v2441_v48  ;;  %v2368_v13 = vpop.f32.mrb[73].mxu1  ;;  %v2367_v20 = vadd.f32 %v2366_v63, %v2219_v42 }
 0x7b3   :  { %v3624_v14 = vpack.c.bf16 %v2444_v22, %v2442_v55  ;;  %v2369_v0 = vadd.f32 %v2368_v13, %v2219_v42 }
 0x7b4   :  { %v2445_v51 = vmax.f32 %v2367_v20, 0.0 }
 0x7b5   :  { %v2372_v47 = vpop.f32.mrb[74].mxu1  ;;  %3625 = vmatprep.subr.bf16.mxu0 %v3624_v14  ;;  %v2446_v31 = vmax.f32 %v2369_v0, 0.0  ;;  %v2259_v0 = vpop.permute.xlu1 %2258 }
 0x7b6   :  { %v2373_v59 = vadd.f32 %v2372_v47, %v2224_v53  ;;  %v2374_v28 = vpop.f32.mrb[75].mxu1  ;;  %3627 = vmatpush1.bf16.msra.mxu0 %v3626_v56 }
 0x7b7   :  { %v2375_v33 = vadd.f32 %v2374_v28, %v2224_v53  ;;  %v2264_v28 = vpop.permute.xlu0 %2263 }
 0x7b8   :  { %v2447_v24 = vmax.f32 %v2373_v59, 0.0 }
 0x7b9   :  { %v2448_v50 = vmax.f32 %v2375_v33, 0.0  ;;  %v2378_v26 = vpop.f32.mrb[76].mxu1 }
 0x7ba   :  { %v3630_v27 = vpack.c.bf16 %v2447_v24, %v2445_v51  ;;  %v2380_v23 = vpop.f32.mrb[77].mxu1  ;;  %v2379_v43 = vadd.f32 %v2378_v26, %v2229_v19 }
 0x7bb   :  { %v3628_v41 = vpack.c.bf16 %v2448_v50, %v2446_v31  ;;  %v2381_v25 = vadd.f32 %v2380_v23, %v2229_v19 }
 0x7bc   :  { %v2449_v60 = vmax.f32 %v2379_v43, 0.0 }
 0x7bd   :  { %v2384_v45 = vpop.f32.mrb[78].mxu1  ;;  %3629 = vmatprep.subr.bf16.mxu0 %v3628_v41  ;;  %v2450_v58 = vmax.f32 %v2381_v25, 0.0  ;;  %v2269_v25 = vpop.permute.xlu1 %2268 }
 0x7be   :  { %v2385_v34 = vadd.f32 %v2384_v45, %v2234_v35  ;;  %v2386_v9 = vpop.f32.mrb[79].mxu1  ;;  %3631 = vmatpush1.bf16.msra.mxu0 %v3630_v27 }
 0x7bf   :  { %v2387_v29 = vadd.f32 %v2386_v9, %v2234_v35  ;;  %v2274_v9 = vpop.permute.xlu0 %2273 }
 0x7c0   :  { %v2451_v46 = vmax.f32 %v2385_v34, 0.0 }
 0x7c1   :  { %v2452_v12 = vmax.f32 %v2387_v29, 0.0  ;;  %v2390_v6 = vpop.f32.mrb[80].mxu1 }
 0x7c2   :  { %v3634_v61 = vpack.c.bf16 %v2451_v46, %v2449_v60  ;;  %v2392_v18 = vpop.f32.mrb[81].mxu1  ;;  %v2391_v30 = vadd.f32 %v2390_v6, %v2239_v2 }
 0x7c3   :  { %v3632_v62 = vpack.c.bf16 %v2452_v12, %v2450_v58  ;;  %v2393_v21 = vadd.f32 %v2392_v18, %v2239_v2 }
 0x7c4   :  { %v2453_v11 = vmax.f32 %v2391_v30, 0.0 }
 0x7c5   :  { %v2396_v16 = vpop.f32.mrb[82].mxu1  ;;  %3633 = vmatprep.subr.bf16.mxu0 %v3632_v62  ;;  %v2454_v37 = vmax.f32 %v2393_v21, 0.0  ;;  %v3365_v21 = vld [vmem:[%s5312_s3 + $0x308] sm:$0xff] }
 0x7c6   :  { %v2397_v17 = vadd.f32 %v2396_v16, %v2244_v40  ;;  %v2398_v44 = vpop.f32.mrb[83].mxu1  ;;  %3635 = vmatpush1.bf16.msra.mxu0 %v3634_v61  ;;  %v3366_v16 = vld [vmem:[%s5312_s3 + $0x310] sm:$0xff] }
 0x7c7   :  { %v2399_v36 = vadd.f32 %v2398_v44, %v2244_v40  ;;  %v3364_v40 = vld [vmem:[%s5312_s3 + $0x300] sm:$0xff] }
 0x7c8   :  { %v2455_v8 = vmax.f32 %v2397_v17, 0.0  ;;  %v3367_v17 = vld [vmem:[%s5312_s3 + $0x318] sm:$0xff]  ;;  %v3368_v44 = vld [vmem:[%s5312_s3 + $0x320] sm:$0xff] }
 0x7c9   :  { %v2456_v32 = vmax.f32 %v2399_v36, 0.0  ;;  %v2402_v1 = vpop.f32.mrb[84].mxu1  ;;  %v3369_v36 = vld [vmem:[%s5312_s3 + $0x328] sm:$0xff] }
 0x7ca   :  { %v3638_v52 = vpack.c.bf16 %v2455_v8, %v2453_v11  ;;  %v2404_v4 = vpop.f32.mrb[85].mxu1  ;;  %v2403_v3 = vadd.f32 %v2402_v1, %v2249_v7  ;;  %v3370_v11 = vld [vmem:[%s5312_s3 + $0x330] sm:$0xff]  ;;  %v3371_v8 = vld [vmem:[%s5312_s3 + $0x338] sm:$0xff] }
 0x7cb   :  { %v3636_v39 = vpack.c.bf16 %v2456_v32, %v2454_v37  ;;  %v2405_v54 = vadd.f32 %v2404_v4, %v2249_v7  ;;  %v3372_v37 = vld [vmem:[%s5312_s3 + $0x340] sm:$0xff]  ;;  %v3373_v32 = vld [vmem:[%s5312_s3 + $0x348] sm:$0xff]  ;;  %v3374_v1 = vld [vmem:[%s5312_s3 + $0x350] sm:$0xff] }
 0x7cc   :  { %v2457_v63 = vmax.f32 %v2403_v3, 0.0  ;;  %v3376_v4 = vld [vmem:[%s5312_s3 + $0x360] sm:$0xff]  ;;  %v3377_v7 = vld [vmem:[%s5312_s3 + $0x368] sm:$0xff]  ;;  %v3379_v3 = vld [vmem:[%s5312_s3 + $0x378] sm:$0xff] }
 0x7cd   :  { %v2408_v48 = vpop.f32.mrb[86].mxu1  ;;  %3637 = vmatprep.subr.bf16.mxu0 %v3636_v39  ;;  %v2458_v13 = vmax.f32 %v2405_v54, 0.0  ;;  %v3378_v39 = vld [vmem:[%s5312_s3 + $0x370] sm:$0xff] }
 0x7ce   :  { %v2409_v38 = vadd.f32 %v2408_v48, %v2254_v57  ;;  %v2410_v55 = vpop.f32.mrb[87].mxu1  ;;  %3639 = vmatpush1.bf16.msra.mxu0 %v3638_v52  ;;  %v3375_v52 = vld [vmem:[%s5312_s3 + $0x358] sm:$0xff]  ;;  %v2506_v48 = vpop.permute.xlu1 %2505 }
 0x7cf   :  { %v2411_v22 = vadd.f32 %v2410_v55, %v2254_v57  ;;  %v2511_v55 = vpop.permute.xlu0 %2510 }
 0x7d0   :  { %v2459_v56 = vmax.f32 %v2409_v38, 0.0 }
 0x7d1   :  { %v2460_v42 = vmax.f32 %v2411_v22, 0.0  ;;  %v2414_v14 = vpop.f32.mrb[88].mxu1 }
 0x7d2   :  { %v3642_v20 = vpack.c.bf16 %v2459_v56, %v2457_v63  ;;  %v2416_v53 = vpop.f32.mrb[89].mxu1  ;;  %v2415_v59 = vadd.f32 %v2414_v14, %v2259_v0 }
 0x7d3   :  { %v3640_v47 = vpack.c.bf16 %v2460_v42, %v2458_v13  ;;  %v2417_v33 = vadd.f32 %v2416_v53, %v2259_v0 }
 0x7d4   :  { %v2461_v26 = vmax.f32 %v2415_v59, 0.0 }
 0x7d5   :  { %v2420_v51 = vpop.f32.mrb[90].mxu1  ;;  %3641 = vmatprep.subr.bf16.mxu0 %v3640_v47  ;;  %v2462_v23 = vmax.f32 %v2417_v33, 0.0  ;;  %v2516_v33 = vpop.permute.xlu1 %2515 }
 0x7d6   :  { %v2421_v24 = vadd.f32 %v2420_v51, %v2264_v28  ;;  %v2422_v31 = vpop.f32.mrb[91].mxu1  ;;  %3643 = vmatpush1.bf16.msra.mxu0 %v3642_v20 }
 0x7d7   :  { %v2423_v50 = vadd.f32 %v2422_v31, %v2264_v28  ;;  %v2521_v31 = vpop.permute.xlu0 %2520 }
 0x7d8   :  { %v2463_v27 = vmax.f32 %v2421_v24, 0.0 }
 0x7d9   :  { %v2464_v19 = vmax.f32 %v2423_v50, 0.0  ;;  %v2426_v41 = vpop.f32.mrb[92].mxu1 }
 0x7da   :  { %v3646_v43 = vpack.c.bf16 %v2463_v27, %v2461_v26  ;;  %v2428_v35 = vpop.f32.mrb[93].mxu1  ;;  %v2427_v34 = vadd.f32 %v2426_v41, %v2269_v25 }
 0x7db   :  { %v3644_v45 = vpack.c.bf16 %v2464_v19, %v2462_v23  ;;  %v2429_v29 = vadd.f32 %v2428_v35, %v2269_v25 }
 0x7dc   :  { %v2465_v6 = vmax.f32 %v2427_v34, 0.0 }
 0x7dd   :  { %v2432_v60 = vpop.f32.mrb[94].mxu1  ;;  %3645 = vmatprep.subr.bf16.mxu0 %v3644_v45  ;;  %v2466_v18 = vmax.f32 %v2429_v29, 0.0  ;;  %v2526_v29 = vpop.permute.xlu1 %2525 }
 0x7de   :  { %v2433_v46 = vadd.f32 %v2432_v60, %v2274_v9  ;;  %v2434_v58 = vpop.f32.mrb[95].mxu1  ;;  %3647 = vmatpush1.bf16.msra.mxu0 %v3646_v43 }
 0x7df   :  { %v2435_v12 = vadd.f32 %v2434_v58, %v2274_v9  ;;  %v2531_v58 = vpop.permute.xlu0 %2530 }
 0x7e0   :  { %v2467_v61 = vmax.f32 %v2433_v46, 0.0 }
 0x7e1   :  { %v2468_v2 = vmax.f32 %v2435_v12, 0.0 }
 0x7e2   :  { %v3650_v62 = vpack.c.bf16 %v2467_v61, %v2465_v6 }
 0x7e3   :  { %v3648_v30 = vpack.c.bf16 %v2468_v2, %v2466_v18 }
 0x7e5   :  { %3649 = vmatprep.subr.bf16.mxu0 %v3648_v30 }
 0x7e6   :  { %3651 = vmatpush1.bf16.msra.mxu0 %v3650_v62 }
 0x7e9   :  { %2648 = vmatmul.mubr.f32.vlgmr.msra.gmra.mrb[96].mxu0 %v3364_v40 }
 0x7ea   :  { %2653 = vmatprep.mubr.f32.mxu0 %v3785_v49 }
 0x7ed   :  { %2654 = vmatmul.mubr.f32.gmra.mrb[98].mxu0 %v3365_v21 }
 0x7ee   :  { %2659 = vmatprep.mubr.f32.mxu0 %v3785_v49 }
 0x7f1   :  { %2660 = vmatmul.mubr.f32.gmra.mrb[100].mxu0 %v3366_v16 }
 0x7f2   :  { %2665 = vmatprep.mubr.f32.mxu0 %v3785_v49 }
 0x7f5   :  { %2666 = vmatmul.mubr.f32.gmra.mrb[102].mxu0 %v3367_v17 }
 0x7f6   :  { %2671 = vmatprep.mubr.f32.mxu0 %v3785_v49 }
 0x7f9   :  { %2672 = vmatmul.mubr.f32.gmra.mrb[104].mxu0 %v3368_v44 }
 0x7fa   :  { %2677 = vmatprep.mubr.f32.mxu0 %v3785_v49 }
 0x7fd   :  { %2678 = vmatmul.mubr.f32.gmra.mrb[106].mxu0 %v3369_v36  ;;  %v2536_v36 = vpop.permute.xlu1 %2535 }
 0x7fe   :  { %2683 = vmatprep.mubr.f32.mxu0 %v3785_v49 }
 0x801   :  { %2684 = vmatmul.mubr.f32.gmra.mrb[108].mxu0 %v3370_v11 }
 0x802   :  { %2689 = vmatprep.mubr.f32.mxu0 %v3785_v49 }
 0x805   :  { %2690 = vmatmul.mubr.f32.gmra.mrb[110].mxu0 %v3371_v8 }
 0x806   :  { %2695 = vmatprep.mubr.f32.mxu0 %v3785_v49 }
 0x809   :  { %2696 = vmatmul.mubr.f32.gmra.mrb[112].mxu0 %v3372_v37  ;;  %v2541_v37 = vpop.permute.xlu0 %2540 }
 0x80a   :  { %2701 = vmatprep.mubr.f32.mxu0 %v3785_v49 }
 0x80d   :  { %2702 = vmatmul.mubr.f32.gmra.mrb[114].mxu0 %v3373_v32 }
 0x80e   :  { %2707 = vmatprep.mubr.f32.mxu0 %v3785_v49 }
 0x811   :  { %2708 = vmatmul.mubr.f32.gmra.mrb[116].mxu0 %v3374_v1 }
 0x812   :  { %2713 = vmatprep.mubr.f32.mxu0 %v3785_v49 }
 0x815   :  { %2714 = vmatmul.mubr.f32.gmra.mrb[118].mxu0 %v3375_v52 }
 0x816   :  { %2719 = vmatprep.mubr.f32.mxu0 %v3785_v49 }
 0x819   :  { %2720 = vmatmul.mubr.f32.gmra.mrb[120].mxu0 %v3376_v4 }
 0x81a   :  { %2725 = vmatprep.mubr.f32.mxu0 %v3785_v49 }
 0x81d   :  { %2726 = vmatmul.mubr.f32.gmra.mrb[122].mxu0 %v3377_v7 }
 0x81e   :  { %2731 = vmatprep.mubr.f32.mxu0 %v3785_v49 }
 0x821   :  { %2732 = vmatmul.mubr.f32.gmra.mrb[124].mxu0 %v3378_v39 }
 0x822   :  { %2737 = vmatprep.mubr.f32.mxu0 %v3785_v49 }
 0x825   :  { %2738 = vmatmul.mubr.f32.gmra.mrb[126].mxu0 %v3379_v3 }
 0x826   :  { %3148 = vmatprep.mubr.f32.mxu0 %v3785_v49 }
 0x8bc   :  { %v2649_v57 = vpop.f32.mrb[96].mxu0 }
 0x8bd   :  { %v2651_v54 = vpop.f32.mrb[97].mxu0  ;;  %v2650_v38 = vadd.f32 %v2649_v57, %v2506_v48 }
 0x8be   :  { %v2652_v22 = vadd.f32 %v2651_v54, %v2506_v48 }
 0x8bf   :  { %v2744_v14 = vmax.f32 %v2650_v38, 0.0 }
 0x8c0   :  { %v2655_v63 = vpop.f32.mrb[98].mxu0  ;;  %v2745_v53 = vmax.f32 %v2652_v22, 0.0  ;;  %v2546_v22 = vpop.permute.xlu1 %2545 }
 0x8c1   :  { %v2656_v56 = vadd.f32 %v2655_v63, %v2511_v55  ;;  %v2657_v13 = vpop.f32.mrb[99].mxu0 }
 0x8c2   :  { %v2658_v42 = vadd.f32 %v2657_v13, %v2511_v55  ;;  %v2551_v13 = vpop.permute.xlu0 %2550 }
 0x8c3   :  { %v2746_v20 = vmax.f32 %v2656_v56, 0.0 }
 0x8c4   :  { %v2747_v0 = vmax.f32 %v2658_v42, 0.0  ;;  %v2661_v47 = vpop.f32.mrb[100].mxu0 }
 0x8c5   :  { %v3654_v59 = vpack.c.bf16 %v2746_v20, %v2744_v14  ;;  %v2663_v28 = vpop.f32.mrb[101].mxu0  ;;  %v2662_v24 = vadd.f32 %v2661_v47, %v2516_v33 }
 0x8c6   :  { %v3652_v51 = vpack.c.bf16 %v2747_v0, %v2745_v53  ;;  %v2664_v50 = vadd.f32 %v2663_v28, %v2516_v33 }
 0x8c7   :  { %v2748_v41 = vmax.f32 %v2662_v24, 0.0 }
 0x8c8   :  { %v2667_v26 = vpop.f32.mrb[102].mxu0  ;;  %3653 = vmatprep.subr.bf16.mxu1 %v3652_v51  ;;  %v2749_v35 = vmax.f32 %v2664_v50, 0.0  ;;  %v2556_v50 = vpop.permute.xlu1 %2555 }
 0x8c9   :  { %v2668_v27 = vadd.f32 %v2667_v26, %v2521_v31  ;;  %v2669_v23 = vpop.f32.mrb[103].mxu0  ;;  %3655 = vmatpush1.bf16.msra.mxu1 %v3654_v59 }
 0x8ca   :  { %v2670_v19 = vadd.f32 %v2669_v23, %v2521_v31  ;;  %v2561_v23 = vpop.permute.xlu0 %2560 }
 0x8cb   :  { %v2750_v43 = vmax.f32 %v2668_v27, 0.0 }
 0x8cc   :  { %v2751_v25 = vmax.f32 %v2670_v19, 0.0  ;;  %v2673_v45 = vpop.f32.mrb[104].mxu0 }
 0x8cd   :  { %v3658_v34 = vpack.c.bf16 %v2750_v43, %v2748_v41  ;;  %v2675_v9 = vpop.f32.mrb[105].mxu0  ;;  %v2674_v46 = vadd.f32 %v2673_v45, %v2526_v29 }
 0x8ce   :  { %v3656_v60 = vpack.c.bf16 %v2751_v25, %v2749_v35  ;;  %v2676_v12 = vadd.f32 %v2675_v9, %v2526_v29 }
 0x8cf   :  { %v2752_v62 = vmax.f32 %v2674_v46, 0.0 }
 0x8d0   :  { %v2679_v6 = vpop.f32.mrb[106].mxu0  ;;  %3657 = vmatprep.subr.bf16.mxu1 %v3656_v60  ;;  %v2753_v40 = vmax.f32 %v2676_v12, 0.0  ;;  %v2566_v12 = vpop.permute.xlu1 %2565 }
 0x8d1   :  { %v2680_v61 = vadd.f32 %v2679_v6, %v2531_v58  ;;  %v2681_v18 = vpop.f32.mrb[107].mxu0  ;;  %3659 = vmatpush1.bf16.msra.mxu1 %v3658_v34 }
 0x8d2   :  { %v2682_v2 = vadd.f32 %v2681_v18, %v2531_v58  ;;  %v2571_v18 = vpop.permute.xlu0 %2570 }
 0x8d3   :  { %v2754_v30 = vmax.f32 %v2680_v61, 0.0 }
 0x8d4   :  { %v2755_v21 = vmax.f32 %v2682_v2, 0.0  ;;  %v2685_v16 = vpop.f32.mrb[108].mxu0 }
 0x8d5   :  { %v3662_v17 = vpack.c.bf16 %v2754_v30, %v2752_v62  ;;  %v2687_v44 = vpop.f32.mrb[109].mxu0  ;;  %v2686_v8 = vadd.f32 %v2685_v16, %v2536_v36 }
 0x8d6   :  { %v3660_v11 = vpack.c.bf16 %v2755_v21, %v2753_v40  ;;  %v2688_v32 = vadd.f32 %v2687_v44, %v2536_v36 }
 0x8d7   :  { %v2756_v39 = vmax.f32 %v2686_v8, 0.0 }
 0x8d8   :  { %v2691_v1 = vpop.f32.mrb[110].mxu0  ;;  %3661 = vmatprep.subr.bf16.mxu1 %v3660_v11  ;;  %v2757_v57 = vmax.f32 %v2688_v32, 0.0  ;;  %v2576_v32 = vpop.permute.xlu1 %2575 }
 0x8d9   :  { %v2692_v52 = vadd.f32 %v2691_v1, %v2541_v37  ;;  %v2693_v4 = vpop.f32.mrb[111].mxu0  ;;  %3663 = vmatpush1.bf16.msra.mxu1 %v3662_v17 }
 0x8da   :  { %v2694_v7 = vadd.f32 %v2693_v4, %v2541_v37  ;;  %v2581_v4 = vpop.permute.xlu0 %2580 }
 0x8db   :  { %v2758_v3 = vmax.f32 %v2692_v52, 0.0 }
 0x8dc   :  { %v2759_v54 = vmax.f32 %v2694_v7, 0.0  ;;  %v2697_v48 = vpop.f32.mrb[112].mxu0 }
 0x8dd   :  { %v3666_v38 = vpack.c.bf16 %v2758_v3, %v2756_v39  ;;  %v2699_v55 = vpop.f32.mrb[113].mxu0  ;;  %v2698_v56 = vadd.f32 %v2697_v48, %v2546_v22 }
 0x8de   :  { %v3664_v63 = vpack.c.bf16 %v2759_v54, %v2757_v57  ;;  %v2700_v42 = vadd.f32 %v2699_v55, %v2546_v22 }
 0x8df   :  { %v2760_v47 = vmax.f32 %v2698_v56, 0.0 }
 0x8e0   :  { %v2703_v14 = vpop.f32.mrb[114].mxu0  ;;  %3665 = vmatprep.subr.bf16.mxu1 %v3664_v63  ;;  %v2761_v28 = vmax.f32 %v2700_v42, 0.0  ;;  %v3397_v42 = vld [vmem:[%s5312_s3 + $0x388] sm:$0xff] }
 0x8e1   :  { %v2704_v20 = vadd.f32 %v2703_v14, %v2551_v13  ;;  %v2705_v53 = vpop.f32.mrb[115].mxu0  ;;  %3667 = vmatpush1.bf16.msra.mxu1 %v3666_v38  ;;  %v3398_v14 = vld [vmem:[%s5312_s3 + $0x390] sm:$0xff] }
 0x8e2   :  { %v2706_v0 = vadd.f32 %v2705_v53, %v2551_v13  ;;  %v3396_v13 = vld [vmem:[%s5312_s3 + $0x380] sm:$0xff] }
 0x8e3   :  { %v2762_v59 = vmax.f32 %v2704_v20, 0.0  ;;  %v3399_v20 = vld [vmem:[%s5312_s3 + $0x398] sm:$0xff]  ;;  %v3400_v53 = vld [vmem:[%s5312_s3 + $0x3a0] sm:$0xff] }
 0x8e4   :  { %v2763_v33 = vmax.f32 %v2706_v0, 0.0  ;;  %v2709_v51 = vpop.f32.mrb[116].mxu0  ;;  %v3401_v0 = vld [vmem:[%s5312_s3 + $0x3a8] sm:$0xff] }
 0x8e5   :  { %v3670_v24 = vpack.c.bf16 %v2762_v59, %v2760_v47  ;;  %v2711_v31 = vpop.f32.mrb[117].mxu0  ;;  %v2710_v27 = vadd.f32 %v2709_v51, %v2556_v50  ;;  %v3402_v47 = vld [vmem:[%s5312_s3 + $0x3b0] sm:$0xff]  ;;  %v3403_v59 = vld [vmem:[%s5312_s3 + $0x3b8] sm:$0xff] }
 0x8e6   :  { %v3668_v26 = vpack.c.bf16 %v2763_v33, %v2761_v28  ;;  %v2712_v19 = vadd.f32 %v2711_v31, %v2556_v50  ;;  %v3404_v28 = vld [vmem:[%s5312_s3 + $0x3c0] sm:$0xff]  ;;  %v3405_v33 = vld [vmem:[%s5312_s3 + $0x3c8] sm:$0xff]  ;;  %v3406_v51 = vld [vmem:[%s5312_s3 + $0x3d0] sm:$0xff] }
 0x8e7   :  { %v2764_v45 = vmax.f32 %v2710_v27, 0.0  ;;  %v3408_v31 = vld [vmem:[%s5312_s3 + $0x3e0] sm:$0xff]  ;;  %v3409_v50 = vld [vmem:[%s5312_s3 + $0x3e8] sm:$0xff]  ;;  %v3411_v27 = vld [vmem:[%s5312_s3 + $0x3f8] sm:$0xff] }
 0x8e8   :  { %v2715_v41 = vpop.f32.mrb[118].mxu0  ;;  %3669 = vmatprep.subr.bf16.mxu1 %v3668_v26  ;;  %v2765_v9 = vmax.f32 %v2712_v19, 0.0  ;;  %v3410_v26 = vld [vmem:[%s5312_s3 + $0x3f0] sm:$0xff] }
 0x8e9   :  { %v2716_v43 = vadd.f32 %v2715_v41, %v2561_v23  ;;  %v2717_v35 = vpop.f32.mrb[119].mxu0  ;;  %3671 = vmatpush1.bf16.msra.mxu1 %v3670_v24  ;;  %v3407_v24 = vld [vmem:[%s5312_s3 + $0x3d8] sm:$0xff]  ;;  %v2813_v41 = vpop.permute.xlu1 %2812 }
 0x8ea   :  { %v2718_v25 = vadd.f32 %v2717_v35, %v2561_v23  ;;  %v2818_v35 = vpop.permute.xlu0 %2817 }
 0x8eb   :  { %v2766_v34 = vmax.f32 %v2716_v43, 0.0 }
 0x8ec   :  { %v2767_v29 = vmax.f32 %v2718_v25, 0.0  ;;  %v2721_v60 = vpop.f32.mrb[120].mxu0 }
 0x8ed   :  { %v3674_v46 = vpack.c.bf16 %v2766_v34, %v2764_v45  ;;  %v2723_v58 = vpop.f32.mrb[121].mxu0  ;;  %v2722_v61 = vadd.f32 %v2721_v60, %v2566_v12 }
 0x8ee   :  { %v3672_v6 = vpack.c.bf16 %v2767_v29, %v2765_v9  ;;  %v2724_v2 = vadd.f32 %v2723_v58, %v2566_v12 }
 0x8ef   :  { %v2768_v16 = vmax.f32 %v2722_v61, 0.0 }
 0x8f0   :  { %v2727_v62 = vpop.f32.mrb[122].mxu0  ;;  %3673 = vmatprep.subr.bf16.mxu1 %v3672_v6  ;;  %v2769_v44 = vmax.f32 %v2724_v2, 0.0 }
 0x8f1   :  { %v2728_v30 = vadd.f32 %v2727_v62, %v2571_v18  ;;  %v2729_v40 = vpop.f32.mrb[123].mxu0  ;;  %3675 = vmatpush1.bf16.msra.mxu1 %v3674_v46 }
 0x8f2   :  { %v2730_v21 = vadd.f32 %v2729_v40, %v2571_v18  ;;  %v2823_v18 = vpop.permute.xlu1 %2822 }
 0x8f3   :  { %v2770_v17 = vmax.f32 %v2728_v30, 0.0  ;;  %v2828_v30 = vpop.permute.xlu0 %2827 }
 0x8f4   :  { %v2771_v36 = vmax.f32 %v2730_v21, 0.0  ;;  %v2733_v11 = vpop.f32.mrb[124].mxu0 }
 0x8f5   :  { %v3678_v8 = vpack.c.bf16 %v2770_v17, %v2768_v16  ;;  %v2735_v37 = vpop.f32.mrb[125].mxu0  ;;  %v2734_v52 = vadd.f32 %v2733_v11, %v2576_v32 }
 0x8f6   :  { %v3676_v1 = vpack.c.bf16 %v2771_v36, %v2769_v44  ;;  %v2736_v7 = vadd.f32 %v2735_v37, %v2576_v32 }
 0x8f7   :  { %v2772_v48 = vmax.f32 %v2734_v52, 0.0 }
 0x8f8   :  { %v2739_v39 = vpop.f32.mrb[126].mxu0  ;;  %3677 = vmatprep.subr.bf16.mxu1 %v3676_v1  ;;  %v2773_v55 = vmax.f32 %v2736_v7, 0.0 }
 0x8f9   :  { %v2740_v3 = vadd.f32 %v2739_v39, %v2581_v4  ;;  %v2741_v57 = vpop.f32.mrb[127].mxu0  ;;  %3679 = vmatpush1.bf16.msra.mxu1 %v3678_v8 }
 0x8fa   :  { %v2742_v54 = vadd.f32 %v2741_v57, %v2581_v4  ;;  %v2833_v4 = vpop.permute.xlu1 %2832 }
 0x8fb   :  { %v2774_v38 = vmax.f32 %v2740_v3, 0.0  ;;  %v2838_v3 = vpop.permute.xlu0 %2837 }
 0x8fc   :  { %v2775_v22 = vmax.f32 %v2742_v54, 0.0 }
 0x8fd   :  { %v3682_v63 = vpack.c.bf16 %v2774_v38, %v2772_v48 }
 0x8fe   :  { %v3680_v56 = vpack.c.bf16 %v2775_v22, %v2773_v55 }
 0x900   :  { %3681 = vmatprep.subr.bf16.mxu1 %v3680_v56 }
 0x901   :  { %3683 = vmatpush1.bf16.msra.mxu1 %v3682_v63 }
 0x904   :  { %2955 = vmatmul.mubr.f32.vlgmr.msra.gmra.mrb[96].mxu1 %v3396_v13 }
 0x905   :  { %2960 = vmatprep.mubr.f32.mxu1 %v3785_v49 }
 0x908   :  { %2961 = vmatmul.mubr.f32.gmra.mrb[98].mxu1 %v3397_v42 }
 0x909   :  { %2966 = vmatprep.mubr.f32.mxu1 %v3785_v49 }
 0x90c   :  { %2967 = vmatmul.mubr.f32.gmra.mrb[100].mxu1 %v3398_v14 }
 0x90d   :  { %2972 = vmatprep.mubr.f32.mxu1 %v3785_v49 }
 0x910   :  { %2973 = vmatmul.mubr.f32.gmra.mrb[102].mxu1 %v3399_v20 }
 0x911   :  { %2978 = vmatprep.mubr.f32.mxu1 %v3785_v49 }
 0x914   :  { %2979 = vmatmul.mubr.f32.gmra.mrb[104].mxu1 %v3400_v53  ;;  %v2843_v53 = vpop.permute.xlu1 %2842 }
 0x915   :  { %2984 = vmatprep.mubr.f32.mxu1 %v3785_v49 }
 0x918   :  { %2985 = vmatmul.mubr.f32.gmra.mrb[106].mxu1 %v3401_v0 }
 0x919   :  { %2990 = vmatprep.mubr.f32.mxu1 %v3785_v49 }
 0x91c   :  { %2991 = vmatmul.mubr.f32.gmra.mrb[108].mxu1 %v3402_v47 }
 0x91d   :  { %2996 = vmatprep.mubr.f32.mxu1 %v3785_v49 }
 0x920   :  { %2997 = vmatmul.mubr.f32.gmra.mrb[110].mxu1 %v3403_v59  ;;  %v2848_v59 = vpop.permute.xlu0 %2847 }
 0x921   :  { %3002 = vmatprep.mubr.f32.mxu1 %v3785_v49 }
 0x924   :  { %3003 = vmatmul.mubr.f32.gmra.mrb[112].mxu1 %v3404_v28 }
 0x925   :  { %3008 = vmatprep.mubr.f32.mxu1 %v3785_v49 }
 0x928   :  { %3009 = vmatmul.mubr.f32.gmra.mrb[114].mxu1 %v3405_v33 }
 0x929   :  { %3014 = vmatprep.mubr.f32.mxu1 %v3785_v49 }
 0x92c   :  { %3015 = vmatmul.mubr.f32.gmra.mrb[116].mxu1 %v3406_v51 }
 0x92d   :  { %3020 = vmatprep.mubr.f32.mxu1 %v3785_v49 }
 0x930   :  { %3021 = vmatmul.mubr.f32.gmra.mrb[118].mxu1 %v3407_v24 }
 0x931   :  { %3026 = vmatprep.mubr.f32.mxu1 %v3785_v49 }
 0x934   :  { %3027 = vmatmul.mubr.f32.gmra.mrb[120].mxu1 %v3408_v31 }
 0x935   :  { %3032 = vmatprep.mubr.f32.mxu1 %v3785_v49 }
 0x938   :  { %3033 = vmatmul.mubr.f32.gmra.mrb[122].mxu1 %v3409_v50 }
 0x939   :  { %3038 = vmatprep.mubr.f32.mxu1 %v3785_v49 }
 0x93c   :  { %3039 = vmatmul.mubr.f32.gmra.mrb[124].mxu1 %v3410_v26 }
 0x93d   :  { %3044 = vmatprep.mubr.f32.mxu1 %v3785_v49 }
 0x940   :  { %3045 = vmatmul.mubr.f32.gmra.mrb[126].mxu1 %v3411_v27 }
 0x9d7   :  { %v2956_v23 = vpop.f32.mrb[96].mxu1 }
 0x9d8   :  { %v2958_v19 = vpop.f32.mrb[97].mxu1  ;;  %v2957_v43 = vadd.f32 %v2956_v23, %v2813_v41 }
 0x9d9   :  { %v2959_v25 = vadd.f32 %v2958_v19, %v2813_v41 }
 0x9da   :  { %v3051_v60 = vmax.f32 %v2957_v43, 0.0 }
 0x9db   :  { %v2962_v45 = vpop.f32.mrb[98].mxu1  ;;  %v3052_v58 = vmax.f32 %v2959_v25, 0.0 }
 0x9dc   :  { %v2963_v34 = vadd.f32 %v2962_v45, %v2818_v35  ;;  %v2964_v9 = vpop.f32.mrb[99].mxu1 }
 0x9dd   :  { %v2965_v29 = vadd.f32 %v2964_v9, %v2818_v35  ;;  %v2853_v35 = vpop.permute.xlu1 %2852 }
 0x9de   :  { %v3053_v46 = vmax.f32 %v2963_v34, 0.0  ;;  %v2858_v34 = vpop.permute.xlu0 %2857 }
 0x9df   :  { %v3054_v12 = vmax.f32 %v2965_v29, 0.0  ;;  %v2968_v49 = vpop.f32.mrb[100].mxu1 }
 0x9e0   :  { %v3686_v6 = vpack.c.bf16 %v3053_v46, %v3051_v60  ;;  %v2970_v61 = vpop.f32.mrb[101].mxu1  ;;  %v2969_v62 = vadd.f32 %v2968_v49, %v2823_v18 }
 0x9e1   :  { %v3684_v2 = vpack.c.bf16 %v3054_v12, %v3052_v58  ;;  %v2971_v40 = vadd.f32 %v2970_v61, %v2823_v18 }
 0x9e2   :  { %v3055_v36 = vmax.f32 %v2969_v62, 0.0 }
 0x9e3   :  { %v2974_v21 = vpop.f32.mrb[102].mxu1  ;;  %3685 = vmatprep.subr.bf16.mxu0 %v3684_v2  ;;  %v3056_v8 = vmax.f32 %v2971_v40, 0.0 }
 0x9e4   :  { %v2975_v16 = vadd.f32 %v2974_v21, %v2828_v30  ;;  %v2976_v17 = vpop.f32.mrb[103].mxu1  ;;  %3687 = vmatpush1.bf16.msra.mxu0 %v3686_v6 }
 0x9e5   :  { %v2977_v44 = vadd.f32 %v2976_v17, %v2828_v30  ;;  %v2863_v30 = vpop.permute.xlu1 %2862 }
 0x9e6   :  { %v3057_v11 = vmax.f32 %v2975_v16, 0.0  ;;  %v2868_v16 = vpop.permute.xlu0 %2867 }
 0x9e7   :  { %v3058_v37 = vmax.f32 %v2977_v44, 0.0  ;;  %v2980_v32 = vpop.f32.mrb[104].mxu1 }
 0x9e8   :  { %v3690_v1 = vpack.c.bf16 %v3057_v11, %v3055_v36  ;;  %v2982_v52 = vpop.f32.mrb[105].mxu1  ;;  %v2981_v39 = vadd.f32 %v2980_v32, %v2833_v4 }
 0x9e9   :  { %v3688_v7 = vpack.c.bf16 %v3058_v37, %v3056_v8  ;;  %v2983_v57 = vadd.f32 %v2982_v52, %v2833_v4 }
 0x9ea   :  { %v3059_v22 = vmax.f32 %v2981_v39, 0.0 }
 0x9eb   :  { %v2986_v54 = vpop.f32.mrb[106].mxu1  ;;  %3689 = vmatprep.subr.bf16.mxu0 %v3688_v7  ;;  %v3060_v56 = vmax.f32 %v2983_v57, 0.0 }
 0x9ec   :  { %v2987_v48 = vadd.f32 %v2986_v54, %v2838_v3  ;;  %v2988_v38 = vpop.f32.mrb[107].mxu1  ;;  %3691 = vmatpush1.bf16.msra.mxu0 %v3690_v1 }
 0x9ed   :  { %v2989_v55 = vadd.f32 %v2988_v38, %v2838_v3  ;;  %v2873_v3 = vpop.permute.xlu1 %2872 }
 0x9ee   :  { %v3061_v63 = vmax.f32 %v2987_v48, 0.0  ;;  %v2878_v48 = vpop.permute.xlu0 %2877 }
 0x9ef   :  { %v3062_v13 = vmax.f32 %v2989_v55, 0.0  ;;  %v2992_v42 = vpop.f32.mrb[108].mxu1 }
 0x9f0   :  { %v3694_v14 = vpack.c.bf16 %v3061_v63, %v3059_v22  ;;  %v2994_v20 = vpop.f32.mrb[109].mxu1  ;;  %v2993_v47 = vadd.f32 %v2992_v42, %v2843_v53 }
 0x9f1   :  { %v3692_v0 = vpack.c.bf16 %v3062_v13, %v3060_v56  ;;  %v2995_v28 = vadd.f32 %v2994_v20, %v2843_v53 }
 0x9f2   :  { %v3063_v50 = vmax.f32 %v2993_v47, 0.0 }
 0x9f3   :  { %v2998_v33 = vpop.f32.mrb[110].mxu1  ;;  %3693 = vmatprep.subr.bf16.mxu0 %v3692_v0  ;;  %v3064_v27 = vmax.f32 %v2995_v28, 0.0 }
 0x9f4   :  { %v2999_v51 = vadd.f32 %v2998_v33, %v2848_v59  ;;  %v3000_v24 = vpop.f32.mrb[111].mxu1  ;;  %3695 = vmatpush1.bf16.msra.mxu0 %v3694_v14 }
 0x9f5   :  { %v3001_v31 = vadd.f32 %v3000_v24, %v2848_v59  ;;  %v2883_v59 = vpop.permute.xlu1 %2882 }
 0x9f6   :  { %v3065_v26 = vmax.f32 %v2999_v51, 0.0  ;;  %v2888_v51 = vpop.permute.xlu0 %2887 }
 0x9f7   :  { %v3066_v23 = vmax.f32 %v3001_v31, 0.0  ;;  %v3004_v19 = vpop.f32.mrb[112].mxu1 }
 0x9f8   :  { %v3698_v41 = vpack.c.bf16 %v3065_v26, %v3063_v50  ;;  %v3006_v43 = vpop.f32.mrb[113].mxu1  ;;  %v3005_v45 = vadd.f32 %v3004_v19, %v2853_v35 }
 0x9f9   :  { %v3696_v25 = vpack.c.bf16 %v3066_v23, %v3064_v27  ;;  %v3007_v9 = vadd.f32 %v3006_v43, %v2853_v35 }
 0x9fa   :  { %v3067_v12 = vmax.f32 %v3005_v45, 0.0  ;;  %v3083_v45 = vld [vmem:[%s5314_s5] sm:$0xff]  ;;  %s3758_s5 = scalar_lea.vmem %s3197_s1, 32 }
 0x9fb   :  { %v3010_v29 = vpop.f32.mrb[114].mxu1  ;;  %3697 = vmatprep.subr.bf16.mxu0 %v3696_v25  ;;  %v3068_v6 = vmax.f32 %v3007_v9, 0.0  ;;  %p3759_p0 = scmp.ne.s32.totalorder %s3197_s1, %s3758_s5  ;;  %p3764_p2 = scmp.lt.s32.totalorder %s3758_s5, %s3758_s5 }
 0x9fc   :  { %v3011_v60 = vadd.f32 %v3010_v29, %v2858_v34  ;;  %v3012_v46 = vpop.f32.mrb[115].mxu1  ;;  %3699 = vmatpush1.bf16.msra.mxu0 %v3698_v41  ;;  %v3159_v29 = vpop.permute.xlu1 %3158 }
 0x9fd   :  { %v3013_v58 = vadd.f32 %v3012_v46, %v2858_v34  ;;  %v3786_v34 = vmov 1966171168   ;;  %v3164_v46 = vrot.slane %v3159_v29, %v4095_v15  ;;  %p3765_p3 = por %p3764_p2, %p3763_p1 }
 0x9fe   :  { %v3069_v49 = vmax.f32 %v3011_v60, 0.0  ;;  %v3171_v9 = vunpack.c.l.s4 %v3786_v34 }
 0x9ff   :  { %v3070_v61 = vmax.f32 %v3013_v58, 0.0  ;;  %v3016_v18 = vpop.f32.mrb[116].mxu1  ;;  %p3766_p4 = pnand %p3765_p3, %p3759_p0 }
 0xa00   :  { %v3702_v2 = vpack.c.bf16 %v3069_v49, %v3067_v12  ;;  %v3018_v62 = vpop.f32.mrb[117].mxu1  ;;  %v3017_v21 = vadd.f32 %v3016_v18, %v2863_v30  ;;  %v3172_v60 = vunpack.c.0.s8 %v3171_v9 }
 0xa01   :  { %v3700_v40 = vpack.c.bf16 %v3070_v61, %v3068_v6  ;;  %v3019_v17 = vadd.f32 %v3018_v62, %v2863_v30 }
 0xa02   :  { %v3071_v37 = vmax.f32 %v3017_v21, 0.0  ;;  %v3175_v61 = vsub.s32 %v3172_v60, %v4083_v10 }
 0xa03   :  { %v3022_v44 = vpop.f32.mrb[118].mxu1  ;;  %3701 = vmatprep.subr.bf16.mxu0 %v3700_v40  ;;  %v3072_v1 = vmax.f32 %v3019_v17, 0.0 }
 0xa04   :  { %v3023_v36 = vadd.f32 %v3022_v44, %v2868_v16  ;;  %v3024_v11 = vpop.f32.mrb[119].mxu1  ;;  %3703 = vmatpush1.bf16.msra.mxu0 %v3702_v2 }
 0xa05   :  { %v3025_v8 = vadd.f32 %v3024_v11, %v2868_v16 }
 0xa06   :  { %v3073_v32 = vmax.f32 %v3023_v36, 0.0 }
 0xa07   :  { %v3074_v52 = vmax.f32 %v3025_v8, 0.0  ;;  %v3028_v4 = vpop.f32.mrb[120].mxu1 }
 0xa08   :  { %v3706_v7 = vpack.c.bf16 %v3073_v32, %v3071_v37  ;;  %v3030_v39 = vpop.f32.mrb[121].mxu1  ;;  %v3029_v54 = vadd.f32 %v3028_v4, %v2873_v3 }
 0xa09   :  { %v3704_v57 = vpack.c.bf16 %v3074_v52, %v3072_v1  ;;  %v3031_v38 = vadd.f32 %v3030_v39, %v2873_v3 }
 0xa0a   :  { %v3075_v13 = vmax.f32 %v3029_v54, 0.0 }
 0xa0b   :  { %v3034_v55 = vpop.f32.mrb[122].mxu1  ;;  %3705 = vmatprep.subr.bf16.mxu0 %v3704_v57  ;;  %v3076_v14 = vmax.f32 %v3031_v38, 0.0 }
 0xa0c   :  { %v3035_v22 = vadd.f32 %v3034_v55, %v2878_v48  ;;  %v3036_v63 = vpop.f32.mrb[123].mxu1  ;;  %3707 = vmatpush1.bf16.msra.mxu0 %v3706_v7 }
 0xa0d   :  { %v3037_v56 = vadd.f32 %v3036_v63, %v2878_v48 }
 0xa0e   :  { %v3077_v42 = vmax.f32 %v3035_v22, 0.0 }
 0xa0f   :  { %v3078_v20 = vmax.f32 %v3037_v56, 0.0  ;;  %v3040_v53 = vpop.f32.mrb[124].mxu1 }
 0xa10   :  { %v3710_v0 = vpack.c.bf16 %v3077_v42, %v3075_v13  ;;  %v3042_v47 = vpop.f32.mrb[125].mxu1  ;;  %v3041_v33 = vadd.f32 %v3040_v53, %v2883_v59 }
 0xa11   :  { %v3708_v28 = vpack.c.bf16 %v3078_v20, %v3076_v14  ;;  %v3043_v24 = vadd.f32 %v3042_v47, %v2883_v59 }
 0xa12   :  { %v3079_v23 = vmax.f32 %v3041_v33, 0.0 }
 0xa13   :  { %v3046_v31 = vpop.f32.mrb[126].mxu1  ;;  %3709 = vmatprep.subr.bf16.mxu0 %v3708_v28  ;;  %v3080_v41 = vmax.f32 %v3043_v24, 0.0 }
 0xa14   :  { %v3047_v50 = vadd.f32 %v3046_v31, %v2888_v51  ;;  %v3048_v26 = vpop.f32.mrb[127].mxu1  ;;  %3711 = vmatpush1.bf16.msra.mxu0 %v3710_v0 }
 0xa15   :  { %v3049_v27 = vadd.f32 %v3048_v26, %v2888_v51 }
 0xa16   :  { %v3081_v19 = vmax.f32 %v3047_v50, 0.0 }
 0xa17   :  { %v3082_v43 = vmax.f32 %v3049_v27, 0.0 }
 0xa18   :  { %v3714_v35 = vpack.c.bf16 %v3081_v19, %v3079_v23 }
 0xa19   :  { %v3712_v25 = vpack.c.bf16 %v3082_v43, %v3080_v41 }
 0xa1b   :  { %3713 = vmatprep.subr.bf16.mxu0 %v3712_v25 }
 0xa1c   :  { %3715 = vmatpush1.bf16.msra.mxu0 %v3714_v35 }
 0xa1f   :  { %3149 = vmatmul.mubr.f32.vlgmr.msra.gmra.mrb[128].mxu0 %v3083_v45 }
 0xaf2   :  { %v3150_v58 = vpop.f32.mrb[128].mxu0 }
 0xaf3   :  { %v3165_v12 = vadd.f32 %v3164_v46, %v3150_v58  ;;  %v3152_v49 = vpop.f32.mrb[129].mxu0 }
 0xaf4   :  { %v3166_v6 = vadd.f32 %v3164_v46, %v3152_v49 }
 0xaf6   :  { %v3169_v18 = vcombine.low %v3165_v12, %v3166_v6 }
 0xaf8   :  { %v3176_v2 = vrot.slane %v3169_v18, %v3175_v61 }
 0xafa   :  { %v3183_v62 = vrot.slane %v3176_v2, %v3175_v61 }
 0xafc   :  { %3189 = vst.msk [vmem:[#allocation3] sm:$0x3] %vm3187_vm0, %v3183_v62 }
 0xafd   :  { %3769 = shalt.err (!%p3766_p4)
}
 0xafe   :  { %s3770_s16 = scalar_lea.hbm %s5316_s7, 32 }
 0xaff   :  { %p3771_p5 = scmp.ne.s32.totalorder %s5316_s7, %s3770_s16  ;;  %p3774_p6 = scmp.lt.u32.totalorder %s3770_s16, %s5316_s7 }
 0xb01   :  { %p3776_p7 = pnand %p3774_p6, %p3771_p5 }
 0xb03   :  { %3779 = shalt.err (!%p3776_p7)
}
 0xb04   :  { %3199 = dma.vmem_to_hbm [thread:$0]  %s3197_s1, 32, %s5316_s7, [#allocation4]  }
 0xb05   :  { %3780 = dma.done.wait [#allocation4], 32  }
 0xb06   :  { %3781 = vsyncadd [#allocation4], 4294967264 }
 0xb07   :  { %3203 = vsyncpa [#allocation4], 1 }

</bundles_post_ra>
